<compile_context>
chip_gen: v5e
topology: v5e:2x2
jax: 0.10.0
libtpu: 0.0.40
codegen_flags: <defaults>
</compile_context>

<pallas_src>
import numpy as np
import jax
import jax.numpy as jnp
from jax import lax
from jax.experimental import pallas as pl
from jax.experimental.pallas import tpu as pltpu

# ----------------------------- configuration -----------------------------

H = W = 32             # canvas / source image size
HT = WT = 32           # target image & mask size
HW = H * W             # 1024 = 8 * 128 lanes per channel
C_IMG = 3
NUM_CLASSES = 8
SOURCE_ID = 3
TARGET_ID = 5
EPS = 1.0
BLUR_R = 3             # 7-tap truncated Gaussian; sigma = |v5| + EPS (data dependent)
N_TAPS = 2 * BLUR_R + 1
LANES = 128
CHUNK = 128            # lane-chunk of the warp (keeps live set < ~40 vregs)
N_CHUNKS = HW // CHUNK
N_GROUPS = 1 + C_IMG   # blurred mask + 3 image channels stacked in the warp LHS

# per-candidate SMEM scalar slots
P_PX, P_PY, P_CX, P_CY, P_CT, P_ST, P_SXW, P_SYH, P_WMAX, P_HMAX, P_BLUR = range(11)
N_PARAMS = P_BLUR + N_TAPS   # 17


def _band_matrices():
    """Constant edge-clamped banded-Toeplitz indicator matrices for the blur."""
    r = np.arange(HT)[:, None]
    c = np.arange(WT)[None, :]
    rows = np.stack([(np.clip(r + k, 0, HT - 1) == c)
                     for k in range(-BLUR_R, BLUR_R + 1)]).astype(np.float32)
    cols = np.stack([(np.clip(c + k, 0, WT - 1) == r)
                     for k in range(-BLUR_R, BLUR_R + 1)]).astype(np.float32)
    return rows, cols


_BAND_ROWS, _BAND_COLS = _band_matrices()     # (7, 32, 32) each, constant


# ----------------------------- fused Pallas kernel -----------------------------

def _fused_kernel(params_sm, band_r_ref, band_c_ref, img_s_ref, img_t_ref,
                  mask_ref, w_ref, b_ref, o_ref, lhs_ref):
    f32 = jnp.float32
    i = pl.program_id(0)

    # per-candidate scalars (SMEM -> sregs; splat on use, no lane extracts)
    px = params_sm[i, P_PX]
    py = params_sm[i, P_PY]
    cx = params_sm[i, P_CX]
    cy = params_sm[i, P_CY]
    ct = params_sm[i, P_CT]
    st = params_sm[i, P_ST]
    sxw = params_sm[i, P_SXW]
    syh = params_sm[i, P_SYH]
    wmax = params_sm[i, P_WMAX]
    hmax = params_sm[i, P_HMAX]

    # ---- Gaussian blur of the paste mask: weighted sum of constant band matrices
    #      (only the sigma-dependent tap weights are applied in-kernel), then two
    #      small MXU matmuls.
    blur_rows = params_sm[i, P_BLUR] * band_r_ref[0]
    blur_cols = params_sm[i, P_BLUR] * band_c_ref[0]
    for k in range(1, N_TAPS):
        wk = params_sm[i, P_BLUR + k]
        blur_rows = blur_rows + wk * band_r_ref[k]
        blur_cols = blur_cols + wk * band_c_ref[k]
    mask_blur = jnp.dot(
        blur_rows,
        jnp.dot(mask_ref[...], blur_cols, preferred_element_type=f32),
        preferred_element_type=f32)                                     # (32, 32)

    # ---- stacked warp LHS in VMEM scratch: [mask_blur ; img_t ch0 ; ch1 ; ch2]
    lhs_ref[0:HT, :] = mask_blur
    lhs_ref[HT:N_GROUPS * HT, :] = img_t_ref[...]

    acc = jnp.zeros((NUM_CLASSES, CHUNK), f32)    # classifier partials (1 vreg)
    d2 = jnp.zeros((1, CHUNK), f32)               # SSD partials

    for c in range(N_CHUNKS):
        # inverse-affine warp coordinates (resize+rotate+translate) for this chunk
        p_f = (lax.broadcasted_iota(jnp.int32, (1, CHUNK), 1) + c * CHUNK).astype(f32)
        r_f = jnp.floor(p_f * (1.0 / float(W)))       # exact: divide by power of two
        c_f = p_f - float(W) * r_f
        lx = c_f - px
        ly = r_f - py
        dx = lx - cx
        dy = ly - cy
        sx = cx + ct * dx - st * dy                   # inverse rotation about box center
        sy = cy + st * dx + ct * dy
        tx = (sx + 0.5) * sxw - 0.5                   # resized-box -> target coords
        ty = (sy + 0.5) * syh - 0.5
        valid = (lx >= 0.0) & (lx <= wmax) & (ly >= 0.0) & (ly <= hmax)
        inb = (tx >= 0.0) & (tx <= float(WT - 1)) & (ty >= 0.0) & (ty <= float(HT - 1))
        pm = (valid & inb).astype(f32)                                  # (1, CHUNK)

        # separable bilinear tent weights for this lane chunk
        q_i = lax.broadcasted_iota(jnp.int32, (HT, CHUNK), 0).astype(f32)
        wx = jnp.maximum(0.0, 1.0 - jnp.abs(q_i - tx))                  # (32, CHUNK)
        wy = jnp.maximum(0.0, 1.0 - jnp.abs(q_i - ty))                  # (32, CHUNK)

        # one fused MXU matmul warps the blurred mask and all 3 channels at once
        vh = jnp.dot(lhs_ref[...], wx, preferred_element_type=f32)      # (128, CHUNK)

        alpha = jnp.sum(vh[0:HT, :] * wy, axis=0, keepdims=True) * pm   # (1, CHUNK)
        sl = slice(c * CHUNK, (c + 1) * CHUNK)
        for ch in range(C_IMG):
            fg = jnp.sum(vh[(ch + 1) * HT:(ch + 2) * HT, :] * wy,
                         axis=0, keepdims=True)                         # (1, CHUNK)
            back = img_s_ref[ch:ch + 1, sl]                             # (1, CHUNK)
            t = alpha * (fg - back)            # == sample - back (paste delta)
            sample = back + t                  # == back*(1-alpha) + fg*alpha
            acc = acc + sample * w_ref[ch, :, sl]                       # (8, CHUNK)
            d2 = d2 + t * t

    # ---- logits, softmax prob of target class (confidence), exp(-MSE) stealthiness
    logits = jnp.sum(acc, axis=1, keepdims=True) + b_ref[...]           # (8, 1)
    mx = jnp.max(logits, axis=0, keepdims=True)
    ex = jnp.exp(logits - mx)
    onehot = (lax.broadcasted_iota(jnp.int32, (NUM_CLASSES, 1), 0) == TARGET_ID).astype(f32)
    conf = jnp.sum(ex * onehot, axis=0, keepdims=True) / jnp.sum(ex, axis=0, keepdims=True)
    ssd = jnp.sum(d2, axis=1, keepdims=True)
    stealth = jnp.exp(-ssd * (1.0 / float(C_IMG * HW)))                 # (1, 1)

    # compute_score_from_output (exact nested branching)
    score = jnp.where(
        conf < 0.01, -1.0 + stealth,
        jnp.where(conf + stealth < 1.0, conf,
                  jnp.where(stealth < 0.5, conf + stealth,
                            jnp.where(conf < 1.0, 2.0 + conf, 2.0 + conf + stealth))))

    o_ref[...] = jnp.broadcast_to(score, (1, 1, LANES))                 # single lane-dense row


# ----------------------------- wrapper -----------------------------

def _fused_forward(params, band_rows, band_cols, img_s_flat, img_t_rows, mask, w_t, bias):
    b = params.shape[0]
    grid_spec = pltpu.PrefetchScalarGridSpec(
        num_scalar_prefetch=1,                     # params -> SMEM scalars
        grid=(b,),
        in_specs=[
            pl.BlockSpec((N_TAPS, HT, WT), lambda i, p: (0, 0, 0)),     # constant bands
            pl.BlockSpec((N_TAPS, HT, WT), lambda i, p: (0, 0, 0)),
            pl.BlockSpec((C_IMG, HW), lambda i, p: (0, 0)),             # source, lane-dense
            pl.BlockSpec((C_IMG * HT, WT), lambda i, p: (0, 0)),        # target, row-stacked
            pl.BlockSpec((HT, WT), lambda i, p: (0, 0)),                # paste mask
            pl.BlockSpec((C_IMG, NUM_CLASSES, HW), lambda i, p: (0, 0, 0)),
            pl.BlockSpec((NUM_CLASSES, 1), lambda i, p: (0, 0)),
        ],
        out_specs=pl.BlockSpec((1, 1, LANES), lambda i, p: (i, 0, 0)),
        scratch_shapes=[pltpu.VMEM((N_GROUPS * HT, WT), jnp.float32)],  # stacked warp LHS
    )
    out = pl.pallas_call(
        _fused_kernel,
        out_shape=jax.ShapeDtypeStruct((b, 1, LANES), jnp.float32),
        grid_spec=grid_spec,
        compiler_params=pltpu.CompilerParams(dimension_semantics=("parallel",)),
    )(params, band_rows, band_cols, img_s_flat, img_t_rows, mask, w_t, bias)
    return out[:, 0, 0]


@jax.jit
def alternate_random_search_forward(v, img_s, img_t, mask, w_cls, b_cls):
    """Score one candidate v (shape (6,)) or a batch of candidates (B, 6)."""
    single = v.ndim == 1
    vb = jnp.atleast_2d(v.astype(jnp.float32))
    va = jnp.abs(vb)
    # pure-scalar prep stays in the wrapper; everything heavy is in-kernel
    w_box = jnp.floor(va[:, 0]) + EPS
    h_box = jnp.floor(va[:, 1]) + EPS
    px = jnp.trunc(vb[:, 2])
    py = jnp.trunc(vb[:, 3])
    theta = jnp.deg2rad(vb[:, 4])
    sigma = va[:, 5] + EPS

    # normalized truncated-Gaussian blur tap weights, per candidate: (b, 7)
    taps = jnp.arange(-BLUR_R, BLUR_R + 1, dtype=jnp.float32)
    wraw = jnp.exp(-0.5 * (taps[None, :] / sigma[:, None]) ** 2)
    wts = wraw / jnp.sum(wraw, axis=1, keepdims=True)

    params = jnp.concatenate([
        jnp.stack([px, py,
                   (w_box - 1.0) * 0.5, (h_box - 1.0) * 0.5,       # box center
                   jnp.cos(theta), jnp.sin(theta),
                   float(WT) / w_box, float(HT) / h_box,           # resize scales
                   w_box - 1.0, h_box - 1.0], axis=-1),            # valid bounds
        wts], axis=-1)                                             # (b, 17)

    band_rows = jnp.asarray(_BAND_ROWS)
    band_cols = jnp.asarray(_BAND_COLS)
    img_s_flat = img_s.reshape(C_IMG, HW)                          # (3, 1024) lane-dense
    img_t_rows = img_t.reshape(C_IMG * HT, WT)                     # (96, 32) row-stacked
    w_t = w_cls.reshape(C_IMG, HW, NUM_CLASSES).transpose(0, 2, 1) # (3, 8, 1024)
    bias = b_cls.reshape(NUM_CLASSES, 1)

    scores = _fused_forward(params, band_rows, band_cols, img_s_flat,
                            img_t_rows, mask, w_t, bias)
    return scores[0] if single else scores


# ----------------------------- main -----------------------------

if __name__ == "__main__":
    key = jax.random.PRNGKey(0)
    k_s, k_t, k_m, k_w, k_b, k_v = jax.random.split(key, 6)

    # Deterministic, in-script stand-ins for the PNG assets and the model weights.
    img_s = jax.random.uniform(k_s, (C_IMG, H, W), dtype=jnp.float32)
    img_t = jax.random.uniform(k_t, (C_IMG, HT, WT), dtype=jnp.float32)
    mask = (jax.random.uniform(k_m, (HT, WT), dtype=jnp.float32) > 0.5).astype(jnp.float32)
    w_cls = jax.random.normal(k_w, (C_IMG * H * W, NUM_CLASSES), dtype=jnp.float32) * 0.02
    b_cls = jax.random.normal(k_b, (1, NUM_CLASSES), dtype=jnp.float32) * 0.1

    # v = [w, h, x, y, angle_deg, blur_radius]
    v = jnp.array([20.0, 18.0, 4.0, 3.0, 30.0, 1.5], dtype=jnp.float32)
    score = alternate_random_search_forward(v, img_s, img_t, mask, w_cls, b_cls)
    jax.block_until_ready(score)

    # Batched random-search candidates: the "parallel" grid axis shards the >=2
    # steps across TensorCores on v7x and amortizes dispatch everywhere.
    v_batch = v[None, :] + 2.0 * jax.random.normal(k_v, (4, 6), dtype=jnp.float32)
    scores = alternate_random_search_forward(v_batch, img_s, img_t, mask, w_cls, b_cls)
    jax.block_until_ready(scores)

    print("KERNEL_OK")
</pallas_src>

<mosaic_0001>
module attributes {stable_mosaic.version = 11 : i64} {
  func.func @_fused_kernel(%arg0: i32, %arg1: memref<1x17xf32, #tpu.memory_space<smem>>, %arg2: memref<7x32x32xf32, #tpu.memory_space<vmem>>, %arg3: memref<7x32x32xf32, #tpu.memory_space<vmem>>, %arg4: memref<3x1024xf32, #tpu.memory_space<vmem>>, %arg5: memref<96x32xf32, #tpu.memory_space<vmem>>, %arg6: memref<32x32xf32, #tpu.memory_space<vmem>>, %arg7: memref<3x8x1024xf32, #tpu.memory_space<vmem>>, %arg8: memref<8x1xf32, #tpu.memory_space<vmem>>, %arg9: memref<1x1x128xf32, #tpu.memory_space<vmem>>, %arg10: memref<128x32xf32, #tpu.memory_space<vmem>>) attributes {dimension_semantics = [#tpu.dimension_semantics<parallel>], iteration_bounds = array<i64: 1>, scalar_prefetch = 1 : i64, scratch_operands = 1 : i64, tpu.core_type = #tpu.core_type<tc>, window_params = [{pipeline_mode = #tpu.pipeline_mode<synchronous>, transform_indices = @transform_0, window_bounds = array<i64: 7, 32, 32>}, {pipeline_mode = #tpu.pipeline_mode<synchronous>, transform_indices = @transform_1, window_bounds = array<i64: 7, 32, 32>}, {pipeline_mode = #tpu.pipeline_mode<synchronous>, transform_indices = @transform_2, window_bounds = array<i64: 3, 1024>}, {pipeline_mode = #tpu.pipeline_mode<synchronous>, transform_indices = @transform_3, window_bounds = array<i64: 96, 32>}, {pipeline_mode = #tpu.pipeline_mode<synchronous>, transform_indices = @transform_4, window_bounds = array<i64: 32, 32>}, {pipeline_mode = #tpu.pipeline_mode<synchronous>, transform_indices = @transform_5, window_bounds = array<i64: 3, 8, 1024>}, {pipeline_mode = #tpu.pipeline_mode<synchronous>, transform_indices = @transform_6, window_bounds = array<i64: 8, 1>}, {transform_indices = @transform_7, window_bounds = array<i64: 1, 1, 128>}]} {
    %0 = arith.index_cast %arg0 : i32 to index
    %c0 = arith.constant 0 : index
    %1 = memref.load %arg1[%0, %c0] : memref<1x17xf32, #tpu.memory_space<smem>>
    %2 = arith.index_cast %arg0 : i32 to index
    %c1 = arith.constant 1 : index
    %3 = memref.load %arg1[%2, %c1] : memref<1x17xf32, #tpu.memory_space<smem>>
    %4 = arith.index_cast %arg0 : i32 to index
    %c2 = arith.constant 2 : index
    %5 = memref.load %arg1[%4, %c2] : memref<1x17xf32, #tpu.memory_space<smem>>
    %6 = arith.index_cast %arg0 : i32 to index
    %c3 = arith.constant 3 : index
    %7 = memref.load %arg1[%6, %c3] : memref<1x17xf32, #tpu.memory_space<smem>>
    %8 = arith.index_cast %arg0 : i32 to index
    %c4 = arith.constant 4 : index
    %9 = memref.load %arg1[%8, %c4] : memref<1x17xf32, #tpu.memory_space<smem>>
    %10 = arith.index_cast %arg0 : i32 to index
    %c5 = arith.constant 5 : index
    %11 = memref.load %arg1[%10, %c5] : memref<1x17xf32, #tpu.memory_space<smem>>
    %12 = arith.index_cast %arg0 : i32 to index
    %c6 = arith.constant 6 : index
    %13 = memref.load %arg1[%12, %c6] : memref<1x17xf32, #tpu.memory_space<smem>>
    %14 = arith.index_cast %arg0 : i32 to index
    %c7 = arith.constant 7 : index
    %15 = memref.load %arg1[%14, %c7] : memref<1x17xf32, #tpu.memory_space<smem>>
    %16 = arith.index_cast %arg0 : i32 to index
    %c8 = arith.constant 8 : index
    %17 = memref.load %arg1[%16, %c8] : memref<1x17xf32, #tpu.memory_space<smem>>
    %18 = arith.index_cast %arg0 : i32 to index
    %c9 = arith.constant 9 : index
    %19 = memref.load %arg1[%18, %c9] : memref<1x17xf32, #tpu.memory_space<smem>>
    %20 = arith.index_cast %arg0 : i32 to index
    %c10 = arith.constant 10 : index
    %21 = memref.load %arg1[%20, %c10] : memref<1x17xf32, #tpu.memory_space<smem>>
    %c0_0 = arith.constant 0 : index
    %c0_1 = arith.constant 0 : index
    %c0_2 = arith.constant 0 : index
    %22 = vector.load %arg2[%c0_0, %c0_1, %c0_2] : memref<7x32x32xf32, #tpu.memory_space<vmem>>, vector<1x32x32xf32>
    %23 = vector.shape_cast %22 : vector<1x32x32xf32> to vector<32x32xf32>
    %24 = vector.broadcast %21 : f32 to vector<32x32xf32>
    %25 = arith.mulf %24, %23 : vector<32x32xf32>
    %26 = arith.index_cast %arg0 : i32 to index
    %c10_3 = arith.constant 10 : index
    %27 = memref.load %arg1[%26, %c10_3] : memref<1x17xf32, #tpu.memory_space<smem>>
    %c0_4 = arith.constant 0 : index
    %c0_5 = arith.constant 0 : index
    %c0_6 = arith.constant 0 : index
    %28 = vector.load %arg3[%c0_4, %c0_5, %c0_6] : memref<7x32x32xf32, #tpu.memory_space<vmem>>, vector<1x32x32xf32>
    %29 = vector.shape_cast %28 : vector<1x32x32xf32> to vector<32x32xf32>
    %30 = vector.broadcast %27 : f32 to vector<32x32xf32>
    %31 = arith.mulf %30, %29 : vector<32x32xf32>
    %32 = arith.index_cast %arg0 : i32 to index
    %c11 = arith.constant 11 : index
    %33 = memref.load %arg1[%32, %c11] : memref<1x17xf32, #tpu.memory_space<smem>>
    %c1_7 = arith.constant 1 : index
    %c0_8 = arith.constant 0 : index
    %c0_9 = arith.constant 0 : index
    %34 = vector.load %arg2[%c1_7, %c0_8, %c0_9] : memref<7x32x32xf32, #tpu.memory_space<vmem>>, vector<1x32x32xf32>
    %35 = vector.shape_cast %34 : vector<1x32x32xf32> to vector<32x32xf32>
    %36 = vector.broadcast %33 : f32 to vector<32x32xf32>
    %37 = arith.mulf %36, %35 : vector<32x32xf32>
    %38 = arith.addf %25, %37 : vector<32x32xf32>
    %c1_10 = arith.constant 1 : index
    %c0_11 = arith.constant 0 : index
    %c0_12 = arith.constant 0 : index
    %39 = vector.load %arg3[%c1_10, %c0_11, %c0_12] : memref<7x32x32xf32, #tpu.memory_space<vmem>>, vector<1x32x32xf32>
    %40 = vector.shape_cast %39 : vector<1x32x32xf32> to vector<32x32xf32>
    %41 = vector.broadcast %33 : f32 to vector<32x32xf32>
    %42 = arith.mulf %41, %40 : vector<32x32xf32>
    %43 = arith.addf %31, %42 : vector<32x32xf32>
    %44 = arith.index_cast %arg0 : i32 to index
    %c12 = arith.constant 12 : index
    %45 = memref.load %arg1[%44, %c12] : memref<1x17xf32, #tpu.memory_space<smem>>
    %c2_13 = arith.constant 2 : index
    %c0_14 = arith.constant 0 : index
    %c0_15 = arith.constant 0 : index
    %46 = vector.load %arg2[%c2_13, %c0_14, %c0_15] : memref<7x32x32xf32, #tpu.memory_space<vmem>>, vector<1x32x32xf32>
    %47 = vector.shape_cast %46 : vector<1x32x32xf32> to vector<32x32xf32>
    %48 = vector.broadcast %45 : f32 to vector<32x32xf32>
    %49 = arith.mulf %48, %47 : vector<32x32xf32>
    %50 = arith.addf %38, %49 : vector<32x32xf32>
    %c2_16 = arith.constant 2 : index
    %c0_17 = arith.constant 0 : index
    %c0_18 = arith.constant 0 : index
    %51 = vector.load %arg3[%c2_16, %c0_17, %c0_18] : memref<7x32x32xf32, #tpu.memory_space<vmem>>, vector<1x32x32xf32>
    %52 = vector.shape_cast %51 : vector<1x32x32xf32> to vector<32x32xf32>
    %53 = vector.broadcast %45 : f32 to vector<32x32xf32>
    %54 = arith.mulf %53, %52 : vector<32x32xf32>
    %55 = arith.addf %43, %54 : vector<32x32xf32>
    %56 = arith.index_cast %arg0 : i32 to index
    %c13 = arith.constant 13 : index
    %57 = memref.load %arg1[%56, %c13] : memref<1x17xf32, #tpu.memory_space<smem>>
    %c3_19 = arith.constant 3 : index
    %c0_20 = arith.constant 0 : index
    %c0_21 = arith.constant 0 : index
    %58 = vector.load %arg2[%c3_19, %c0_20, %c0_21] : memref<7x32x32xf32, #tpu.memory_space<vmem>>, vector<1x32x32xf32>
    %59 = vector.shape_cast %58 : vector<1x32x32xf32> to vector<32x32xf32>
    %60 = vector.broadcast %57 : f32 to vector<32x32xf32>
    %61 = arith.mulf %60, %59 : vector<32x32xf32>
    %62 = arith.addf %50, %61 : vector<32x32xf32>
    %c3_22 = arith.constant 3 : index
    %c0_23 = arith.constant 0 : index
    %c0_24 = arith.constant 0 : index
    %63 = vector.load %arg3[%c3_22, %c0_23, %c0_24] : memref<7x32x32xf32, #tpu.memory_space<vmem>>, vector<1x32x32xf32>
    %64 = vector.shape_cast %63 : vector<1x32x32xf32> to vector<32x32xf32>
    %65 = vector.broadcast %57 : f32 to vector<32x32xf32>
    %66 = arith.mulf %65, %64 : vector<32x32xf32>
    %67 = arith.addf %55, %66 : vector<32x32xf32>
    %68 = arith.index_cast %arg0 : i32 to index
    %c14 = arith.constant 14 : index
    %69 = memref.load %arg1[%68, %c14] : memref<1x17xf32, #tpu.memory_space<smem>>
    %c4_25 = arith.constant 4 : index
    %c0_26 = arith.constant 0 : index
    %c0_27 = arith.constant 0 : index
    %70 = vector.load %arg2[%c4_25, %c0_26, %c0_27] : memref<7x32x32xf32, #tpu.memory_space<vmem>>, vector<1x32x32xf32>
    %71 = vector.shape_cast %70 : vector<1x32x32xf32> to vector<32x32xf32>
    %72 = vector.broadcast %69 : f32 to vector<32x32xf32>
    %73 = arith.mulf %72, %71 : vector<32x32xf32>
    %74 = arith.addf %62, %73 : vector<32x32xf32>
    %c4_28 = arith.constant 4 : index
    %c0_29 = arith.constant 0 : index
    %c0_30 = arith.constant 0 : index
    %75 = vector.load %arg3[%c4_28, %c0_29, %c0_30] : memref<7x32x32xf32, #tpu.memory_space<vmem>>, vector<1x32x32xf32>
    %76 = vector.shape_cast %75 : vector<1x32x32xf32> to vector<32x32xf32>
    %77 = vector.broadcast %69 : f32 to vector<32x32xf32>
    %78 = arith.mulf %77, %76 : vector<32x32xf32>
    %79 = arith.addf %67, %78 : vector<32x32xf32>
    %80 = arith.index_cast %arg0 : i32 to index
    %c15 = arith.constant 15 : index
    %81 = memref.load %arg1[%80, %c15] : memref<1x17xf32, #tpu.memory_space<smem>>
    %c5_31 = arith.constant 5 : index
    %c0_32 = arith.constant 0 : index
    %c0_33 = arith.constant 0 : index
    %82 = vector.load %arg2[%c5_31, %c0_32, %c0_33] : memref<7x32x32xf32, #tpu.memory_space<vmem>>, vector<1x32x32xf32>
    %83 = vector.shape_cast %82 : vector<1x32x32xf32> to vector<32x32xf32>
    %84 = vector.broadcast %81 : f32 to vector<32x32xf32>
    %85 = arith.mulf %84, %83 : vector<32x32xf32>
    %86 = arith.addf %74, %85 : vector<32x32xf32>
    %c5_34 = arith.constant 5 : index
    %c0_35 = arith.constant 0 : index
    %c0_36 = arith.constant 0 : index
    %87 = vector.load %arg3[%c5_34, %c0_35, %c0_36] : memref<7x32x32xf32, #tpu.memory_space<vmem>>, vector<1x32x32xf32>
    %88 = vector.shape_cast %87 : vector<1x32x32xf32> to vector<32x32xf32>
    %89 = vector.broadcast %81 : f32 to vector<32x32xf32>
    %90 = arith.mulf %89, %88 : vector<32x32xf32>
    %91 = arith.addf %79, %90 : vector<32x32xf32>
    %92 = arith.index_cast %arg0 : i32 to index
    %c16 = arith.constant 16 : index
    %93 = memref.load %arg1[%92, %c16] : memref<1x17xf32, #tpu.memory_space<smem>>
    %c6_37 = arith.constant 6 : index
    %c0_38 = arith.constant 0 : index
    %c0_39 = arith.constant 0 : index
    %94 = vector.load %arg2[%c6_37, %c0_38, %c0_39] : memref<7x32x32xf32, #tpu.memory_space<vmem>>, vector<1x32x32xf32>
    %95 = vector.shape_cast %94 : vector<1x32x32xf32> to vector<32x32xf32>
    %96 = vector.broadcast %93 : f32 to vector<32x32xf32>
    %97 = arith.mulf %96, %95 : vector<32x32xf32>
    %98 = arith.addf %86, %97 : vector<32x32xf32>
    %c6_40 = arith.constant 6 : index
    %c0_41 = arith.constant 0 : index
    %c0_42 = arith.constant 0 : index
    %99 = vector.load %arg3[%c6_40, %c0_41, %c0_42] : memref<7x32x32xf32, #tpu.memory_space<vmem>>, vector<1x32x32xf32>
    %100 = vector.shape_cast %99 : vector<1x32x32xf32> to vector<32x32xf32>
    %101 = vector.broadcast %93 : f32 to vector<32x32xf32>
    %102 = arith.mulf %101, %100 : vector<32x32xf32>
    %103 = arith.addf %91, %102 : vector<32x32xf32>
    %c0_43 = arith.constant 0 : index
    %c0_44 = arith.constant 0 : index
    %104 = vector.load %arg6[%c0_43, %c0_44] : memref<32x32xf32, #tpu.memory_space<vmem>>, vector<32x32xf32>
    %cst = arith.constant dense<0.000000e+00> : vector<32x32xf32>
    %105 = tpu.matmul %104, %103, %cst {dimension_numbers = #tpu.dot_dimension_numbers<[1], [0], [0], [1], [0, 0, 1, 1], [], []>} : vector<32x32xf32>, vector<32x32xf32>, vector<32x32xf32> -> vector<32x32xf32>
    %cst_45 = arith.constant dense<0.000000e+00> : vector<32x32xf32>
    %106 = tpu.matmul %98, %105, %cst_45 {dimension_numbers = #tpu.dot_dimension_numbers<[1], [0], [0], [1], [0, 0, 1, 1], [], []>} : vector<32x32xf32>, vector<32x32xf32>, vector<32x32xf32> -> vector<32x32xf32>
    %c0_46 = arith.constant 0 : index
    %c0_47 = arith.constant 0 : index
    %107 = vector.load %arg10[%c0_46, %c0_47] : memref<128x32xf32, #tpu.memory_space<vmem>>, vector<32x32xf32>
    tpu.vector_store %arg10[%c0_46, %c0_47], %106 {strides = array<i32>} : memref<128x32xf32, #tpu.memory_space<vmem>>, vector<32x32xf32>,
    %c0_48 = arith.constant 0 : index
    %c0_49 = arith.constant 0 : index
    %108 = vector.load %arg5[%c0_48, %c0_49] : memref<96x32xf32, #tpu.memory_space<vmem>>, vector<96x32xf32>
    %c32 = arith.constant 32 : index
    %c0_50 = arith.constant 0 : index
    %109 = vector.load %arg10[%c32, %c0_50] : memref<128x32xf32, #tpu.memory_space<vmem>>, vector<96x32xf32>
    tpu.vector_store %arg10[%c32, %c0_50], %108 {strides = array<i32>} : memref<128x32xf32, #tpu.memory_space<vmem>>, vector<96x32xf32>,
    %cst_51 = arith.constant 0.000000e+00 : f32
    %110 = vector.broadcast %cst_51 : f32 to vector<8x128xf32>
    %cst_52 = arith.constant 0.000000e+00 : f32
    %111 = vector.broadcast %cst_52 : f32 to vector<1x128xf32>
    %112 = tpu.iota {dimensions = array<i32: 1>} : vector<1x128xi32>
    %c0_i32 = arith.constant 0 : i32
    %113 = vector.broadcast %c0_i32 : i32 to vector<1x128xi32>
    %114 = arith.addi %112, %113 : vector<1x128xi32>
    %115 = arith.sitofp %114 : vector<1x128xi32> to vector<1x128xf32>
    %cst_53 = arith.constant 3.125000e-02 : f32
    %116 = vector.broadcast %cst_53 : f32 to vector<1x128xf32>
    %117 = arith.mulf %115, %116 : vector<1x128xf32>
    %118 = math.floor %117 : vector<1x128xf32>
    %cst_54 = arith.constant 3.200000e+01 : f32
    %119 = vector.broadcast %cst_54 : f32 to vector<1x128xf32>
    %120 = arith.mulf %119, %118 : vector<1x128xf32>
    %121 = arith.subf %115, %120 : vector<1x128xf32>
    %122 = vector.broadcast %1 : f32 to vector<1x128xf32>
    %123 = arith.subf %121, %122 : vector<1x128xf32>
    %124 = vector.broadcast %3 : f32 to vector<1x128xf32>
    %125 = arith.subf %118, %124 : vector<1x128xf32>
    %126 = vector.broadcast %5 : f32 to vector<1x128xf32>
    %127 = arith.subf %123, %126 : vector<1x128xf32>
    %128 = vector.broadcast %7 : f32 to vector<1x128xf32>
    %129 = arith.subf %125, %128 : vector<1x128xf32>
    %130 = vector.broadcast %9 : f32 to vector<1x128xf32>
    %131 = arith.mulf %130, %127 : vector<1x128xf32>
    %132 = vector.broadcast %5 : f32 to vector<1x128xf32>
    %133 = arith.addf %132, %131 : vector<1x128xf32>
    %134 = vector.broadcast %11 : f32 to vector<1x128xf32>
    %135 = arith.mulf %134, %129 : vector<1x128xf32>
    %136 = arith.subf %133, %135 : vector<1x128xf32>
    %137 = vector.broadcast %11 : f32 to vector<1x128xf32>
    %138 = arith.mulf %137, %127 : vector<1x128xf32>
    %139 = vector.broadcast %7 : f32 to vector<1x128xf32>
    %140 = arith.addf %139, %138 : vector<1x128xf32>
    %141 = vector.broadcast %9 : f32 to vector<1x128xf32>
    %142 = arith.mulf %141, %129 : vector<1x128xf32>
    %143 = arith.addf %140, %142 : vector<1x128xf32>
    %cst_55 = arith.constant 5.000000e-01 : f32
    %144 = vector.broadcast %cst_55 : f32 to vector<1x128xf32>
    %145 = arith.addf %136, %144 : vector<1x128xf32>
    %146 = vector.broadcast %13 : f32 to vector<1x128xf32>
    %147 = arith.mulf %145, %146 : vector<1x128xf32>
    %cst_56 = arith.constant 5.000000e-01 : f32
    %148 = vector.broadcast %cst_56 : f32 to vector<1x128xf32>
    %149 = arith.subf %147, %148 : vector<1x128xf32>
    %cst_57 = arith.constant 5.000000e-01 : f32
    %150 = vector.broadcast %cst_57 : f32 to vector<1x128xf32>
    %151 = arith.addf %143, %150 : vector<1x128xf32>
    %152 = vector.broadcast %15 : f32 to vector<1x128xf32>
    %153 = arith.mulf %151, %152 : vector<1x128xf32>
    %cst_58 = arith.constant 5.000000e-01 : f32
    %154 = vector.broadcast %cst_58 : f32 to vector<1x128xf32>
    %155 = arith.subf %153, %154 : vector<1x128xf32>
    %cst_59 = arith.constant 0.000000e+00 : f32
    %156 = vector.broadcast %cst_59 : f32 to vector<1x128xf32>
    %157 = arith.cmpf oge, %123, %156 : vector<1x128xf32>
    %158 = vector.broadcast %17 : f32 to vector<1x128xf32>
    %159 = arith.cmpf ole, %123, %158 : vector<1x128xf32>
    %160 = arith.andi %157, %159 : vector<1x128xi1>
    %cst_60 = arith.constant 0.000000e+00 : f32
    %161 = vector.broadcast %cst_60 : f32 to vector<1x128xf32>
    %162 = arith.cmpf oge, %125, %161 : vector<1x128xf32>
    %163 = arith.andi %160, %162 : vector<1x128xi1>
    %164 = vector.broadcast %19 : f32 to vector<1x128xf32>
    %165 = arith.cmpf ole, %125, %164 : vector<1x128xf32>
    %166 = arith.andi %163, %165 : vector<1x128xi1>
    %cst_61 = arith.constant 0.000000e+00 : f32
    %167 = vector.broadcast %cst_61 : f32 to vector<1x128xf32>
    %168 = arith.cmpf oge, %149, %167 : vector<1x128xf32>
    %cst_62 = arith.constant 3.100000e+01 : f32
    %169 = vector.broadcast %cst_62 : f32 to vector<1x128xf32>
    %170 = arith.cmpf ole, %149, %169 : vector<1x128xf32>
    %171 = arith.andi %168, %170 : vector<1x128xi1>
    %cst_63 = arith.constant 0.000000e+00 : f32
    %172 = vector.broadcast %cst_63 : f32 to vector<1x128xf32>
    %173 = arith.cmpf oge, %155, %172 : vector<1x128xf32>
    %174 = arith.andi %171, %173 : vector<1x128xi1>
    %cst_64 = arith.constant 3.100000e+01 : f32
    %175 = vector.broadcast %cst_64 : f32 to vector<1x128xf32>
    %176 = arith.cmpf ole, %155, %175 : vector<1x128xf32>
    %177 = arith.andi %174, %176 : vector<1x128xi1>
    %178 = arith.andi %166, %177 : vector<1x128xi1>
    %179 = arith.extui %178 : vector<1x128xi1> to vector<1x128xi32>
    %180 = arith.sitofp %179 : vector<1x128xi32> to vector<1x128xf32>
    %181 = tpu.iota {dimensions = array<i32: 0>} : vector<32x128xi32>
    %182 = arith.sitofp %181 : vector<32x128xi32> to vector<32x128xf32>
    %183 = vector.broadcast %149 : vector<1x128xf32> to vector<32x128xf32>
    %184 = arith.subf %182, %183 : vector<32x128xf32>
    %185 = math.absf %184 : vector<32x128xf32>
    %cst_65 = arith.constant 1.000000e+00 : f32
    %186 = vector.broadcast %cst_65 : f32 to vector<32x128xf32>
    %187 = arith.subf %186, %185 : vector<32x128xf32>
    %cst_66 = arith.constant 0.000000e+00 : f32
    %188 = vector.broadcast %cst_66 : f32 to vector<32x128xf32>
    %189 = arith.maximumf %188, %187 : vector<32x128xf32>
    %190 = vector.broadcast %155 : vector<1x128xf32> to vector<32x128xf32>
    %191 = arith.subf %182, %190 : vector<32x128xf32>
    %192 = math.absf %191 : vector<32x128xf32>
    %cst_67 = arith.constant 1.000000e+00 : f32
    %193 = vector.broadcast %cst_67 : f32 to vector<32x128xf32>
    %194 = arith.subf %193, %192 : vector<32x128xf32>
    %cst_68 = arith.constant 0.000000e+00 : f32
    %195 = vector.broadcast %cst_68 : f32 to vector<32x128xf32>
    %196 = arith.maximumf %195, %194 : vector<32x128xf32>
    %c0_69 = arith.constant 0 : index
    %c0_70 = arith.constant 0 : index
    %197 = vector.load %arg10[%c0_69, %c0_70] : memref<128x32xf32, #tpu.memory_space<vmem>>, vector<128x32xf32>
    %cst_71 = arith.constant dense<0.000000e+00> : vector<128x128xf32>
    %198 = tpu.matmul %197, %189, %cst_71 {dimension_numbers = #tpu.dot_dimension_numbers<[1], [0], [0], [1], [0, 0, 1, 1], [], []>} : vector<128x32xf32>, vector<32x128xf32>, vector<128x128xf32> -> vector<128x128xf32>
    %199 = vector.extract_strided_slice %198 {offsets = [0, 0], sizes = [32, 128], strides = [1, 1]} : vector<128x128xf32> to vector<32x128xf32>
    %200 = arith.mulf %199, %196 : vector<32x128xf32>
    %cst_72 = arith.constant dense<0.000000e+00> : vector<128xf32>
    %201 = vector.multi_reduction <add>, %200, %cst_72 [0] : vector<32x128xf32> to vector<128xf32>
    %202 = vector.shape_cast %201 : vector<128xf32> to vector<1x128xf32>
    %203 = arith.mulf %202, %180 : vector<1x128xf32>
    %204 = vector.extract_strided_slice %198 {offsets = [32, 0], sizes = [32, 128], strides = [1, 1]} : vector<128x128xf32> to vector<32x128xf32>
    %205 = arith.mulf %204, %196 : vector<32x128xf32>
    %cst_73 = arith.constant dense<0.000000e+00> : vector<128xf32>
    %206 = vector.multi_reduction <add>, %205, %cst_73 [0] : vector<32x128xf32> to vector<128xf32>
    %207 = vector.shape_cast %206 : vector<128xf32> to vector<1x128xf32>
    %c0_74 = arith.constant 0 : index
    %c0_75 = arith.constant 0 : index
    %208 = vector.load %arg4[%c0_74, %c0_75] : memref<3x1024xf32, #tpu.memory_space<vmem>>, vector<1x128xf32>
    %209 = arith.subf %207, %208 : vector<1x128xf32>
    %210 = arith.mulf %203, %209 : vector<1x128xf32>
    %211 = arith.addf %208, %210 : vector<1x128xf32>
    %c0_76 = arith.constant 0 : index
    %c0_77 = arith.constant 0 : index
    %c0_78 = arith.constant 0 : index
    %212 = vector.load %arg7[%c0_76, %c0_77, %c0_78] : memref<3x8x1024xf32, #tpu.memory_space<vmem>>, vector<1x8x128xf32>
    %213 = vector.shape_cast %212 : vector<1x8x128xf32> to vector<8x128xf32>
    %214 = vector.broadcast %211 : vector<1x128xf32> to vector<8x128xf32>
    %215 = arith.mulf %214, %213 : vector<8x128xf32>
    %216 = arith.addf %110, %215 : vector<8x128xf32>
    %217 = arith.mulf %210, %210 : vector<1x128xf32>
    %218 = arith.addf %111, %217 : vector<1x128xf32>
    %219 = vector.extract_strided_slice %198 {offsets = [64, 0], sizes = [32, 128], strides = [1, 1]} : vector<128x128xf32> to vector<32x128xf32>
    %220 = arith.mulf %219, %196 : vector<32x128xf32>
    %cst_79 = arith.constant dense<0.000000e+00> : vector<128xf32>
    %221 = vector.multi_reduction <add>, %220, %cst_79 [0] : vector<32x128xf32> to vector<128xf32>
    %222 = vector.shape_cast %221 : vector<128xf32> to vector<1x128xf32>
    %c1_80 = arith.constant 1 : index
    %c0_81 = arith.constant 0 : index
    %223 = vector.load %arg4[%c1_80, %c0_81] : memref<3x1024xf32, #tpu.memory_space<vmem>>, vector<1x128xf32>
    %224 = arith.subf %222, %223 : vector<1x128xf32>
    %225 = arith.mulf %203, %224 : vector<1x128xf32>
    %226 = arith.addf %223, %225 : vector<1x128xf32>
    %c1_82 = arith.constant 1 : index
    %c0_83 = arith.constant 0 : index
    %c0_84 = arith.constant 0 : index
    %227 = vector.load %arg7[%c1_82, %c0_83, %c0_84] : memref<3x8x1024xf32, #tpu.memory_space<vmem>>, vector<1x8x128xf32>
    %228 = vector.shape_cast %227 : vector<1x8x128xf32> to vector<8x128xf32>
    %229 = vector.broadcast %226 : vector<1x128xf32> to vector<8x128xf32>
    %230 = arith.mulf %229, %228 : vector<8x128xf32>
    %231 = arith.addf %216, %230 : vector<8x128xf32>
    %232 = arith.mulf %225, %225 : vector<1x128xf32>
    %233 = arith.addf %218, %232 : vector<1x128xf32>
    %234 = vector.extract_strided_slice %198 {offsets = [96, 0], sizes = [32, 128], strides = [1, 1]} : vector<128x128xf32> to vector<32x128xf32>
    %235 = arith.mulf %234, %196 : vector<32x128xf32>
    %cst_85 = arith.constant dense<0.000000e+00> : vector<128xf32>
    %236 = vector.multi_reduction <add>, %235, %cst_85 [0] : vector<32x128xf32> to vector<128xf32>
    %237 = vector.shape_cast %236 : vector<128xf32> to vector<1x128xf32>
    %c2_86 = arith.constant 2 : index
    %c0_87 = arith.constant 0 : index
    %238 = vector.load %arg4[%c2_86, %c0_87] : memref<3x1024xf32, #tpu.memory_space<vmem>>, vector<1x128xf32>
    %239 = arith.subf %237, %238 : vector<1x128xf32>
    %240 = arith.mulf %203, %239 : vector<1x128xf32>
    %241 = arith.addf %238, %240 : vector<1x128xf32>
    %c2_88 = arith.constant 2 : index
    %c0_89 = arith.constant 0 : index
    %c0_90 = arith.constant 0 : index
    %242 = vector.load %arg7[%c2_88, %c0_89, %c0_90] : memref<3x8x1024xf32, #tpu.memory_space<vmem>>, vector<1x8x128xf32>
    %243 = vector.shape_cast %242 : vector<1x8x128xf32> to vector<8x128xf32>
    %244 = vector.broadcast %241 : vector<1x128xf32> to vector<8x128xf32>
    %245 = arith.mulf %244, %243 : vector<8x128xf32>
    %246 = arith.addf %231, %245 : vector<8x128xf32>
    %247 = arith.mulf %240, %240 : vector<1x128xf32>
    %248 = arith.addf %233, %247 : vector<1x128xf32>
    %249 = tpu.iota {dimensions = array<i32: 1>} : vector<1x128xi32>
    %c128_i32 = arith.constant 128 : i32
    %250 = vector.broadcast %c128_i32 : i32 to vector<1x128xi32>
    %251 = arith.addi %249, %250 : vector<1x128xi32>
    %252 = arith.sitofp %251 : vector<1x128xi32> to vector<1x128xf32>
    %cst_91 = arith.constant 3.125000e-02 : f32
    %253 = vector.broadcast %cst_91 : f32 to vector<1x128xf32>
    %254 = arith.mulf %252, %253 : vector<1x128xf32>
    %255 = math.floor %254 : vector<1x128xf32>
    %cst_92 = arith.constant 3.200000e+01 : f32
    %256 = vector.broadcast %cst_92 : f32 to vector<1x128xf32>
    %257 = arith.mulf %256, %255 : vector<1x128xf32>
    %258 = arith.subf %252, %257 : vector<1x128xf32>
    %259 = vector.broadcast %1 : f32 to vector<1x128xf32>
    %260 = arith.subf %258, %259 : vector<1x128xf32>
    %261 = vector.broadcast %3 : f32 to vector<1x128xf32>
    %262 = arith.subf %255, %261 : vector<1x128xf32>
    %263 = vector.broadcast %5 : f32 to vector<1x128xf32>
    %264 = arith.subf %260, %263 : vector<1x128xf32>
    %265 = vector.broadcast %7 : f32 to vector<1x128xf32>
    %266 = arith.subf %262, %265 : vector<1x128xf32>
    %267 = vector.broadcast %9 : f32 to vector<1x128xf32>
    %268 = arith.mulf %267, %264 : vector<1x128xf32>
    %269 = vector.broadcast %5 : f32 to vector<1x128xf32>
    %270 = arith.addf %269, %268 : vector<1x128xf32>
    %271 = vector.broadcast %11 : f32 to vector<1x128xf32>
    %272 = arith.mulf %271, %266 : vector<1x128xf32>
    %273 = arith.subf %270, %272 : vector<1x128xf32>
    %274 = vector.broadcast %11 : f32 to vector<1x128xf32>
    %275 = arith.mulf %274, %264 : vector<1x128xf32>
    %276 = vector.broadcast %7 : f32 to vector<1x128xf32>
    %277 = arith.addf %276, %275 : vector<1x128xf32>
    %278 = vector.broadcast %9 : f32 to vector<1x128xf32>
    %279 = arith.mulf %278, %266 : vector<1x128xf32>
    %280 = arith.addf %277, %279 : vector<1x128xf32>
    %cst_93 = arith.constant 5.000000e-01 : f32
    %281 = vector.broadcast %cst_93 : f32 to vector<1x128xf32>
    %282 = arith.addf %273, %281 : vector<1x128xf32>
    %283 = vector.broadcast %13 : f32 to vector<1x128xf32>
    %284 = arith.mulf %282, %283 : vector<1x128xf32>
    %cst_94 = arith.constant 5.000000e-01 : f32
    %285 = vector.broadcast %cst_94 : f32 to vector<1x128xf32>
    %286 = arith.subf %284, %285 : vector<1x128xf32>
    %cst_95 = arith.constant 5.000000e-01 : f32
    %287 = vector.broadcast %cst_95 : f32 to vector<1x128xf32>
    %288 = arith.addf %280, %287 : vector<1x128xf32>
    %289 = vector.broadcast %15 : f32 to vector<1x128xf32>
    %290 = arith.mulf %288, %289 : vector<1x128xf32>
    %cst_96 = arith.constant 5.000000e-01 : f32
    %291 = vector.broadcast %cst_96 : f32 to vector<1x128xf32>
    %292 = arith.subf %290, %291 : vector<1x128xf32>
    %cst_97 = arith.constant 0.000000e+00 : f32
    %293 = vector.broadcast %cst_97 : f32 to vector<1x128xf32>
    %294 = arith.cmpf oge, %260, %293 : vector<1x128xf32>
    %295 = vector.broadcast %17 : f32 to vector<1x128xf32>
    %296 = arith.cmpf ole, %260, %295 : vector<1x128xf32>
    %297 = arith.andi %294, %296 : vector<1x128xi1>
    %cst_98 = arith.constant 0.000000e+00 : f32
    %298 = vector.broadcast %cst_98 : f32 to vector<1x128xf32>
    %299 = arith.cmpf oge, %262, %298 : vector<1x128xf32>
    %300 = arith.andi %297, %299 : vector<1x128xi1>
    %301 = vector.broadcast %19 : f32 to vector<1x128xf32>
    %302 = arith.cmpf ole, %262, %301 : vector<1x128xf32>
    %303 = arith.andi %300, %302 : vector<1x128xi1>
    %cst_99 = arith.constant 0.000000e+00 : f32
    %304 = vector.broadcast %cst_99 : f32 to vector<1x128xf32>
    %305 = arith.cmpf oge, %286, %304 : vector<1x128xf32>
    %cst_100 = arith.constant 3.100000e+01 : f32
    %306 = vector.broadcast %cst_100 : f32 to vector<1x128xf32>
    %307 = arith.cmpf ole, %286, %306 : vector<1x128xf32>
    %308 = arith.andi %305, %307 : vector<1x128xi1>
    %cst_101 = arith.constant 0.000000e+00 : f32
    %309 = vector.broadcast %cst_101 : f32 to vector<1x128xf32>
    %310 = arith.cmpf oge, %292, %309 : vector<1x128xf32>
    %311 = arith.andi %308, %310 : vector<1x128xi1>
    %cst_102 = arith.constant 3.100000e+01 : f32
    %312 = vector.broadcast %cst_102 : f32 to vector<1x128xf32>
    %313 = arith.cmpf ole, %292, %312 : vector<1x128xf32>
    %314 = arith.andi %311, %313 : vector<1x128xi1>
    %315 = arith.andi %303, %314 : vector<1x128xi1>
    %316 = arith.extui %315 : vector<1x128xi1> to vector<1x128xi32>
    %317 = arith.sitofp %316 : vector<1x128xi32> to vector<1x128xf32>
    %318 = tpu.iota {dimensions = array<i32: 0>} : vector<32x128xi32>
    %319 = arith.sitofp %318 : vector<32x128xi32> to vector<32x128xf32>
    %320 = vector.broadcast %286 : vector<1x128xf32> to vector<32x128xf32>
    %321 = arith.subf %319, %320 : vector<32x128xf32>
    %322 = math.absf %321 : vector<32x128xf32>
    %cst_103 = arith.constant 1.000000e+00 : f32
    %323 = vector.broadcast %cst_103 : f32 to vector<32x128xf32>
    %324 = arith.subf %323, %322 : vector<32x128xf32>
    %cst_104 = arith.constant 0.000000e+00 : f32
    %325 = vector.broadcast %cst_104 : f32 to vector<32x128xf32>
    %326 = arith.maximumf %325, %324 : vector<32x128xf32>
    %327 = vector.broadcast %292 : vector<1x128xf32> to vector<32x128xf32>
    %328 = arith.subf %319, %327 : vector<32x128xf32>
    %329 = math.absf %328 : vector<32x128xf32>
    %cst_105 = arith.constant 1.000000e+00 : f32
    %330 = vector.broadcast %cst_105 : f32 to vector<32x128xf32>
    %331 = arith.subf %330, %329 : vector<32x128xf32>
    %cst_106 = arith.constant 0.000000e+00 : f32
    %332 = vector.broadcast %cst_106 : f32 to vector<32x128xf32>
    %333 = arith.maximumf %332, %331 : vector<32x128xf32>
    %c0_107 = arith.constant 0 : index
    %c0_108 = arith.constant 0 : index
    %334 = vector.load %arg10[%c0_107, %c0_108] : memref<128x32xf32, #tpu.memory_space<vmem>>, vector<128x32xf32>
    %cst_109 = arith.constant dense<0.000000e+00> : vector<128x128xf32>
    %335 = tpu.matmul %334, %326, %cst_109 {dimension_numbers = #tpu.dot_dimension_numbers<[1], [0], [0], [1], [0, 0, 1, 1], [], []>} : vector<128x32xf32>, vector<32x128xf32>, vector<128x128xf32> -> vector<128x128xf32>
    %336 = vector.extract_strided_slice %335 {offsets = [0, 0], sizes = [32, 128], strides = [1, 1]} : vector<128x128xf32> to vector<32x128xf32>
    %337 = arith.mulf %336, %333 : vector<32x128xf32>
    %cst_110 = arith.constant dense<0.000000e+00> : vector<128xf32>
    %338 = vector.multi_reduction <add>, %337, %cst_110 [0] : vector<32x128xf32> to vector<128xf32>
    %339 = vector.shape_cast %338 : vector<128xf32> to vector<1x128xf32>
    %340 = arith.mulf %339, %317 : vector<1x128xf32>
    %341 = vector.extract_strided_slice %335 {offsets = [32, 0], sizes = [32, 128], strides = [1, 1]} : vector<128x128xf32> to vector<32x128xf32>
    %342 = arith.mulf %341, %333 : vector<32x128xf32>
    %cst_111 = arith.constant dense<0.000000e+00> : vector<128xf32>
    %343 = vector.multi_reduction <add>, %342, %cst_111 [0] : vector<32x128xf32> to vector<128xf32>
    %344 = vector.shape_cast %343 : vector<128xf32> to vector<1x128xf32>
    %c0_112 = arith.constant 0 : index
    %c128 = arith.constant 128 : index
    %345 = vector.load %arg4[%c0_112, %c128] : memref<3x1024xf32, #tpu.memory_space<vmem>>, vector<1x128xf32>
    %346 = arith.subf %344, %345 : vector<1x128xf32>
    %347 = arith.mulf %340, %346 : vector<1x128xf32>
    %348 = arith.addf %345, %347 : vector<1x128xf32>
    %c0_113 = arith.constant 0 : index
    %c0_114 = arith.constant 0 : index
    %c128_115 = arith.constant 128 : index
    %349 = vector.load %arg7[%c0_113, %c0_114, %c128_115] : memref<3x8x1024xf32, #tpu.memory_space<vmem>>, vector<1x8x128xf32>
    %350 = vector.shape_cast %349 : vector<1x8x128xf32> to vector<8x128xf32>
    %351 = vector.broadcast %348 : vector<1x128xf32> to vector<8x128xf32>
    %352 = arith.mulf %351, %350 : vector<8x128xf32>
    %353 = arith.addf %246, %352 : vector<8x128xf32>
    %354 = arith.mulf %347, %347 : vector<1x128xf32>
    %355 = arith.addf %248, %354 : vector<1x128xf32>
    %356 = vector.extract_strided_slice %335 {offsets = [64, 0], sizes = [32, 128], strides = [1, 1]} : vector<128x128xf32> to vector<32x128xf32>
    %357 = arith.mulf %356, %333 : vector<32x128xf32>
    %cst_116 = arith.constant dense<0.000000e+00> : vector<128xf32>
    %358 = vector.multi_reduction <add>, %357, %cst_116 [0] : vector<32x128xf32> to vector<128xf32>
    %359 = vector.shape_cast %358 : vector<128xf32> to vector<1x128xf32>
    %c1_117 = arith.constant 1 : index
    %c128_118 = arith.constant 128 : index
    %360 = vector.load %arg4[%c1_117, %c128_118] : memref<3x1024xf32, #tpu.memory_space<vmem>>, vector<1x128xf32>
    %361 = arith.subf %359, %360 : vector<1x128xf32>
    %362 = arith.mulf %340, %361 : vector<1x128xf32>
    %363 = arith.addf %360, %362 : vector<1x128xf32>
    %c1_119 = arith.constant 1 : index
    %c0_120 = arith.constant 0 : index
    %c128_121 = arith.constant 128 : index
    %364 = vector.load %arg7[%c1_119, %c0_120, %c128_121] : memref<3x8x1024xf32, #tpu.memory_space<vmem>>, vector<1x8x128xf32>
    %365 = vector.shape_cast %364 : vector<1x8x128xf32> to vector<8x128xf32>
    %366 = vector.broadcast %363 : vector<1x128xf32> to vector<8x128xf32>
    %367 = arith.mulf %366, %365 : vector<8x128xf32>
    %368 = arith.addf %353, %367 : vector<8x128xf32>
    %369 = arith.mulf %362, %362 : vector<1x128xf32>
    %370 = arith.addf %355, %369 : vector<1x128xf32>
    %371 = vector.extract_strided_slice %335 {offsets = [96, 0], sizes = [32, 128], strides = [1, 1]} : vector<128x128xf32> to vector<32x128xf32>
    %372 = arith.mulf %371, %333 : vector<32x128xf32>
    %cst_122 = arith.constant dense<0.000000e+00> : vector<128xf32>
    %373 = vector.multi_reduction <add>, %372, %cst_122 [0] : vector<32x128xf32> to vector<128xf32>
    %374 = vector.shape_cast %373 : vector<128xf32> to vector<1x128xf32>
    %c2_123 = arith.constant 2 : index
    %c128_124 = arith.constant 128 : index
    %375 = vector.load %arg4[%c2_123, %c128_124] : memref<3x1024xf32, #tpu.memory_space<vmem>>, vector<1x128xf32>
    %376 = arith.subf %374, %375 : vector<1x128xf32>
    %377 = arith.mulf %340, %376 : vector<1x128xf32>
    %378 = arith.addf %375, %377 : vector<1x128xf32>
    %c2_125 = arith.constant 2 : index
    %c0_126 = arith.constant 0 : index
    %c128_127 = arith.constant 128 : index
    %379 = vector.load %arg7[%c2_125, %c0_126, %c128_127] : memref<3x8x1024xf32, #tpu.memory_space<vmem>>, vector<1x8x128xf32>
    %380 = vector.shape_cast %379 : vector<1x8x128xf32> to vector<8x128xf32>
    %381 = vector.broadcast %378 : vector<1x128xf32> to vector<8x128xf32>
    %382 = arith.mulf %381, %380 : vector<8x128xf32>
    %383 = arith.addf %368, %382 : vector<8x128xf32>
    %384 = arith.mulf %377, %377 : vector<1x128xf32>
    %385 = arith.addf %370, %384 : vector<1x128xf32>
    %386 = tpu.iota {dimensions = array<i32: 1>} : vector<1x128xi32>
    %c256_i32 = arith.constant 256 : i32
    %387 = vector.broadcast %c256_i32 : i32 to vector<1x128xi32>
    %388 = arith.addi %386, %387 : vector<1x128xi32>
    %389 = arith.sitofp %388 : vector<1x128xi32> to vector<1x128xf32>
    %cst_128 = arith.constant 3.125000e-02 : f32
    %390 = vector.broadcast %cst_128 : f32 to vector<1x128xf32>
    %391 = arith.mulf %389, %390 : vector<1x128xf32>
    %392 = math.floor %391 : vector<1x128xf32>
    %cst_129 = arith.constant 3.200000e+01 : f32
    %393 = vector.broadcast %cst_129 : f32 to vector<1x128xf32>
    %394 = arith.mulf %393, %392 : vector<1x128xf32>
    %395 = arith.subf %389, %394 : vector<1x128xf32>
    %396 = vector.broadcast %1 : f32 to vector<1x128xf32>
    %397 = arith.subf %395, %396 : vector<1x128xf32>
    %398 = vector.broadcast %3 : f32 to vector<1x128xf32>
    %399 = arith.subf %392, %398 : vector<1x128xf32>
    %400 = vector.broadcast %5 : f32 to vector<1x128xf32>
    %401 = arith.subf %397, %400 : vector<1x128xf32>
    %402 = vector.broadcast %7 : f32 to vector<1x128xf32>
    %403 = arith.subf %399, %402 : vector<1x128xf32>
    %404 = vector.broadcast %9 : f32 to vector<1x128xf32>
    %405 = arith.mulf %404, %401 : vector<1x128xf32>
    %406 = vector.broadcast %5 : f32 to vector<1x128xf32>
    %407 = arith.addf %406, %405 : vector<1x128xf32>
    %408 = vector.broadcast %11 : f32 to vector<1x128xf32>
    %409 = arith.mulf %408, %403 : vector<1x128xf32>
    %410 = arith.subf %407, %409 : vector<1x128xf32>
    %411 = vector.broadcast %11 : f32 to vector<1x128xf32>
    %412 = arith.mulf %411, %401 : vector<1x128xf32>
    %413 = vector.broadcast %7 : f32 to vector<1x128xf32>
    %414 = arith.addf %413, %412 : vector<1x128xf32>
    %415 = vector.broadcast %9 : f32 to vector<1x128xf32>
    %416 = arith.mulf %415, %403 : vector<1x128xf32>
    %417 = arith.addf %414, %416 : vector<1x128xf32>
    %cst_130 = arith.constant 5.000000e-01 : f32
    %418 = vector.broadcast %cst_130 : f32 to vector<1x128xf32>
    %419 = arith.addf %410, %418 : vector<1x128xf32>
    %420 = vector.broadcast %13 : f32 to vector<1x128xf32>
    %421 = arith.mulf %419, %420 : vector<1x128xf32>
    %cst_131 = arith.constant 5.000000e-01 : f32
    %422 = vector.broadcast %cst_131 : f32 to vector<1x128xf32>
    %423 = arith.subf %421, %422 : vector<1x128xf32>
    %cst_132 = arith.constant 5.000000e-01 : f32
    %424 = vector.broadcast %cst_132 : f32 to vector<1x128xf32>
    %425 = arith.addf %417, %424 : vector<1x128xf32>
    %426 = vector.broadcast %15 : f32 to vector<1x128xf32>
    %427 = arith.mulf %425, %426 : vector<1x128xf32>
    %cst_133 = arith.constant 5.000000e-01 : f32
    %428 = vector.broadcast %cst_133 : f32 to vector<1x128xf32>
    %429 = arith.subf %427, %428 : vector<1x128xf32>
    %cst_134 = arith.constant 0.000000e+00 : f32
    %430 = vector.broadcast %cst_134 : f32 to vector<1x128xf32>
    %431 = arith.cmpf oge, %397, %430 : vector<1x128xf32>
    %432 = vector.broadcast %17 : f32 to vector<1x128xf32>
    %433 = arith.cmpf ole, %397, %432 : vector<1x128xf32>
    %434 = arith.andi %431, %433 : vector<1x128xi1>
    %cst_135 = arith.constant 0.000000e+00 : f32
    %435 = vector.broadcast %cst_135 : f32 to vector<1x128xf32>
    %436 = arith.cmpf oge, %399, %435 : vector<1x128xf32>
    %437 = arith.andi %434, %436 : vector<1x128xi1>
    %438 = vector.broadcast %19 : f32 to vector<1x128xf32>
    %439 = arith.cmpf ole, %399, %438 : vector<1x128xf32>
    %440 = arith.andi %437, %439 : vector<1x128xi1>
    %cst_136 = arith.constant 0.000000e+00 : f32
    %441 = vector.broadcast %cst_136 : f32 to vector<1x128xf32>
    %442 = arith.cmpf oge, %423, %441 : vector<1x128xf32>
    %cst_137 = arith.constant 3.100000e+01 : f32
    %443 = vector.broadcast %cst_137 : f32 to vector<1x128xf32>
    %444 = arith.cmpf ole, %423, %443 : vector<1x128xf32>
    %445 = arith.andi %442, %444 : vector<1x128xi1>
    %cst_138 = arith.constant 0.000000e+00 : f32
    %446 = vector.broadcast %cst_138 : f32 to vector<1x128xf32>
    %447 = arith.cmpf oge, %429, %446 : vector<1x128xf32>
    %448 = arith.andi %445, %447 : vector<1x128xi1>
    %cst_139 = arith.constant 3.100000e+01 : f32
    %449 = vector.broadcast %cst_139 : f32 to vector<1x128xf32>
    %450 = arith.cmpf ole, %429, %449 : vector<1x128xf32>
    %451 = arith.andi %448, %450 : vector<1x128xi1>
    %452 = arith.andi %440, %451 : vector<1x128xi1>
    %453 = arith.extui %452 : vector<1x128xi1> to vector<1x128xi32>
    %454 = arith.sitofp %453 : vector<1x128xi32> to vector<1x128xf32>
    %455 = tpu.iota {dimensions = array<i32: 0>} : vector<32x128xi32>
    %456 = arith.sitofp %455 : vector<32x128xi32> to vector<32x128xf32>
    %457 = vector.broadcast %423 : vector<1x128xf32> to vector<32x128xf32>
    %458 = arith.subf %456, %457 : vector<32x128xf32>
    %459 = math.absf %458 : vector<32x128xf32>
    %cst_140 = arith.constant 1.000000e+00 : f32
    %460 = vector.broadcast %cst_140 : f32 to vector<32x128xf32>
    %461 = arith.subf %460, %459 : vector<32x128xf32>
    %cst_141 = arith.constant 0.000000e+00 : f32
    %462 = vector.broadcast %cst_141 : f32 to vector<32x128xf32>
    %463 = arith.maximumf %462, %461 : vector<32x128xf32>
    %464 = vector.broadcast %429 : vector<1x128xf32> to vector<32x128xf32>
    %465 = arith.subf %456, %464 : vector<32x128xf32>
    %466 = math.absf %465 : vector<32x128xf32>
    %cst_142 = arith.constant 1.000000e+00 : f32
    %467 = vector.broadcast %cst_142 : f32 to vector<32x128xf32>
    %468 = arith.subf %467, %466 : vector<32x128xf32>
    %cst_143 = arith.constant 0.000000e+00 : f32
    %469 = vector.broadcast %cst_143 : f32 to vector<32x128xf32>
    %470 = arith.maximumf %469, %468 : vector<32x128xf32>
    %c0_144 = arith.constant 0 : index
    %c0_145 = arith.constant 0 : index
    %471 = vector.load %arg10[%c0_144, %c0_145] : memref<128x32xf32, #tpu.memory_space<vmem>>, vector<128x32xf32>
    %cst_146 = arith.constant dense<0.000000e+00> : vector<128x128xf32>
    %472 = tpu.matmul %471, %463, %cst_146 {dimension_numbers = #tpu.dot_dimension_numbers<[1], [0], [0], [1], [0, 0, 1, 1], [], []>} : vector<128x32xf32>, vector<32x128xf32>, vector<128x128xf32> -> vector<128x128xf32>
    %473 = vector.extract_strided_slice %472 {offsets = [0, 0], sizes = [32, 128], strides = [1, 1]} : vector<128x128xf32> to vector<32x128xf32>
    %474 = arith.mulf %473, %470 : vector<32x128xf32>
    %cst_147 = arith.constant dense<0.000000e+00> : vector<128xf32>
    %475 = vector.multi_reduction <add>, %474, %cst_147 [0] : vector<32x128xf32> to vector<128xf32>
    %476 = vector.shape_cast %475 : vector<128xf32> to vector<1x128xf32>
    %477 = arith.mulf %476, %454 : vector<1x128xf32>
    %478 = vector.extract_strided_slice %472 {offsets = [32, 0], sizes = [32, 128], strides = [1, 1]} : vector<128x128xf32> to vector<32x128xf32>
    %479 = arith.mulf %478, %470 : vector<32x128xf32>
    %cst_148 = arith.constant dense<0.000000e+00> : vector<128xf32>
    %480 = vector.multi_reduction <add>, %479, %cst_148 [0] : vector<32x128xf32> to vector<128xf32>
    %481 = vector.shape_cast %480 : vector<128xf32> to vector<1x128xf32>
    %c0_149 = arith.constant 0 : index
    %c256 = arith.constant 256 : index
    %482 = vector.load %arg4[%c0_149, %c256] : memref<3x1024xf32, #tpu.memory_space<vmem>>, vector<1x128xf32>
    %483 = arith.subf %481, %482 : vector<1x128xf32>
    %484 = arith.mulf %477, %483 : vector<1x128xf32>
    %485 = arith.addf %482, %484 : vector<1x128xf32>
    %c0_150 = arith.constant 0 : index
    %c0_151 = arith.constant 0 : index
    %c256_152 = arith.constant 256 : index
    %486 = vector.load %arg7[%c0_150, %c0_151, %c256_152] : memref<3x8x1024xf32, #tpu.memory_space<vmem>>, vector<1x8x128xf32>
    %487 = vector.shape_cast %486 : vector<1x8x128xf32> to vector<8x128xf32>
    %488 = vector.broadcast %485 : vector<1x128xf32> to vector<8x128xf32>
    %489 = arith.mulf %488, %487 : vector<8x128xf32>
    %490 = arith.addf %383, %489 : vector<8x128xf32>
    %491 = arith.mulf %484, %484 : vector<1x128xf32>
    %492 = arith.addf %385, %491 : vector<1x128xf32>
    %493 = vector.extract_strided_slice %472 {offsets = [64, 0], sizes = [32, 128], strides = [1, 1]} : vector<128x128xf32> to vector<32x128xf32>
    %494 = arith.mulf %493, %470 : vector<32x128xf32>
    %cst_153 = arith.constant dense<0.000000e+00> : vector<128xf32>
    %495 = vector.multi_reduction <add>, %494, %cst_153 [0] : vector<32x128xf32> to vector<128xf32>
    %496 = vector.shape_cast %495 : vector<128xf32> to vector<1x128xf32>
    %c1_154 = arith.constant 1 : index
    %c256_155 = arith.constant 256 : index
    %497 = vector.load %arg4[%c1_154, %c256_155] : memref<3x1024xf32, #tpu.memory_space<vmem>>, vector<1x128xf32>
    %498 = arith.subf %496, %497 : vector<1x128xf32>
    %499 = arith.mulf %477, %498 : vector<1x128xf32>
    %500 = arith.addf %497, %499 : vector<1x128xf32>
    %c1_156 = arith.constant 1 : index
    %c0_157 = arith.constant 0 : index
    %c256_158 = arith.constant 256 : index
    %501 = vector.load %arg7[%c1_156, %c0_157, %c256_158] : memref<3x8x1024xf32, #tpu.memory_space<vmem>>, vector<1x8x128xf32>
    %502 = vector.shape_cast %501 : vector<1x8x128xf32> to vector<8x128xf32>
    %503 = vector.broadcast %500 : vector<1x128xf32> to vector<8x128xf32>
    %504 = arith.mulf %503, %502 : vector<8x128xf32>
    %505 = arith.addf %490, %504 : vector<8x128xf32>
    %506 = arith.mulf %499, %499 : vector<1x128xf32>
    %507 = arith.addf %492, %506 : vector<1x128xf32>
    %508 = vector.extract_strided_slice %472 {offsets = [96, 0], sizes = [32, 128], strides = [1, 1]} : vector<128x128xf32> to vector<32x128xf32>
    %509 = arith.mulf %508, %470 : vector<32x128xf32>
    %cst_159 = arith.constant dense<0.000000e+00> : vector<128xf32>
    %510 = vector.multi_reduction <add>, %509, %cst_159 [0] : vector<32x128xf32> to vector<128xf32>
    %511 = vector.shape_cast %510 : vector<128xf32> to vector<1x128xf32>
    %c2_160 = arith.constant 2 : index
    %c256_161 = arith.constant 256 : index
    %512 = vector.load %arg4[%c2_160, %c256_161] : memref<3x1024xf32, #tpu.memory_space<vmem>>, vector<1x128xf32>
    %513 = arith.subf %511, %512 : vector<1x128xf32>
    %514 = arith.mulf %477, %513 : vector<1x128xf32>
    %515 = arith.addf %512, %514 : vector<1x128xf32>
    %c2_162 = arith.constant 2 : index
    %c0_163 = arith.constant 0 : index
    %c256_164 = arith.constant 256 : index
    %516 = vector.load %arg7[%c2_162, %c0_163, %c256_164] : memref<3x8x1024xf32, #tpu.memory_space<vmem>>, vector<1x8x128xf32>
    %517 = vector.shape_cast %516 : vector<1x8x128xf32> to vector<8x128xf32>
    %518 = vector.broadcast %515 : vector<1x128xf32> to vector<8x128xf32>
    %519 = arith.mulf %518, %517 : vector<8x128xf32>
    %520 = arith.addf %505, %519 : vector<8x128xf32>
    %521 = arith.mulf %514, %514 : vector<1x128xf32>
    %522 = arith.addf %507, %521 : vector<1x128xf32>
    %523 = tpu.iota {dimensions = array<i32: 1>} : vector<1x128xi32>
    %c384_i32 = arith.constant 384 : i32
    %524 = vector.broadcast %c384_i32 : i32 to vector<1x128xi32>
    %525 = arith.addi %523, %524 : vector<1x128xi32>
    %526 = arith.sitofp %525 : vector<1x128xi32> to vector<1x128xf32>
    %cst_165 = arith.constant 3.125000e-02 : f32
    %527 = vector.broadcast %cst_165 : f32 to vector<1x128xf32>
    %528 = arith.mulf %526, %527 : vector<1x128xf32>
    %529 = math.floor %528 : vector<1x128xf32>
    %cst_166 = arith.constant 3.200000e+01 : f32
    %530 = vector.broadcast %cst_166 : f32 to vector<1x128xf32>
    %531 = arith.mulf %530, %529 : vector<1x128xf32>
    %532 = arith.subf %526, %531 : vector<1x128xf32>
    %533 = vector.broadcast %1 : f32 to vector<1x128xf32>
    %534 = arith.subf %532, %533 : vector<1x128xf32>
    %535 = vector.broadcast %3 : f32 to vector<1x128xf32>
    %536 = arith.subf %529, %535 : vector<1x128xf32>
    %537 = vector.broadcast %5 : f32 to vector<1x128xf32>
    %538 = arith.subf %534, %537 : vector<1x128xf32>
    %539 = vector.broadcast %7 : f32 to vector<1x128xf32>
    %540 = arith.subf %536, %539 : vector<1x128xf32>
    %541 = vector.broadcast %9 : f32 to vector<1x128xf32>
    %542 = arith.mulf %541, %538 : vector<1x128xf32>
    %543 = vector.broadcast %5 : f32 to vector<1x128xf32>
    %544 = arith.addf %543, %542 : vector<1x128xf32>
    %545 = vector.broadcast %11 : f32 to vector<1x128xf32>
    %546 = arith.mulf %545, %540 : vector<1x128xf32>
    %547 = arith.subf %544, %546 : vector<1x128xf32>
    %548 = vector.broadcast %11 : f32 to vector<1x128xf32>
    %549 = arith.mulf %548, %538 : vector<1x128xf32>
    %550 = vector.broadcast %7 : f32 to vector<1x128xf32>
    %551 = arith.addf %550, %549 : vector<1x128xf32>
    %552 = vector.broadcast %9 : f32 to vector<1x128xf32>
    %553 = arith.mulf %552, %540 : vector<1x128xf32>
    %554 = arith.addf %551, %553 : vector<1x128xf32>
    %cst_167 = arith.constant 5.000000e-01 : f32
    %555 = vector.broadcast %cst_167 : f32 to vector<1x128xf32>
    %556 = arith.addf %547, %555 : vector<1x128xf32>
    %557 = vector.broadcast %13 : f32 to vector<1x128xf32>
    %558 = arith.mulf %556, %557 : vector<1x128xf32>
    %cst_168 = arith.constant 5.000000e-01 : f32
    %559 = vector.broadcast %cst_168 : f32 to vector<1x128xf32>
    %560 = arith.subf %558, %559 : vector<1x128xf32>
    %cst_169 = arith.constant 5.000000e-01 : f32
    %561 = vector.broadcast %cst_169 : f32 to vector<1x128xf32>
    %562 = arith.addf %554, %561 : vector<1x128xf32>
    %563 = vector.broadcast %15 : f32 to vector<1x128xf32>
    %564 = arith.mulf %562, %563 : vector<1x128xf32>
    %cst_170 = arith.constant 5.000000e-01 : f32
    %565 = vector.broadcast %cst_170 : f32 to vector<1x128xf32>
    %566 = arith.subf %564, %565 : vector<1x128xf32>
    %cst_171 = arith.constant 0.000000e+00 : f32
    %567 = vector.broadcast %cst_171 : f32 to vector<1x128xf32>
    %568 = arith.cmpf oge, %534, %567 : vector<1x128xf32>
    %569 = vector.broadcast %17 : f32 to vector<1x128xf32>
    %570 = arith.cmpf ole, %534, %569 : vector<1x128xf32>
    %571 = arith.andi %568, %570 : vector<1x128xi1>
    %cst_172 = arith.constant 0.000000e+00 : f32
    %572 = vector.broadcast %cst_172 : f32 to vector<1x128xf32>
    %573 = arith.cmpf oge, %536, %572 : vector<1x128xf32>
    %574 = arith.andi %571, %573 : vector<1x128xi1>
    %575 = vector.broadcast %19 : f32 to vector<1x128xf32>
    %576 = arith.cmpf ole, %536, %575 : vector<1x128xf32>
    %577 = arith.andi %574, %576 : vector<1x128xi1>
    %cst_173 = arith.constant 0.000000e+00 : f32
    %578 = vector.broadcast %cst_173 : f32 to vector<1x128xf32>
    %579 = arith.cmpf oge, %560, %578 : vector<1x128xf32>
    %cst_174 = arith.constant 3.100000e+01 : f32
    %580 = vector.broadcast %cst_174 : f32 to vector<1x128xf32>
    %581 = arith.cmpf ole, %560, %580 : vector<1x128xf32>
    %582 = arith.andi %579, %581 : vector<1x128xi1>
    %cst_175 = arith.constant 0.000000e+00 : f32
    %583 = vector.broadcast %cst_175 : f32 to vector<1x128xf32>
    %584 = arith.cmpf oge, %566, %583 : vector<1x128xf32>
    %585 = arith.andi %582, %584 : vector<1x128xi1>
    %cst_176 = arith.constant 3.100000e+01 : f32
    %586 = vector.broadcast %cst_176 : f32 to vector<1x128xf32>
    %587 = arith.cmpf ole, %566, %586 : vector<1x128xf32>
    %588 = arith.andi %585, %587 : vector<1x128xi1>
    %589 = arith.andi %577, %588 : vector<1x128xi1>
    %590 = arith.extui %589 : vector<1x128xi1> to vector<1x128xi32>
    %591 = arith.sitofp %590 : vector<1x128xi32> to vector<1x128xf32>
    %592 = tpu.iota {dimensions = array<i32: 0>} : vector<32x128xi32>
    %593 = arith.sitofp %592 : vector<32x128xi32> to vector<32x128xf32>
    %594 = vector.broadcast %560 : vector<1x128xf32> to vector<32x128xf32>
    %595 = arith.subf %593, %594 : vector<32x128xf32>
    %596 = math.absf %595 : vector<32x128xf32>
    %cst_177 = arith.constant 1.000000e+00 : f32
    %597 = vector.broadcast %cst_177 : f32 to vector<32x128xf32>
    %598 = arith.subf %597, %596 : vector<32x128xf32>
    %cst_178 = arith.constant 0.000000e+00 : f32
    %599 = vector.broadcast %cst_178 : f32 to vector<32x128xf32>
    %600 = arith.maximumf %599, %598 : vector<32x128xf32>
    %601 = vector.broadcast %566 : vector<1x128xf32> to vector<32x128xf32>
    %602 = arith.subf %593, %601 : vector<32x128xf32>
    %603 = math.absf %602 : vector<32x128xf32>
    %cst_179 = arith.constant 1.000000e+00 : f32
    %604 = vector.broadcast %cst_179 : f32 to vector<32x128xf32>
    %605 = arith.subf %604, %603 : vector<32x128xf32>
    %cst_180 = arith.constant 0.000000e+00 : f32
    %606 = vector.broadcast %cst_180 : f32 to vector<32x128xf32>
    %607 = arith.maximumf %606, %605 : vector<32x128xf32>
    %c0_181 = arith.constant 0 : index
    %c0_182 = arith.constant 0 : index
    %608 = vector.load %arg10[%c0_181, %c0_182] : memref<128x32xf32, #tpu.memory_space<vmem>>, vector<128x32xf32>
    %cst_183 = arith.constant dense<0.000000e+00> : vector<128x128xf32>
    %609 = tpu.matmul %608, %600, %cst_183 {dimension_numbers = #tpu.dot_dimension_numbers<[1], [0], [0], [1], [0, 0, 1, 1], [], []>} : vector<128x32xf32>, vector<32x128xf32>, vector<128x128xf32> -> vector<128x128xf32>
    %610 = vector.extract_strided_slice %609 {offsets = [0, 0], sizes = [32, 128], strides = [1, 1]} : vector<128x128xf32> to vector<32x128xf32>
    %611 = arith.mulf %610, %607 : vector<32x128xf32>
    %cst_184 = arith.constant dense<0.000000e+00> : vector<128xf32>
    %612 = vector.multi_reduction <add>, %611, %cst_184 [0] : vector<32x128xf32> to vector<128xf32>
    %613 = vector.shape_cast %612 : vector<128xf32> to vector<1x128xf32>
    %614 = arith.mulf %613, %591 : vector<1x128xf32>
    %615 = vector.extract_strided_slice %609 {offsets = [32, 0], sizes = [32, 128], strides = [1, 1]} : vector<128x128xf32> to vector<32x128xf32>
    %616 = arith.mulf %615, %607 : vector<32x128xf32>
    %cst_185 = arith.constant dense<0.000000e+00> : vector<128xf32>
    %617 = vector.multi_reduction <add>, %616, %cst_185 [0] : vector<32x128xf32> to vector<128xf32>
    %618 = vector.shape_cast %617 : vector<128xf32> to vector<1x128xf32>
    %c0_186 = arith.constant 0 : index
    %c384 = arith.constant 384 : index
    %619 = vector.load %arg4[%c0_186, %c384] : memref<3x1024xf32, #tpu.memory_space<vmem>>, vector<1x128xf32>
    %620 = arith.subf %618, %619 : vector<1x128xf32>
    %621 = arith.mulf %614, %620 : vector<1x128xf32>
    %622 = arith.addf %619, %621 : vector<1x128xf32>
    %c0_187 = arith.constant 0 : index
    %c0_188 = arith.constant 0 : index
    %c384_189 = arith.constant 384 : index
    %623 = vector.load %arg7[%c0_187, %c0_188, %c384_189] : memref<3x8x1024xf32, #tpu.memory_space<vmem>>, vector<1x8x128xf32>
    %624 = vector.shape_cast %623 : vector<1x8x128xf32> to vector<8x128xf32>
    %625 = vector.broadcast %622 : vector<1x128xf32> to vector<8x128xf32>
    %626 = arith.mulf %625, %624 : vector<8x128xf32>
    %627 = arith.addf %520, %626 : vector<8x128xf32>
    %628 = arith.mulf %621, %621 : vector<1x128xf32>
    %629 = arith.addf %522, %628 : vector<1x128xf32>
    %630 = vector.extract_strided_slice %609 {offsets = [64, 0], sizes = [32, 128], strides = [1, 1]} : vector<128x128xf32> to vector<32x128xf32>
    %631 = arith.mulf %630, %607 : vector<32x128xf32>
    %cst_190 = arith.constant dense<0.000000e+00> : vector<128xf32>
    %632 = vector.multi_reduction <add>, %631, %cst_190 [0] : vector<32x128xf32> to vector<128xf32>
    %633 = vector.shape_cast %632 : vector<128xf32> to vector<1x128xf32>
    %c1_191 = arith.constant 1 : index
    %c384_192 = arith.constant 384 : index
    %634 = vector.load %arg4[%c1_191, %c384_192] : memref<3x1024xf32, #tpu.memory_space<vmem>>, vector<1x128xf32>
    %635 = arith.subf %633, %634 : vector<1x128xf32>
    %636 = arith.mulf %614, %635 : vector<1x128xf32>
    %637 = arith.addf %634, %636 : vector<1x128xf32>
    %c1_193 = arith.constant 1 : index
    %c0_194 = arith.constant 0 : index
    %c384_195 = arith.constant 384 : index
    %638 = vector.load %arg7[%c1_193, %c0_194, %c384_195] : memref<3x8x1024xf32, #tpu.memory_space<vmem>>, vector<1x8x128xf32>
    %639 = vector.shape_cast %638 : vector<1x8x128xf32> to vector<8x128xf32>
    %640 = vector.broadcast %637 : vector<1x128xf32> to vector<8x128xf32>
    %641 = arith.mulf %640, %639 : vector<8x128xf32>
    %642 = arith.addf %627, %641 : vector<8x128xf32>
    %643 = arith.mulf %636, %636 : vector<1x128xf32>
    %644 = arith.addf %629, %643 : vector<1x128xf32>
    %645 = vector.extract_strided_slice %609 {offsets = [96, 0], sizes = [32, 128], strides = [1, 1]} : vector<128x128xf32> to vector<32x128xf32>
    %646 = arith.mulf %645, %607 : vector<32x128xf32>
    %cst_196 = arith.constant dense<0.000000e+00> : vector<128xf32>
    %647 = vector.multi_reduction <add>, %646, %cst_196 [0] : vector<32x128xf32> to vector<128xf32>
    %648 = vector.shape_cast %647 : vector<128xf32> to vector<1x128xf32>
    %c2_197 = arith.constant 2 : index
    %c384_198 = arith.constant 384 : index
    %649 = vector.load %arg4[%c2_197, %c384_198] : memref<3x1024xf32, #tpu.memory_space<vmem>>, vector<1x128xf32>
    %650 = arith.subf %648, %649 : vector<1x128xf32>
    %651 = arith.mulf %614, %650 : vector<1x128xf32>
    %652 = arith.addf %649, %651 : vector<1x128xf32>
    %c2_199 = arith.constant 2 : index
    %c0_200 = arith.constant 0 : index
    %c384_201 = arith.constant 384 : index
    %653 = vector.load %arg7[%c2_199, %c0_200, %c384_201] : memref<3x8x1024xf32, #tpu.memory_space<vmem>>, vector<1x8x128xf32>
    %654 = vector.shape_cast %653 : vector<1x8x128xf32> to vector<8x128xf32>
    %655 = vector.broadcast %652 : vector<1x128xf32> to vector<8x128xf32>
    %656 = arith.mulf %655, %654 : vector<8x128xf32>
    %657 = arith.addf %642, %656 : vector<8x128xf32>
    %658 = arith.mulf %651, %651 : vector<1x128xf32>
    %659 = arith.addf %644, %658 : vector<1x128xf32>
    %660 = tpu.iota {dimensions = array<i32: 1>} : vector<1x128xi32>
    %c512_i32 = arith.constant 512 : i32
    %661 = vector.broadcast %c512_i32 : i32 to vector<1x128xi32>
    %662 = arith.addi %660, %661 : vector<1x128xi32>
    %663 = arith.sitofp %662 : vector<1x128xi32> to vector<1x128xf32>
    %cst_202 = arith.constant 3.125000e-02 : f32
    %664 = vector.broadcast %cst_202 : f32 to vector<1x128xf32>
    %665 = arith.mulf %663, %664 : vector<1x128xf32>
    %666 = math.floor %665 : vector<1x128xf32>
    %cst_203 = arith.constant 3.200000e+01 : f32
    %667 = vector.broadcast %cst_203 : f32 to vector<1x128xf32>
    %668 = arith.mulf %667, %666 : vector<1x128xf32>
    %669 = arith.subf %663, %668 : vector<1x128xf32>
    %670 = vector.broadcast %1 : f32 to vector<1x128xf32>
    %671 = arith.subf %669, %670 : vector<1x128xf32>
    %672 = vector.broadcast %3 : f32 to vector<1x128xf32>
    %673 = arith.subf %666, %672 : vector<1x128xf32>
    %674 = vector.broadcast %5 : f32 to vector<1x128xf32>
    %675 = arith.subf %671, %674 : vector<1x128xf32>
    %676 = vector.broadcast %7 : f32 to vector<1x128xf32>
    %677 = arith.subf %673, %676 : vector<1x128xf32>
    %678 = vector.broadcast %9 : f32 to vector<1x128xf32>
    %679 = arith.mulf %678, %675 : vector<1x128xf32>
    %680 = vector.broadcast %5 : f32 to vector<1x128xf32>
    %681 = arith.addf %680, %679 : vector<1x128xf32>
    %682 = vector.broadcast %11 : f32 to vector<1x128xf32>
    %683 = arith.mulf %682, %677 : vector<1x128xf32>
    %684 = arith.subf %681, %683 : vector<1x128xf32>
    %685 = vector.broadcast %11 : f32 to vector<1x128xf32>
    %686 = arith.mulf %685, %675 : vector<1x128xf32>
    %687 = vector.broadcast %7 : f32 to vector<1x128xf32>
    %688 = arith.addf %687, %686 : vector<1x128xf32>
    %689 = vector.broadcast %9 : f32 to vector<1x128xf32>
    %690 = arith.mulf %689, %677 : vector<1x128xf32>
    %691 = arith.addf %688, %690 : vector<1x128xf32>
    %cst_204 = arith.constant 5.000000e-01 : f32
    %692 = vector.broadcast %cst_204 : f32 to vector<1x128xf32>
    %693 = arith.addf %684, %692 : vector<1x128xf32>
    %694 = vector.broadcast %13 : f32 to vector<1x128xf32>
    %695 = arith.mulf %693, %694 : vector<1x128xf32>
    %cst_205 = arith.constant 5.000000e-01 : f32
    %696 = vector.broadcast %cst_205 : f32 to vector<1x128xf32>
    %697 = arith.subf %695, %696 : vector<1x128xf32>
    %cst_206 = arith.constant 5.000000e-01 : f32
    %698 = vector.broadcast %cst_206 : f32 to vector<1x128xf32>
    %699 = arith.addf %691, %698 : vector<1x128xf32>
    %700 = vector.broadcast %15 : f32 to vector<1x128xf32>
    %701 = arith.mulf %699, %700 : vector<1x128xf32>
    %cst_207 = arith.constant 5.000000e-01 : f32
    %702 = vector.broadcast %cst_207 : f32 to vector<1x128xf32>
    %703 = arith.subf %701, %702 : vector<1x128xf32>
    %cst_208 = arith.constant 0.000000e+00 : f32
    %704 = vector.broadcast %cst_208 : f32 to vector<1x128xf32>
    %705 = arith.cmpf oge, %671, %704 : vector<1x128xf32>
    %706 = vector.broadcast %17 : f32 to vector<1x128xf32>
    %707 = arith.cmpf ole, %671, %706 : vector<1x128xf32>
    %708 = arith.andi %705, %707 : vector<1x128xi1>
    %cst_209 = arith.constant 0.000000e+00 : f32
    %709 = vector.broadcast %cst_209 : f32 to vector<1x128xf32>
    %710 = arith.cmpf oge, %673, %709 : vector<1x128xf32>
    %711 = arith.andi %708, %710 : vector<1x128xi1>
    %712 = vector.broadcast %19 : f32 to vector<1x128xf32>
    %713 = arith.cmpf ole, %673, %712 : vector<1x128xf32>
    %714 = arith.andi %711, %713 : vector<1x128xi1>
    %cst_210 = arith.constant 0.000000e+00 : f32
    %715 = vector.broadcast %cst_210 : f32 to vector<1x128xf32>
    %716 = arith.cmpf oge, %697, %715 : vector<1x128xf32>
    %cst_211 = arith.constant 3.100000e+01 : f32
    %717 = vector.broadcast %cst_211 : f32 to vector<1x128xf32>
    %718 = arith.cmpf ole, %697, %717 : vector<1x128xf32>
    %719 = arith.andi %716, %718 : vector<1x128xi1>
    %cst_212 = arith.constant 0.000000e+00 : f32
    %720 = vector.broadcast %cst_212 : f32 to vector<1x128xf32>
    %721 = arith.cmpf oge, %703, %720 : vector<1x128xf32>
    %722 = arith.andi %719, %721 : vector<1x128xi1>
    %cst_213 = arith.constant 3.100000e+01 : f32
    %723 = vector.broadcast %cst_213 : f32 to vector<1x128xf32>
    %724 = arith.cmpf ole, %703, %723 : vector<1x128xf32>
    %725 = arith.andi %722, %724 : vector<1x128xi1>
    %726 = arith.andi %714, %725 : vector<1x128xi1>
    %727 = arith.extui %726 : vector<1x128xi1> to vector<1x128xi32>
    %728 = arith.sitofp %727 : vector<1x128xi32> to vector<1x128xf32>
    %729 = tpu.iota {dimensions = array<i32: 0>} : vector<32x128xi32>
    %730 = arith.sitofp %729 : vector<32x128xi32> to vector<32x128xf32>
    %731 = vector.broadcast %697 : vector<1x128xf32> to vector<32x128xf32>
    %732 = arith.subf %730, %731 : vector<32x128xf32>
    %733 = math.absf %732 : vector<32x128xf32>
    %cst_214 = arith.constant 1.000000e+00 : f32
    %734 = vector.broadcast %cst_214 : f32 to vector<32x128xf32>
    %735 = arith.subf %734, %733 : vector<32x128xf32>
    %cst_215 = arith.constant 0.000000e+00 : f32
    %736 = vector.broadcast %cst_215 : f32 to vector<32x128xf32>
    %737 = arith.maximumf %736, %735 : vector<32x128xf32>
    %738 = vector.broadcast %703 : vector<1x128xf32> to vector<32x128xf32>
    %739 = arith.subf %730, %738 : vector<32x128xf32>
    %740 = math.absf %739 : vector<32x128xf32>
    %cst_216 = arith.constant 1.000000e+00 : f32
    %741 = vector.broadcast %cst_216 : f32 to vector<32x128xf32>
    %742 = arith.subf %741, %740 : vector<32x128xf32>
    %cst_217 = arith.constant 0.000000e+00 : f32
    %743 = vector.broadcast %cst_217 : f32 to vector<32x128xf32>
    %744 = arith.maximumf %743, %742 : vector<32x128xf32>
    %c0_218 = arith.constant 0 : index
    %c0_219 = arith.constant 0 : index
    %745 = vector.load %arg10[%c0_218, %c0_219] : memref<128x32xf32, #tpu.memory_space<vmem>>, vector<128x32xf32>
    %cst_220 = arith.constant dense<0.000000e+00> : vector<128x128xf32>
    %746 = tpu.matmul %745, %737, %cst_220 {dimension_numbers = #tpu.dot_dimension_numbers<[1], [0], [0], [1], [0, 0, 1, 1], [], []>} : vector<128x32xf32>, vector<32x128xf32>, vector<128x128xf32> -> vector<128x128xf32>
    %747 = vector.extract_strided_slice %746 {offsets = [0, 0], sizes = [32, 128], strides = [1, 1]} : vector<128x128xf32> to vector<32x128xf32>
    %748 = arith.mulf %747, %744 : vector<32x128xf32>
    %cst_221 = arith.constant dense<0.000000e+00> : vector<128xf32>
    %749 = vector.multi_reduction <add>, %748, %cst_221 [0] : vector<32x128xf32> to vector<128xf32>
    %750 = vector.shape_cast %749 : vector<128xf32> to vector<1x128xf32>
    %751 = arith.mulf %750, %728 : vector<1x128xf32>
    %752 = vector.extract_strided_slice %746 {offsets = [32, 0], sizes = [32, 128], strides = [1, 1]} : vector<128x128xf32> to vector<32x128xf32>
    %753 = arith.mulf %752, %744 : vector<32x128xf32>
    %cst_222 = arith.constant dense<0.000000e+00> : vector<128xf32>
    %754 = vector.multi_reduction <add>, %753, %cst_222 [0] : vector<32x128xf32> to vector<128xf32>
    %755 = vector.shape_cast %754 : vector<128xf32> to vector<1x128xf32>
    %c0_223 = arith.constant 0 : index
    %c512 = arith.constant 512 : index
    %756 = vector.load %arg4[%c0_223, %c512] : memref<3x1024xf32, #tpu.memory_space<vmem>>, vector<1x128xf32>
    %757 = arith.subf %755, %756 : vector<1x128xf32>
    %758 = arith.mulf %751, %757 : vector<1x128xf32>
    %759 = arith.addf %756, %758 : vector<1x128xf32>
    %c0_224 = arith.constant 0 : index
    %c0_225 = arith.constant 0 : index
    %c512_226 = arith.constant 512 : index
    %760 = vector.load %arg7[%c0_224, %c0_225, %c512_226] : memref<3x8x1024xf32, #tpu.memory_space<vmem>>, vector<1x8x128xf32>
    %761 = vector.shape_cast %760 : vector<1x8x128xf32> to vector<8x128xf32>
    %762 = vector.broadcast %759 : vector<1x128xf32> to vector<8x128xf32>
    %763 = arith.mulf %762, %761 : vector<8x128xf32>
    %764 = arith.addf %657, %763 : vector<8x128xf32>
    %765 = arith.mulf %758, %758 : vector<1x128xf32>
    %766 = arith.addf %659, %765 : vector<1x128xf32>
    %767 = vector.extract_strided_slice %746 {offsets = [64, 0], sizes = [32, 128], strides = [1, 1]} : vector<128x128xf32> to vector<32x128xf32>
    %768 = arith.mulf %767, %744 : vector<32x128xf32>
    %cst_227 = arith.constant dense<0.000000e+00> : vector<128xf32>
    %769 = vector.multi_reduction <add>, %768, %cst_227 [0] : vector<32x128xf32> to vector<128xf32>
    %770 = vector.shape_cast %769 : vector<128xf32> to vector<1x128xf32>
    %c1_228 = arith.constant 1 : index
    %c512_229 = arith.constant 512 : index
    %771 = vector.load %arg4[%c1_228, %c512_229] : memref<3x1024xf32, #tpu.memory_space<vmem>>, vector<1x128xf32>
    %772 = arith.subf %770, %771 : vector<1x128xf32>
    %773 = arith.mulf %751, %772 : vector<1x128xf32>
    %774 = arith.addf %771, %773 : vector<1x128xf32>
    %c1_230 = arith.constant 1 : index
    %c0_231 = arith.constant 0 : index
    %c512_232 = arith.constant 512 : index
    %775 = vector.load %arg7[%c1_230, %c0_231, %c512_232] : memref<3x8x1024xf32, #tpu.memory_space<vmem>>, vector<1x8x128xf32>
    %776 = vector.shape_cast %775 : vector<1x8x128xf32> to vector<8x128xf32>
    %777 = vector.broadcast %774 : vector<1x128xf32> to vector<8x128xf32>
    %778 = arith.mulf %777, %776 : vector<8x128xf32>
    %779 = arith.addf %764, %778 : vector<8x128xf32>
    %780 = arith.mulf %773, %773 : vector<1x128xf32>
    %781 = arith.addf %766, %780 : vector<1x128xf32>
    %782 = vector.extract_strided_slice %746 {offsets = [96, 0], sizes = [32, 128], strides = [1, 1]} : vector<128x128xf32> to vector<32x128xf32>
    %783 = arith.mulf %782, %744 : vector<32x128xf32>
    %cst_233 = arith.constant dense<0.000000e+00> : vector<128xf32>
    %784 = vector.multi_reduction <add>, %783, %cst_233 [0] : vector<32x128xf32> to vector<128xf32>
    %785 = vector.shape_cast %784 : vector<128xf32> to vector<1x128xf32>
    %c2_234 = arith.constant 2 : index
    %c512_235 = arith.constant 512 : index
    %786 = vector.load %arg4[%c2_234, %c512_235] : memref<3x1024xf32, #tpu.memory_space<vmem>>, vector<1x128xf32>
    %787 = arith.subf %785, %786 : vector<1x128xf32>
    %788 = arith.mulf %751, %787 : vector<1x128xf32>
    %789 = arith.addf %786, %788 : vector<1x128xf32>
    %c2_236 = arith.constant 2 : index
    %c0_237 = arith.constant 0 : index
    %c512_238 = arith.constant 512 : index
    %790 = vector.load %arg7[%c2_236, %c0_237, %c512_238] : memref<3x8x1024xf32, #tpu.memory_space<vmem>>, vector<1x8x128xf32>
    %791 = vector.shape_cast %790 : vector<1x8x128xf32> to vector<8x128xf32>
    %792 = vector.broadcast %789 : vector<1x128xf32> to vector<8x128xf32>
    %793 = arith.mulf %792, %791 : vector<8x128xf32>
    %794 = arith.addf %779, %793 : vector<8x128xf32>
    %795 = arith.mulf %788, %788 : vector<1x128xf32>
    %796 = arith.addf %781, %795 : vector<1x128xf32>
    %797 = tpu.iota {dimensions = array<i32: 1>} : vector<1x128xi32>
    %c640_i32 = arith.constant 640 : i32
    %798 = vector.broadcast %c640_i32 : i32 to vector<1x128xi32>
    %799 = arith.addi %797, %798 : vector<1x128xi32>
    %800 = arith.sitofp %799 : vector<1x128xi32> to vector<1x128xf32>
    %cst_239 = arith.constant 3.125000e-02 : f32
    %801 = vector.broadcast %cst_239 : f32 to vector<1x128xf32>
    %802 = arith.mulf %800, %801 : vector<1x128xf32>
    %803 = math.floor %802 : vector<1x128xf32>
    %cst_240 = arith.constant 3.200000e+01 : f32
    %804 = vector.broadcast %cst_240 : f32 to vector<1x128xf32>
    %805 = arith.mulf %804, %803 : vector<1x128xf32>
    %806 = arith.subf %800, %805 : vector<1x128xf32>
    %807 = vector.broadcast %1 : f32 to vector<1x128xf32>
    %808 = arith.subf %806, %807 : vector<1x128xf32>
    %809 = vector.broadcast %3 : f32 to vector<1x128xf32>
    %810 = arith.subf %803, %809 : vector<1x128xf32>
    %811 = vector.broadcast %5 : f32 to vector<1x128xf32>
    %812 = arith.subf %808, %811 : vector<1x128xf32>
    %813 = vector.broadcast %7 : f32 to vector<1x128xf32>
    %814 = arith.subf %810, %813 : vector<1x128xf32>
    %815 = vector.broadcast %9 : f32 to vector<1x128xf32>
    %816 = arith.mulf %815, %812 : vector<1x128xf32>
    %817 = vector.broadcast %5 : f32 to vector<1x128xf32>
    %818 = arith.addf %817, %816 : vector<1x128xf32>
    %819 = vector.broadcast %11 : f32 to vector<1x128xf32>
    %820 = arith.mulf %819, %814 : vector<1x128xf32>
    %821 = arith.subf %818, %820 : vector<1x128xf32>
    %822 = vector.broadcast %11 : f32 to vector<1x128xf32>
    %823 = arith.mulf %822, %812 : vector<1x128xf32>
    %824 = vector.broadcast %7 : f32 to vector<1x128xf32>
    %825 = arith.addf %824, %823 : vector<1x128xf32>
    %826 = vector.broadcast %9 : f32 to vector<1x128xf32>
    %827 = arith.mulf %826, %814 : vector<1x128xf32>
    %828 = arith.addf %825, %827 : vector<1x128xf32>
    %cst_241 = arith.constant 5.000000e-01 : f32
    %829 = vector.broadcast %cst_241 : f32 to vector<1x128xf32>
    %830 = arith.addf %821, %829 : vector<1x128xf32>
    %831 = vector.broadcast %13 : f32 to vector<1x128xf32>
    %832 = arith.mulf %830, %831 : vector<1x128xf32>
    %cst_242 = arith.constant 5.000000e-01 : f32
    %833 = vector.broadcast %cst_242 : f32 to vector<1x128xf32>
    %834 = arith.subf %832, %833 : vector<1x128xf32>
    %cst_243 = arith.constant 5.000000e-01 : f32
    %835 = vector.broadcast %cst_243 : f32 to vector<1x128xf32>
    %836 = arith.addf %828, %835 : vector<1x128xf32>
    %837 = vector.broadcast %15 : f32 to vector<1x128xf32>
    %838 = arith.mulf %836, %837 : vector<1x128xf32>
    %cst_244 = arith.constant 5.000000e-01 : f32
    %839 = vector.broadcast %cst_244 : f32 to vector<1x128xf32>
    %840 = arith.subf %838, %839 : vector<1x128xf32>
    %cst_245 = arith.constant 0.000000e+00 : f32
    %841 = vector.broadcast %cst_245 : f32 to vector<1x128xf32>
    %842 = arith.cmpf oge, %808, %841 : vector<1x128xf32>
    %843 = vector.broadcast %17 : f32 to vector<1x128xf32>
    %844 = arith.cmpf ole, %808, %843 : vector<1x128xf32>
    %845 = arith.andi %842, %844 : vector<1x128xi1>
    %cst_246 = arith.constant 0.000000e+00 : f32
    %846 = vector.broadcast %cst_246 : f32 to vector<1x128xf32>
    %847 = arith.cmpf oge, %810, %846 : vector<1x128xf32>
    %848 = arith.andi %845, %847 : vector<1x128xi1>
    %849 = vector.broadcast %19 : f32 to vector<1x128xf32>
    %850 = arith.cmpf ole, %810, %849 : vector<1x128xf32>
    %851 = arith.andi %848, %850 : vector<1x128xi1>
    %cst_247 = arith.constant 0.000000e+00 : f32
    %852 = vector.broadcast %cst_247 : f32 to vector<1x128xf32>
    %853 = arith.cmpf oge, %834, %852 : vector<1x128xf32>
    %cst_248 = arith.constant 3.100000e+01 : f32
    %854 = vector.broadcast %cst_248 : f32 to vector<1x128xf32>
    %855 = arith.cmpf ole, %834, %854 : vector<1x128xf32>
    %856 = arith.andi %853, %855 : vector<1x128xi1>
    %cst_249 = arith.constant 0.000000e+00 : f32
    %857 = vector.broadcast %cst_249 : f32 to vector<1x128xf32>
    %858 = arith.cmpf oge, %840, %857 : vector<1x128xf32>
    %859 = arith.andi %856, %858 : vector<1x128xi1>
    %cst_250 = arith.constant 3.100000e+01 : f32
    %860 = vector.broadcast %cst_250 : f32 to vector<1x128xf32>
    %861 = arith.cmpf ole, %840, %860 : vector<1x128xf32>
    %862 = arith.andi %859, %861 : vector<1x128xi1>
    %863 = arith.andi %851, %862 : vector<1x128xi1>
    %864 = arith.extui %863 : vector<1x128xi1> to vector<1x128xi32>
    %865 = arith.sitofp %864 : vector<1x128xi32> to vector<1x128xf32>
    %866 = tpu.iota {dimensions = array<i32: 0>} : vector<32x128xi32>
    %867 = arith.sitofp %866 : vector<32x128xi32> to vector<32x128xf32>
    %868 = vector.broadcast %834 : vector<1x128xf32> to vector<32x128xf32>
    %869 = arith.subf %867, %868 : vector<32x128xf32>
    %870 = math.absf %869 : vector<32x128xf32>
    %cst_251 = arith.constant 1.000000e+00 : f32
    %871 = vector.broadcast %cst_251 : f32 to vector<32x128xf32>
    %872 = arith.subf %871, %870 : vector<32x128xf32>
    %cst_252 = arith.constant 0.000000e+00 : f32
    %873 = vector.broadcast %cst_252 : f32 to vector<32x128xf32>
    %874 = arith.maximumf %873, %872 : vector<32x128xf32>
    %875 = vector.broadcast %840 : vector<1x128xf32> to vector<32x128xf32>
    %876 = arith.subf %867, %875 : vector<32x128xf32>
    %877 = math.absf %876 : vector<32x128xf32>
    %cst_253 = arith.constant 1.000000e+00 : f32
    %878 = vector.broadcast %cst_253 : f32 to vector<32x128xf32>
    %879 = arith.subf %878, %877 : vector<32x128xf32>
    %cst_254 = arith.constant 0.000000e+00 : f32
    %880 = vector.broadcast %cst_254 : f32 to vector<32x128xf32>
    %881 = arith.maximumf %880, %879 : vector<32x128xf32>
    %c0_255 = arith.constant 0 : index
    %c0_256 = arith.constant 0 : index
    %882 = vector.load %arg10[%c0_255, %c0_256] : memref<128x32xf32, #tpu.memory_space<vmem>>, vector<128x32xf32>
    %cst_257 = arith.constant dense<0.000000e+00> : vector<128x128xf32>
    %883 = tpu.matmul %882, %874, %cst_257 {dimension_numbers = #tpu.dot_dimension_numbers<[1], [0], [0], [1], [0, 0, 1, 1], [], []>} : vector<128x32xf32>, vector<32x128xf32>, vector<128x128xf32> -> vector<128x128xf32>
    %884 = vector.extract_strided_slice %883 {offsets = [0, 0], sizes = [32, 128], strides = [1, 1]} : vector<128x128xf32> to vector<32x128xf32>
    %885 = arith.mulf %884, %881 : vector<32x128xf32>
    %cst_258 = arith.constant dense<0.000000e+00> : vector<128xf32>
    %886 = vector.multi_reduction <add>, %885, %cst_258 [0] : vector<32x128xf32> to vector<128xf32>
    %887 = vector.shape_cast %886 : vector<128xf32> to vector<1x128xf32>
    %888 = arith.mulf %887, %865 : vector<1x128xf32>
    %889 = vector.extract_strided_slice %883 {offsets = [32, 0], sizes = [32, 128], strides = [1, 1]} : vector<128x128xf32> to vector<32x128xf32>
    %890 = arith.mulf %889, %881 : vector<32x128xf32>
    %cst_259 = arith.constant dense<0.000000e+00> : vector<128xf32>
    %891 = vector.multi_reduction <add>, %890, %cst_259 [0] : vector<32x128xf32> to vector<128xf32>
    %892 = vector.shape_cast %891 : vector<128xf32> to vector<1x128xf32>
    %c0_260 = arith.constant 0 : index
    %c640 = arith.constant 640 : index
    %893 = vector.load %arg4[%c0_260, %c640] : memref<3x1024xf32, #tpu.memory_space<vmem>>, vector<1x128xf32>
    %894 = arith.subf %892, %893 : vector<1x128xf32>
    %895 = arith.mulf %888, %894 : vector<1x128xf32>
    %896 = arith.addf %893, %895 : vector<1x128xf32>
    %c0_261 = arith.constant 0 : index
    %c0_262 = arith.constant 0 : index
    %c640_263 = arith.constant 640 : index
    %897 = vector.load %arg7[%c0_261, %c0_262, %c640_263] : memref<3x8x1024xf32, #tpu.memory_space<vmem>>, vector<1x8x128xf32>
    %898 = vector.shape_cast %897 : vector<1x8x128xf32> to vector<8x128xf32>
    %899 = vector.broadcast %896 : vector<1x128xf32> to vector<8x128xf32>
    %900 = arith.mulf %899, %898 : vector<8x128xf32>
    %901 = arith.addf %794, %900 : vector<8x128xf32>
    %902 = arith.mulf %895, %895 : vector<1x128xf32>
    %903 = arith.addf %796, %902 : vector<1x128xf32>
    %904 = vector.extract_strided_slice %883 {offsets = [64, 0], sizes = [32, 128], strides = [1, 1]} : vector<128x128xf32> to vector<32x128xf32>
    %905 = arith.mulf %904, %881 : vector<32x128xf32>
    %cst_264 = arith.constant dense<0.000000e+00> : vector<128xf32>
    %906 = vector.multi_reduction <add>, %905, %cst_264 [0] : vector<32x128xf32> to vector<128xf32>
    %907 = vector.shape_cast %906 : vector<128xf32> to vector<1x128xf32>
    %c1_265 = arith.constant 1 : index
    %c640_266 = arith.constant 640 : index
    %908 = vector.load %arg4[%c1_265, %c640_266] : memref<3x1024xf32, #tpu.memory_space<vmem>>, vector<1x128xf32>
    %909 = arith.subf %907, %908 : vector<1x128xf32>
    %910 = arith.mulf %888, %909 : vector<1x128xf32>
    %911 = arith.addf %908, %910 : vector<1x128xf32>
    %c1_267 = arith.constant 1 : index
    %c0_268 = arith.constant 0 : index
    %c640_269 = arith.constant 640 : index
    %912 = vector.load %arg7[%c1_267, %c0_268, %c640_269] : memref<3x8x1024xf32, #tpu.memory_space<vmem>>, vector<1x8x128xf32>
    %913 = vector.shape_cast %912 : vector<1x8x128xf32> to vector<8x128xf32>
    %914 = vector.broadcast %911 : vector<1x128xf32> to vector<8x128xf32>
    %915 = arith.mulf %914, %913 : vector<8x128xf32>
    %916 = arith.addf %901, %915 : vector<8x128xf32>
    %917 = arith.mulf %910, %910 : vector<1x128xf32>
    %918 = arith.addf %903, %917 : vector<1x128xf32>
    %919 = vector.extract_strided_slice %883 {offsets = [96, 0], sizes = [32, 128], strides = [1, 1]} : vector<128x128xf32> to vector<32x128xf32>
    %920 = arith.mulf %919, %881 : vector<32x128xf32>
    %cst_270 = arith.constant dense<0.000000e+00> : vector<128xf32>
    %921 = vector.multi_reduction <add>, %920, %cst_270 [0] : vector<32x128xf32> to vector<128xf32>
    %922 = vector.shape_cast %921 : vector<128xf32> to vector<1x128xf32>
    %c2_271 = arith.constant 2 : index
    %c640_272 = arith.constant 640 : index
    %923 = vector.load %arg4[%c2_271, %c640_272] : memref<3x1024xf32, #tpu.memory_space<vmem>>, vector<1x128xf32>
    %924 = arith.subf %922, %923 : vector<1x128xf32>
    %925 = arith.mulf %888, %924 : vector<1x128xf32>
    %926 = arith.addf %923, %925 : vector<1x128xf32>
    %c2_273 = arith.constant 2 : index
    %c0_274 = arith.constant 0 : index
    %c640_275 = arith.constant 640 : index
    %927 = vector.load %arg7[%c2_273, %c0_274, %c640_275] : memref<3x8x1024xf32, #tpu.memory_space<vmem>>, vector<1x8x128xf32>
    %928 = vector.shape_cast %927 : vector<1x8x128xf32> to vector<8x128xf32>
    %929 = vector.broadcast %926 : vector<1x128xf32> to vector<8x128xf32>
    %930 = arith.mulf %929, %928 : vector<8x128xf32>
    %931 = arith.addf %916, %930 : vector<8x128xf32>
    %932 = arith.mulf %925, %925 : vector<1x128xf32>
    %933 = arith.addf %918, %932 : vector<1x128xf32>
    %934 = tpu.iota {dimensions = array<i32: 1>} : vector<1x128xi32>
    %c768_i32 = arith.constant 768 : i32
    %935 = vector.broadcast %c768_i32 : i32 to vector<1x128xi32>
    %936 = arith.addi %934, %935 : vector<1x128xi32>
    %937 = arith.sitofp %936 : vector<1x128xi32> to vector<1x128xf32>
    %cst_276 = arith.constant 3.125000e-02 : f32
    %938 = vector.broadcast %cst_276 : f32 to vector<1x128xf32>
    %939 = arith.mulf %937, %938 : vector<1x128xf32>
    %940 = math.floor %939 : vector<1x128xf32>
    %cst_277 = arith.constant 3.200000e+01 : f32
    %941 = vector.broadcast %cst_277 : f32 to vector<1x128xf32>
    %942 = arith.mulf %941, %940 : vector<1x128xf32>
    %943 = arith.subf %937, %942 : vector<1x128xf32>
    %944 = vector.broadcast %1 : f32 to vector<1x128xf32>
    %945 = arith.subf %943, %944 : vector<1x128xf32>
    %946 = vector.broadcast %3 : f32 to vector<1x128xf32>
    %947 = arith.subf %940, %946 : vector<1x128xf32>
    %948 = vector.broadcast %5 : f32 to vector<1x128xf32>
    %949 = arith.subf %945, %948 : vector<1x128xf32>
    %950 = vector.broadcast %7 : f32 to vector<1x128xf32>
    %951 = arith.subf %947, %950 : vector<1x128xf32>
    %952 = vector.broadcast %9 : f32 to vector<1x128xf32>
    %953 = arith.mulf %952, %949 : vector<1x128xf32>
    %954 = vector.broadcast %5 : f32 to vector<1x128xf32>
    %955 = arith.addf %954, %953 : vector<1x128xf32>
    %956 = vector.broadcast %11 : f32 to vector<1x128xf32>
    %957 = arith.mulf %956, %951 : vector<1x128xf32>
    %958 = arith.subf %955, %957 : vector<1x128xf32>
    %959 = vector.broadcast %11 : f32 to vector<1x128xf32>
    %960 = arith.mulf %959, %949 : vector<1x128xf32>
    %961 = vector.broadcast %7 : f32 to vector<1x128xf32>
    %962 = arith.addf %961, %960 : vector<1x128xf32>
    %963 = vector.broadcast %9 : f32 to vector<1x128xf32>
    %964 = arith.mulf %963, %951 : vector<1x128xf32>
    %965 = arith.addf %962, %964 : vector<1x128xf32>
    %cst_278 = arith.constant 5.000000e-01 : f32
    %966 = vector.broadcast %cst_278 : f32 to vector<1x128xf32>
    %967 = arith.addf %958, %966 : vector<1x128xf32>
    %968 = vector.broadcast %13 : f32 to vector<1x128xf32>
    %969 = arith.mulf %967, %968 : vector<1x128xf32>
    %cst_279 = arith.constant 5.000000e-01 : f32
    %970 = vector.broadcast %cst_279 : f32 to vector<1x128xf32>
    %971 = arith.subf %969, %970 : vector<1x128xf32>
    %cst_280 = arith.constant 5.000000e-01 : f32
    %972 = vector.broadcast %cst_280 : f32 to vector<1x128xf32>
    %973 = arith.addf %965, %972 : vector<1x128xf32>
    %974 = vector.broadcast %15 : f32 to vector<1x128xf32>
    %975 = arith.mulf %973, %974 : vector<1x128xf32>
    %cst_281 = arith.constant 5.000000e-01 : f32
    %976 = vector.broadcast %cst_281 : f32 to vector<1x128xf32>
    %977 = arith.subf %975, %976 : vector<1x128xf32>
    %cst_282 = arith.constant 0.000000e+00 : f32
    %978 = vector.broadcast %cst_282 : f32 to vector<1x128xf32>
    %979 = arith.cmpf oge, %945, %978 : vector<1x128xf32>
    %980 = vector.broadcast %17 : f32 to vector<1x128xf32>
    %981 = arith.cmpf ole, %945, %980 : vector<1x128xf32>
    %982 = arith.andi %979, %981 : vector<1x128xi1>
    %cst_283 = arith.constant 0.000000e+00 : f32
    %983 = vector.broadcast %cst_283 : f32 to vector<1x128xf32>
    %984 = arith.cmpf oge, %947, %983 : vector<1x128xf32>
    %985 = arith.andi %982, %984 : vector<1x128xi1>
    %986 = vector.broadcast %19 : f32 to vector<1x128xf32>
    %987 = arith.cmpf ole, %947, %986 : vector<1x128xf32>
    %988 = arith.andi %985, %987 : vector<1x128xi1>
    %cst_284 = arith.constant 0.000000e+00 : f32
    %989 = vector.broadcast %cst_284 : f32 to vector<1x128xf32>
    %990 = arith.cmpf oge, %971, %989 : vector<1x128xf32>
    %cst_285 = arith.constant 3.100000e+01 : f32
    %991 = vector.broadcast %cst_285 : f32 to vector<1x128xf32>
    %992 = arith.cmpf ole, %971, %991 : vector<1x128xf32>
    %993 = arith.andi %990, %992 : vector<1x128xi1>
    %cst_286 = arith.constant 0.000000e+00 : f32
    %994 = vector.broadcast %cst_286 : f32 to vector<1x128xf32>
    %995 = arith.cmpf oge, %977, %994 : vector<1x128xf32>
    %996 = arith.andi %993, %995 : vector<1x128xi1>
    %cst_287 = arith.constant 3.100000e+01 : f32
    %997 = vector.broadcast %cst_287 : f32 to vector<1x128xf32>
    %998 = arith.cmpf ole, %977, %997 : vector<1x128xf32>
    %999 = arith.andi %996, %998 : vector<1x128xi1>
    %1000 = arith.andi %988, %999 : vector<1x128xi1>
    %1001 = arith.extui %1000 : vector<1x128xi1> to vector<1x128xi32>
    %1002 = arith.sitofp %1001 : vector<1x128xi32> to vector<1x128xf32>
    %1003 = tpu.iota {dimensions = array<i32: 0>} : vector<32x128xi32>
    %1004 = arith.sitofp %1003 : vector<32x128xi32> to vector<32x128xf32>
    %1005 = vector.broadcast %971 : vector<1x128xf32> to vector<32x128xf32>
    %1006 = arith.subf %1004, %1005 : vector<32x128xf32>
    %1007 = math.absf %1006 : vector<32x128xf32>
    %cst_288 = arith.constant 1.000000e+00 : f32
    %1008 = vector.broadcast %cst_288 : f32 to vector<32x128xf32>
    %1009 = arith.subf %1008, %1007 : vector<32x128xf32>
    %cst_289 = arith.constant 0.000000e+00 : f32
    %1010 = vector.broadcast %cst_289 : f32 to vector<32x128xf32>
    %1011 = arith.maximumf %1010, %1009 : vector<32x128xf32>
    %1012 = vector.broadcast %977 : vector<1x128xf32> to vector<32x128xf32>
    %1013 = arith.subf %1004, %1012 : vector<32x128xf32>
    %1014 = math.absf %1013 : vector<32x128xf32>
    %cst_290 = arith.constant 1.000000e+00 : f32
    %1015 = vector.broadcast %cst_290 : f32 to vector<32x128xf32>
    %1016 = arith.subf %1015, %1014 : vector<32x128xf32>
    %cst_291 = arith.constant 0.000000e+00 : f32
    %1017 = vector.broadcast %cst_291 : f32 to vector<32x128xf32>
    %1018 = arith.maximumf %1017, %1016 : vector<32x128xf32>
    %c0_292 = arith.constant 0 : index
    %c0_293 = arith.constant 0 : index
    %1019 = vector.load %arg10[%c0_292, %c0_293] : memref<128x32xf32, #tpu.memory_space<vmem>>, vector<128x32xf32>
    %cst_294 = arith.constant dense<0.000000e+00> : vector<128x128xf32>
    %1020 = tpu.matmul %1019, %1011, %cst_294 {dimension_numbers = #tpu.dot_dimension_numbers<[1], [0], [0], [1], [0, 0, 1, 1], [], []>} : vector<128x32xf32>, vector<32x128xf32>, vector<128x128xf32> -> vector<128x128xf32>
    %1021 = vector.extract_strided_slice %1020 {offsets = [0, 0], sizes = [32, 128], strides = [1, 1]} : vector<128x128xf32> to vector<32x128xf32>
    %1022 = arith.mulf %1021, %1018 : vector<32x128xf32>
    %cst_295 = arith.constant dense<0.000000e+00> : vector<128xf32>
    %1023 = vector.multi_reduction <add>, %1022, %cst_295 [0] : vector<32x128xf32> to vector<128xf32>
    %1024 = vector.shape_cast %1023 : vector<128xf32> to vector<1x128xf32>
    %1025 = arith.mulf %1024, %1002 : vector<1x128xf32>
    %1026 = vector.extract_strided_slice %1020 {offsets = [32, 0], sizes = [32, 128], strides = [1, 1]} : vector<128x128xf32> to vector<32x128xf32>
    %1027 = arith.mulf %1026, %1018 : vector<32x128xf32>
    %cst_296 = arith.constant dense<0.000000e+00> : vector<128xf32>
    %1028 = vector.multi_reduction <add>, %1027, %cst_296 [0] : vector<32x128xf32> to vector<128xf32>
    %1029 = vector.shape_cast %1028 : vector<128xf32> to vector<1x128xf32>
    %c0_297 = arith.constant 0 : index
    %c768 = arith.constant 768 : index
    %1030 = vector.load %arg4[%c0_297, %c768] : memref<3x1024xf32, #tpu.memory_space<vmem>>, vector<1x128xf32>
    %1031 = arith.subf %1029, %1030 : vector<1x128xf32>
    %1032 = arith.mulf %1025, %1031 : vector<1x128xf32>
    %1033 = arith.addf %1030, %1032 : vector<1x128xf32>
    %c0_298 = arith.constant 0 : index
    %c0_299 = arith.constant 0 : index
    %c768_300 = arith.constant 768 : index
    %1034 = vector.load %arg7[%c0_298, %c0_299, %c768_300] : memref<3x8x1024xf32, #tpu.memory_space<vmem>>, vector<1x8x128xf32>
    %1035 = vector.shape_cast %1034 : vector<1x8x128xf32> to vector<8x128xf32>
    %1036 = vector.broadcast %1033 : vector<1x128xf32> to vector<8x128xf32>
    %1037 = arith.mulf %1036, %1035 : vector<8x128xf32>
    %1038 = arith.addf %931, %1037 : vector<8x128xf32>
    %1039 = arith.mulf %1032, %1032 : vector<1x128xf32>
    %1040 = arith.addf %933, %1039 : vector<1x128xf32>
    %1041 = vector.extract_strided_slice %1020 {offsets = [64, 0], sizes = [32, 128], strides = [1, 1]} : vector<128x128xf32> to vector<32x128xf32>
    %1042 = arith.mulf %1041, %1018 : vector<32x128xf32>
    %cst_301 = arith.constant dense<0.000000e+00> : vector<128xf32>
    %1043 = vector.multi_reduction <add>, %1042, %cst_301 [0] : vector<32x128xf32> to vector<128xf32>
    %1044 = vector.shape_cast %1043 : vector<128xf32> to vector<1x128xf32>
    %c1_302 = arith.constant 1 : index
    %c768_303 = arith.constant 768 : index
    %1045 = vector.load %arg4[%c1_302, %c768_303] : memref<3x1024xf32, #tpu.memory_space<vmem>>, vector<1x128xf32>
    %1046 = arith.subf %1044, %1045 : vector<1x128xf32>
    %1047 = arith.mulf %1025, %1046 : vector<1x128xf32>
    %1048 = arith.addf %1045, %1047 : vector<1x128xf32>
    %c1_304 = arith.constant 1 : index
    %c0_305 = arith.constant 0 : index
    %c768_306 = arith.constant 768 : index
    %1049 = vector.load %arg7[%c1_304, %c0_305, %c768_306] : memref<3x8x1024xf32, #tpu.memory_space<vmem>>, vector<1x8x128xf32>
    %1050 = vector.shape_cast %1049 : vector<1x8x128xf32> to vector<8x128xf32>
    %1051 = vector.broadcast %1048 : vector<1x128xf32> to vector<8x128xf32>
    %1052 = arith.mulf %1051, %1050 : vector<8x128xf32>
    %1053 = arith.addf %1038, %1052 : vector<8x128xf32>
    %1054 = arith.mulf %1047, %1047 : vector<1x128xf32>
    %1055 = arith.addf %1040, %1054 : vector<1x128xf32>
    %1056 = vector.extract_strided_slice %1020 {offsets = [96, 0], sizes = [32, 128], strides = [1, 1]} : vector<128x128xf32> to vector<32x128xf32>
    %1057 = arith.mulf %1056, %1018 : vector<32x128xf32>
    %cst_307 = arith.constant dense<0.000000e+00> : vector<128xf32>
    %1058 = vector.multi_reduction <add>, %1057, %cst_307 [0] : vector<32x128xf32> to vector<128xf32>
    %1059 = vector.shape_cast %1058 : vector<128xf32> to vector<1x128xf32>
    %c2_308 = arith.constant 2 : index
    %c768_309 = arith.constant 768 : index
    %1060 = vector.load %arg4[%c2_308, %c768_309] : memref<3x1024xf32, #tpu.memory_space<vmem>>, vector<1x128xf32>
    %1061 = arith.subf %1059, %1060 : vector<1x128xf32>
    %1062 = arith.mulf %1025, %1061 : vector<1x128xf32>
    %1063 = arith.addf %1060, %1062 : vector<1x128xf32>
    %c2_310 = arith.constant 2 : index
    %c0_311 = arith.constant 0 : index
    %c768_312 = arith.constant 768 : index
    %1064 = vector.load %arg7[%c2_310, %c0_311, %c768_312] : memref<3x8x1024xf32, #tpu.memory_space<vmem>>, vector<1x8x128xf32>
    %1065 = vector.shape_cast %1064 : vector<1x8x128xf32> to vector<8x128xf32>
    %1066 = vector.broadcast %1063 : vector<1x128xf32> to vector<8x128xf32>
    %1067 = arith.mulf %1066, %1065 : vector<8x128xf32>
    %1068 = arith.addf %1053, %1067 : vector<8x128xf32>
    %1069 = arith.mulf %1062, %1062 : vector<1x128xf32>
    %1070 = arith.addf %1055, %1069 : vector<1x128xf32>
    %1071 = tpu.iota {dimensions = array<i32: 1>} : vector<1x128xi32>
    %c896_i32 = arith.constant 896 : i32
    %1072 = vector.broadcast %c896_i32 : i32 to vector<1x128xi32>
    %1073 = arith.addi %1071, %1072 : vector<1x128xi32>
    %1074 = arith.sitofp %1073 : vector<1x128xi32> to vector<1x128xf32>
    %cst_313 = arith.constant 3.125000e-02 : f32
    %1075 = vector.broadcast %cst_313 : f32 to vector<1x128xf32>
    %1076 = arith.mulf %1074, %1075 : vector<1x128xf32>
    %1077 = math.floor %1076 : vector<1x128xf32>
    %cst_314 = arith.constant 3.200000e+01 : f32
    %1078 = vector.broadcast %cst_314 : f32 to vector<1x128xf32>
    %1079 = arith.mulf %1078, %1077 : vector<1x128xf32>
    %1080 = arith.subf %1074, %1079 : vector<1x128xf32>
    %1081 = vector.broadcast %1 : f32 to vector<1x128xf32>
    %1082 = arith.subf %1080, %1081 : vector<1x128xf32>
    %1083 = vector.broadcast %3 : f32 to vector<1x128xf32>
    %1084 = arith.subf %1077, %1083 : vector<1x128xf32>
    %1085 = vector.broadcast %5 : f32 to vector<1x128xf32>
    %1086 = arith.subf %1082, %1085 : vector<1x128xf32>
    %1087 = vector.broadcast %7 : f32 to vector<1x128xf32>
    %1088 = arith.subf %1084, %1087 : vector<1x128xf32>
    %1089 = vector.broadcast %9 : f32 to vector<1x128xf32>
    %1090 = arith.mulf %1089, %1086 : vector<1x128xf32>
    %1091 = vector.broadcast %5 : f32 to vector<1x128xf32>
    %1092 = arith.addf %1091, %1090 : vector<1x128xf32>
    %1093 = vector.broadcast %11 : f32 to vector<1x128xf32>
    %1094 = arith.mulf %1093, %1088 : vector<1x128xf32>
    %1095 = arith.subf %1092, %1094 : vector<1x128xf32>
    %1096 = vector.broadcast %11 : f32 to vector<1x128xf32>
    %1097 = arith.mulf %1096, %1086 : vector<1x128xf32>
    %1098 = vector.broadcast %7 : f32 to vector<1x128xf32>
    %1099 = arith.addf %1098, %1097 : vector<1x128xf32>
    %1100 = vector.broadcast %9 : f32 to vector<1x128xf32>
    %1101 = arith.mulf %1100, %1088 : vector<1x128xf32>
    %1102 = arith.addf %1099, %1101 : vector<1x128xf32>
    %cst_315 = arith.constant 5.000000e-01 : f32
    %1103 = vector.broadcast %cst_315 : f32 to vector<1x128xf32>
    %1104 = arith.addf %1095, %1103 : vector<1x128xf32>
    %1105 = vector.broadcast %13 : f32 to vector<1x128xf32>
    %1106 = arith.mulf %1104, %1105 : vector<1x128xf32>
    %cst_316 = arith.constant 5.000000e-01 : f32
    %1107 = vector.broadcast %cst_316 : f32 to vector<1x128xf32>
    %1108 = arith.subf %1106, %1107 : vector<1x128xf32>
    %cst_317 = arith.constant 5.000000e-01 : f32
    %1109 = vector.broadcast %cst_317 : f32 to vector<1x128xf32>
    %1110 = arith.addf %1102, %1109 : vector<1x128xf32>
    %1111 = vector.broadcast %15 : f32 to vector<1x128xf32>
    %1112 = arith.mulf %1110, %1111 : vector<1x128xf32>
    %cst_318 = arith.constant 5.000000e-01 : f32
    %1113 = vector.broadcast %cst_318 : f32 to vector<1x128xf32>
    %1114 = arith.subf %1112, %1113 : vector<1x128xf32>
    %cst_319 = arith.constant 0.000000e+00 : f32
    %1115 = vector.broadcast %cst_319 : f32 to vector<1x128xf32>
    %1116 = arith.cmpf oge, %1082, %1115 : vector<1x128xf32>
    %1117 = vector.broadcast %17 : f32 to vector<1x128xf32>
    %1118 = arith.cmpf ole, %1082, %1117 : vector<1x128xf32>
    %1119 = arith.andi %1116, %1118 : vector<1x128xi1>
    %cst_320 = arith.constant 0.000000e+00 : f32
    %1120 = vector.broadcast %cst_320 : f32 to vector<1x128xf32>
    %1121 = arith.cmpf oge, %1084, %1120 : vector<1x128xf32>
    %1122 = arith.andi %1119, %1121 : vector<1x128xi1>
    %1123 = vector.broadcast %19 : f32 to vector<1x128xf32>
    %1124 = arith.cmpf ole, %1084, %1123 : vector<1x128xf32>
    %1125 = arith.andi %1122, %1124 : vector<1x128xi1>
    %cst_321 = arith.constant 0.000000e+00 : f32
    %1126 = vector.broadcast %cst_321 : f32 to vector<1x128xf32>
    %1127 = arith.cmpf oge, %1108, %1126 : vector<1x128xf32>
    %cst_322 = arith.constant 3.100000e+01 : f32
    %1128 = vector.broadcast %cst_322 : f32 to vector<1x128xf32>
    %1129 = arith.cmpf ole, %1108, %1128 : vector<1x128xf32>
    %1130 = arith.andi %1127, %1129 : vector<1x128xi1>
    %cst_323 = arith.constant 0.000000e+00 : f32
    %1131 = vector.broadcast %cst_323 : f32 to vector<1x128xf32>
    %1132 = arith.cmpf oge, %1114, %1131 : vector<1x128xf32>
    %1133 = arith.andi %1130, %1132 : vector<1x128xi1>
    %cst_324 = arith.constant 3.100000e+01 : f32
    %1134 = vector.broadcast %cst_324 : f32 to vector<1x128xf32>
    %1135 = arith.cmpf ole, %1114, %1134 : vector<1x128xf32>
    %1136 = arith.andi %1133, %1135 : vector<1x128xi1>
    %1137 = arith.andi %1125, %1136 : vector<1x128xi1>
    %1138 = arith.extui %1137 : vector<1x128xi1> to vector<1x128xi32>
    %1139 = arith.sitofp %1138 : vector<1x128xi32> to vector<1x128xf32>
    %1140 = tpu.iota {dimensions = array<i32: 0>} : vector<32x128xi32>
    %1141 = arith.sitofp %1140 : vector<32x128xi32> to vector<32x128xf32>
    %1142 = vector.broadcast %1108 : vector<1x128xf32> to vector<32x128xf32>
    %1143 = arith.subf %1141, %1142 : vector<32x128xf32>
    %1144 = math.absf %1143 : vector<32x128xf32>
    %cst_325 = arith.constant 1.000000e+00 : f32
    %1145 = vector.broadcast %cst_325 : f32 to vector<32x128xf32>
    %1146 = arith.subf %1145, %1144 : vector<32x128xf32>
    %cst_326 = arith.constant 0.000000e+00 : f32
    %1147 = vector.broadcast %cst_326 : f32 to vector<32x128xf32>
    %1148 = arith.maximumf %1147, %1146 : vector<32x128xf32>
    %1149 = vector.broadcast %1114 : vector<1x128xf32> to vector<32x128xf32>
    %1150 = arith.subf %1141, %1149 : vector<32x128xf32>
    %1151 = math.absf %1150 : vector<32x128xf32>
    %cst_327 = arith.constant 1.000000e+00 : f32
    %1152 = vector.broadcast %cst_327 : f32 to vector<32x128xf32>
    %1153 = arith.subf %1152, %1151 : vector<32x128xf32>
    %cst_328 = arith.constant 0.000000e+00 : f32
    %1154 = vector.broadcast %cst_328 : f32 to vector<32x128xf32>
    %1155 = arith.maximumf %1154, %1153 : vector<32x128xf32>
    %c0_329 = arith.constant 0 : index
    %c0_330 = arith.constant 0 : index
    %1156 = vector.load %arg10[%c0_329, %c0_330] : memref<128x32xf32, #tpu.memory_space<vmem>>, vector<128x32xf32>
    %cst_331 = arith.constant dense<0.000000e+00> : vector<128x128xf32>
    %1157 = tpu.matmul %1156, %1148, %cst_331 {dimension_numbers = #tpu.dot_dimension_numbers<[1], [0], [0], [1], [0, 0, 1, 1], [], []>} : vector<128x32xf32>, vector<32x128xf32>, vector<128x128xf32> -> vector<128x128xf32>
    %1158 = vector.extract_strided_slice %1157 {offsets = [0, 0], sizes = [32, 128], strides = [1, 1]} : vector<128x128xf32> to vector<32x128xf32>
    %1159 = arith.mulf %1158, %1155 : vector<32x128xf32>
    %cst_332 = arith.constant dense<0.000000e+00> : vector<128xf32>
    %1160 = vector.multi_reduction <add>, %1159, %cst_332 [0] : vector<32x128xf32> to vector<128xf32>
    %1161 = vector.shape_cast %1160 : vector<128xf32> to vector<1x128xf32>
    %1162 = arith.mulf %1161, %1139 : vector<1x128xf32>
    %1163 = vector.extract_strided_slice %1157 {offsets = [32, 0], sizes = [32, 128], strides = [1, 1]} : vector<128x128xf32> to vector<32x128xf32>
    %1164 = arith.mulf %1163, %1155 : vector<32x128xf32>
    %cst_333 = arith.constant dense<0.000000e+00> : vector<128xf32>
    %1165 = vector.multi_reduction <add>, %1164, %cst_333 [0] : vector<32x128xf32> to vector<128xf32>
    %1166 = vector.shape_cast %1165 : vector<128xf32> to vector<1x128xf32>
    %c0_334 = arith.constant 0 : index
    %c896 = arith.constant 896 : index
    %1167 = vector.load %arg4[%c0_334, %c896] : memref<3x1024xf32, #tpu.memory_space<vmem>>, vector<1x128xf32>
    %1168 = arith.subf %1166, %1167 : vector<1x128xf32>
    %1169 = arith.mulf %1162, %1168 : vector<1x128xf32>
    %1170 = arith.addf %1167, %1169 : vector<1x128xf32>
    %c0_335 = arith.constant 0 : index
    %c0_336 = arith.constant 0 : index
    %c896_337 = arith.constant 896 : index
    %1171 = vector.load %arg7[%c0_335, %c0_336, %c896_337] : memref<3x8x1024xf32, #tpu.memory_space<vmem>>, vector<1x8x128xf32>
    %1172 = vector.shape_cast %1171 : vector<1x8x128xf32> to vector<8x128xf32>
    %1173 = vector.broadcast %1170 : vector<1x128xf32> to vector<8x128xf32>
    %1174 = arith.mulf %1173, %1172 : vector<8x128xf32>
    %1175 = arith.addf %1068, %1174 : vector<8x128xf32>
    %1176 = arith.mulf %1169, %1169 : vector<1x128xf32>
    %1177 = arith.addf %1070, %1176 : vector<1x128xf32>
    %1178 = vector.extract_strided_slice %1157 {offsets = [64, 0], sizes = [32, 128], strides = [1, 1]} : vector<128x128xf32> to vector<32x128xf32>
    %1179 = arith.mulf %1178, %1155 : vector<32x128xf32>
    %cst_338 = arith.constant dense<0.000000e+00> : vector<128xf32>
    %1180 = vector.multi_reduction <add>, %1179, %cst_338 [0] : vector<32x128xf32> to vector<128xf32>
    %1181 = vector.shape_cast %1180 : vector<128xf32> to vector<1x128xf32>
    %c1_339 = arith.constant 1 : index
    %c896_340 = arith.constant 896 : index
    %1182 = vector.load %arg4[%c1_339, %c896_340] : memref<3x1024xf32, #tpu.memory_space<vmem>>, vector<1x128xf32>
    %1183 = arith.subf %1181, %1182 : vector<1x128xf32>
    %1184 = arith.mulf %1162, %1183 : vector<1x128xf32>
    %1185 = arith.addf %1182, %1184 : vector<1x128xf32>
    %c1_341 = arith.constant 1 : index
    %c0_342 = arith.constant 0 : index
    %c896_343 = arith.constant 896 : index
    %1186 = vector.load %arg7[%c1_341, %c0_342, %c896_343] : memref<3x8x1024xf32, #tpu.memory_space<vmem>>, vector<1x8x128xf32>
    %1187 = vector.shape_cast %1186 : vector<1x8x128xf32> to vector<8x128xf32>
    %1188 = vector.broadcast %1185 : vector<1x128xf32> to vector<8x128xf32>
    %1189 = arith.mulf %1188, %1187 : vector<8x128xf32>
    %1190 = arith.addf %1175, %1189 : vector<8x128xf32>
    %1191 = arith.mulf %1184, %1184 : vector<1x128xf32>
    %1192 = arith.addf %1177, %1191 : vector<1x128xf32>
    %1193 = vector.extract_strided_slice %1157 {offsets = [96, 0], sizes = [32, 128], strides = [1, 1]} : vector<128x128xf32> to vector<32x128xf32>
    %1194 = arith.mulf %1193, %1155 : vector<32x128xf32>
    %cst_344 = arith.constant dense<0.000000e+00> : vector<128xf32>
    %1195 = vector.multi_reduction <add>, %1194, %cst_344 [0] : vector<32x128xf32> to vector<128xf32>
    %1196 = vector.shape_cast %1195 : vector<128xf32> to vector<1x128xf32>
    %c2_345 = arith.constant 2 : index
    %c896_346 = arith.constant 896 : index
    %1197 = vector.load %arg4[%c2_345, %c896_346] : memref<3x1024xf32, #tpu.memory_space<vmem>>, vector<1x128xf32>
    %1198 = arith.subf %1196, %1197 : vector<1x128xf32>
    %1199 = arith.mulf %1162, %1198 : vector<1x128xf32>
    %1200 = arith.addf %1197, %1199 : vector<1x128xf32>
    %c2_347 = arith.constant 2 : index
    %c0_348 = arith.constant 0 : index
    %c896_349 = arith.constant 896 : index
    %1201 = vector.load %arg7[%c2_347, %c0_348, %c896_349] : memref<3x8x1024xf32, #tpu.memory_space<vmem>>, vector<1x8x128xf32>
    %1202 = vector.shape_cast %1201 : vector<1x8x128xf32> to vector<8x128xf32>
    %1203 = vector.broadcast %1200 : vector<1x128xf32> to vector<8x128xf32>
    %1204 = arith.mulf %1203, %1202 : vector<8x128xf32>
    %1205 = arith.addf %1190, %1204 : vector<8x128xf32>
    %1206 = arith.mulf %1199, %1199 : vector<1x128xf32>
    %1207 = arith.addf %1192, %1206 : vector<1x128xf32>
    %cst_350 = arith.constant dense<0.000000e+00> : vector<8xf32>
    %1208 = vector.multi_reduction <add>, %1205, %cst_350 [1] : vector<8x128xf32> to vector<8xf32>
    %1209 = vector.shape_cast %1208 : vector<8xf32> to vector<8x1xf32>
    %c0_351 = arith.constant 0 : index
    %c0_352 = arith.constant 0 : index
    %1210 = vector.load %arg8[%c0_351, %c0_352] : memref<8x1xf32, #tpu.memory_space<vmem>>, vector<8x1xf32>
    %1211 = arith.addf %1209, %1210 : vector<8x1xf32>
    %cst_353 = arith.constant dense<0xFF800000> : vector<1xf32>
    %1212 = vector.multi_reduction <maximumf>, %1211, %cst_353 [0] : vector<8x1xf32> to vector<1xf32>
    %1213 = vector.shape_cast %1212 : vector<1xf32> to vector<1x1xf32>
    %1214 = vector.broadcast %1213 : vector<1x1xf32> to vector<8x1xf32>
    %1215 = arith.subf %1211, %1214 : vector<8x1xf32>
    %1216 = math.exp %1215 : vector<8x1xf32>
    %1217 = tpu.iota {dimensions = array<i32: 0>} : vector<8x1xi32>
    %c5_i32 = arith.constant 5 : i32
    %1218 = vector.broadcast %c5_i32 : i32 to vector<8x1xi32>
    %1219 = arith.cmpi eq, %1217, %1218 : vector<8x1xi32>
    %1220 = arith.extui %1219 : vector<8x1xi1> to vector<8x1xi32>
    %1221 = arith.sitofp %1220 : vector<8x1xi32> to vector<8x1xf32>
    %1222 = arith.mulf %1216, %1221 : vector<8x1xf32>
    %cst_354 = arith.constant dense<0.000000e+00> : vector<1xf32>
    %1223 = vector.multi_reduction <add>, %1222, %cst_354 [0] : vector<8x1xf32> to vector<1xf32>
    %1224 = vector.shape_cast %1223 : vector<1xf32> to vector<1x1xf32>
    %cst_355 = arith.constant dense<0.000000e+00> : vector<1xf32>
    %1225 = vector.multi_reduction <add>, %1216, %cst_355 [0] : vector<8x1xf32> to vector<1xf32>
    %1226 = vector.shape_cast %1225 : vector<1xf32> to vector<1x1xf32>
    %1227 = arith.divf %1224, %1226 : vector<1x1xf32>
    %cst_356 = arith.constant dense<0.000000e+00> : vector<1xf32>
    %1228 = vector.multi_reduction <add>, %1207, %cst_356 [1] : vector<1x128xf32> to vector<1xf32>
    %1229 = vector.shape_cast %1228 : vector<1xf32> to vector<1x1xf32>
    %cst_357 = arith.constant 0.000000e+00 : f32
    %1230 = vector.broadcast %cst_357 : f32 to vector<1x1xf32>
    %1231 = arith.subf %1230, %1229 : vector<1x1xf32>
    %cst_358 = arith.constant 3.25520843E-4 : f32
    %1232 = vector.broadcast %cst_358 : f32 to vector<1x1xf32>
    %1233 = arith.mulf %1231, %1232 : vector<1x1xf32>
    %1234 = math.exp %1233 : vector<1x1xf32>
    %cst_359 = arith.constant 0.00999999977 : f32
    %1235 = vector.broadcast %cst_359 : f32 to vector<1x1xf32>
    %1236 = arith.cmpf olt, %1227, %1235 : vector<1x1xf32>
    %cst_360 = arith.constant -1.000000e+00 : f32
    %1237 = vector.broadcast %cst_360 : f32 to vector<1x1xf32>
    %1238 = arith.addf %1237, %1234 : vector<1x1xf32>
    %1239 = arith.addf %1227, %1234 : vector<1x1xf32>
    %cst_361 = arith.constant 1.000000e+00 : f32
    %1240 = vector.broadcast %cst_361 : f32 to vector<1x1xf32>
    %1241 = arith.cmpf olt, %1239, %1240 : vector<1x1xf32>
    %cst_362 = arith.constant 5.000000e-01 : f32
    %1242 = vector.broadcast %cst_362 : f32 to vector<1x1xf32>
    %1243 = arith.cmpf olt, %1234, %1242 : vector<1x1xf32>
    %1244 = arith.addf %1227, %1234 : vector<1x1xf32>
    %cst_363 = arith.constant 1.000000e+00 : f32
    %1245 = vector.broadcast %cst_363 : f32 to vector<1x1xf32>
    %1246 = arith.cmpf olt, %1227, %1245 : vector<1x1xf32>
    %cst_364 = arith.constant 2.000000e+00 : f32
    %1247 = vector.broadcast %cst_364 : f32 to vector<1x1xf32>
    %1248 = arith.addf %1247, %1227 : vector<1x1xf32>
    %cst_365 = arith.constant 2.000000e+00 : f32
    %1249 = vector.broadcast %cst_365 : f32 to vector<1x1xf32>
    %1250 = arith.addf %1249, %1227 : vector<1x1xf32>
    %1251 = arith.addf %1250, %1234 : vector<1x1xf32>
    %1252 = arith.select %1246, %1248, %1251 : vector<1x1xi1>, vector<1x1xf32>
    %1253 = arith.select %1243, %1244, %1252 : vector<1x1xi1>, vector<1x1xf32>
    %1254 = arith.select %1241, %1227, %1253 : vector<1x1xi1>, vector<1x1xf32>
    %1255 = arith.select %1236, %1238, %1254 : vector<1x1xi1>, vector<1x1xf32>
    %1256 = vector.shape_cast %1255 : vector<1x1xf32> to vector<1x1x1xf32>
    %1257 = vector.broadcast %1256 : vector<1x1x1xf32> to vector<1x1x128xf32>
    %c0_366 = arith.constant 0 : index
    %c0_367 = arith.constant 0 : index
    %c0_368 = arith.constant 0 : index
    %1258 = vector.load %arg9[%c0_366, %c0_367, %c0_368] : memref<1x1x128xf32, #tpu.memory_space<vmem>>, vector<1x1x128xf32>
    tpu.vector_store %arg9[%c0_366, %c0_367, %c0_368], %1257 {strides = array<i32>} : memref<1x1x128xf32, #tpu.memory_space<vmem>>, vector<1x1x128xf32>,
    return
  }
  func.func @transform_0(%arg0: i32, %arg1: memref<1x17xf32, #tpu.memory_space<smem>>) -> (i32, i32, i32) {
    %c0_i32 = arith.constant 0 : i32
    %c0_i32_0 = arith.constant 0 : i32
    %c0_i32_1 = arith.constant 0 : i32
    %c0_i32_2 = arith.constant 0 : i32
    return %c0_i32, %c0_i32_0, %c0_i32_1 : i32, i32, i32
  }
  func.func @transform_1(%arg0: i32, %arg1: memref<1x17xf32, #tpu.memory_space<smem>>) -> (i32, i32, i32) {
    %c0_i32 = arith.constant 0 : i32
    %c0_i32_0 = arith.constant 0 : i32
    %c0_i32_1 = arith.constant 0 : i32
    %c0_i32_2 = arith.constant 0 : i32
    return %c0_i32, %c0_i32_0, %c0_i32_1 : i32, i32, i32
  }
  func.func @transform_2(%arg0: i32, %arg1: memref<1x17xf32, #tpu.memory_space<smem>>) -> (i32, i32) {
    %c0_i32 = arith.constant 0 : i32
    %c0_i32_0 = arith.constant 0 : i32
    %c0_i32_1 = arith.constant 0 : i32
    return %c0_i32, %c0_i32_0 : i32, i32
  }
  func.func @transform_3(%arg0: i32, %arg1: memref<1x17xf32, #tpu.memory_space<smem>>) -> (i32, i32) {
    %c0_i32 = arith.constant 0 : i32
    %c0_i32_0 = arith.constant 0 : i32
    %c0_i32_1 = arith.constant 0 : i32
    return %c0_i32, %c0_i32_0 : i32, i32
  }
  func.func @transform_4(%arg0: i32, %arg1: memref<1x17xf32, #tpu.memory_space<smem>>) -> (i32, i32) {
    %c0_i32 = arith.constant 0 : i32
    %c0_i32_0 = arith.constant 0 : i32
    %c0_i32_1 = arith.constant 0 : i32
    return %c0_i32, %c0_i32_0 : i32, i32
  }
  func.func @transform_5(%arg0: i32, %arg1: memref<1x17xf32, #tpu.memory_space<smem>>) -> (i32, i32, i32) {
    %c0_i32 = arith.constant 0 : i32
    %c0_i32_0 = arith.constant 0 : i32
    %c0_i32_1 = arith.constant 0 : i32
    %c0_i32_2 = arith.constant 0 : i32
    return %c0_i32, %c0_i32_0, %c0_i32_1 : i32, i32, i32
  }
  func.func @transform_6(%arg0: i32, %arg1: memref<1x17xf32, #tpu.memory_space<smem>>) -> (i32, i32) {
    %c0_i32 = arith.constant 0 : i32
    %c0_i32_0 = arith.constant 0 : i32
    %c0_i32_1 = arith.constant 0 : i32
    return %c0_i32, %c0_i32_0 : i32, i32
  }
  func.func @transform_7(%arg0: i32, %arg1: memref<1x17xf32, #tpu.memory_space<smem>>) -> (i32, i32, i32) {
    %c0_i32 = arith.constant 0 : i32
    %c0_i32_0 = arith.constant 0 : i32
    %c0_i32_1 = arith.constant 0 : i32
    return %arg0, %c0_i32, %c0_i32_0 : i32, i32, i32
  }
}

</mosaic_0001>

<bundles_post_ra>
// kernel: alternate_random_search_forward.1
= control target key start
LH: loop header
LB: loop body
LE: loop exit
PB: predicated region body
PF: predicated region fallthrough
CT: control target
= control target key end

     0   :  { %s2678_s30 = smov [#allocation4]   ;;  %s4482_s0 = inlined_call_operand.vmem [shape: f32[1,17], index: 0, kind: input, shape index: {}]   ;;  %s4483_s1 = inlined_call_operand.hbm [shape: f32[7,32,32], index: 1, kind: input, shape index: {}]   ;;  %s4484_s2 = inlined_call_operand.hbm [shape: f32[7,32,32], index: 2, kind: input, shape index: {}]   ;;  %s4485_s3 = inlined_call_operand.vmem [shape: f32[3,1024], index: 3, kind: input, shape index: {}]   ;;  %s4486_s4 = inlined_call_operand.vmem [shape: f32[96,32], index: 4, kind: input, shape index: {}]   ;;  %s4487_s5 = inlined_call_operand.vmem [shape: f32[32,32], index: 5, kind: input, shape index: {}]   ;;  %s4488_s6 = inlined_call_operand.hbm [shape: f32[3,8,1024], index: 6, kind: input, shape index: {}]   ;;  %s4489_s7 = inlined_call_operand.vmem [shape: f32[8,1], index: 7, kind: input, shape index: {}]   ;;  %s4490_s8 = inlined_call_operand.hbm [shape: f32[1,1,128], index: 8, kind: output, shape index: {}]  }
   0x1   :  { %s14_s29 = sshll.u32 %s4482_s0, 4  ;;  %s15_s29 = int_to_ptr.vmem [resolvable:$true] %s14_s29 }
   0x2   :  { %17 = dma.vmem_to_smem %s15_s29, 16, %s2678_s30, [#allocation3] }
   0x3   :  { %2670 = dma.done.wait [#allocation3], 16 }
   0x4   :  { %2671 = vsyncadd [#allocation3], 4294967280 }
   0x5   :  { %20 = sfence }
   0x6   :  { %21 = vsyncpa [#allocation6], 0 }
   0x7   :  { %22 = vsyncpa [#allocation9], 0 }
   0x8   :  { %23 = vsyncpa [#allocation7], 0  ;;  %s41_s11 = sshll.u32 %s4484_s2, 4  ;;  %s2679_s12 = smov [#allocation8]   ;;  %s42_s11 = int_to_ptr.hbm [resolvable:$true] %s41_s11 }
   0x9   :  { %s43_s13 = sshll.u32 %s2679_s12, 4  ;;  %s28_s0 = sshll.u32 %s4483_s1, 4  ;;  %s44_s13 = int_to_ptr.vmem [resolvable:$true] %s43_s13  ;;  %s29_s0 = int_to_ptr.hbm [resolvable:$true] %s28_s0 }
   0xa   :  { %s2680_s16 = smov 128   ;;  %s2681_s17 = smov 8  }
   0xb   :  { %49 = dma.hbm_to_vmem [thread:$0]  %s42_s11, 3584, %s44_s13, [#allocation9], %s2680_s16, %s2680_s16, %s2681_s17  }
   0xc   :  { %s2682_s18 = smov [#allocation5]   ;;  %s60_s22 = sshll.u32 %s4488_s6, 4  ;;  %s61_s22 = int_to_ptr.hbm [resolvable:$true] %s60_s22 }
   0xd   :  { %s30_s19 = sshll.u32 %s2682_s18, 4  ;;  %s2683_s2 = smov [#allocation10]   ;;  %s31_s19 = int_to_ptr.vmem [resolvable:$true] %s30_s19 }
   0xe   :  { %36 = dma.hbm_to_vmem [thread:$0]  %s29_s0, 3584, %s31_s19, [#allocation6], %s2680_s16, %s2680_s16, %s2681_s17  }
   0xf   :  { %s62_s23 = sshll.u32 %s2683_s2, 4  ;;  %s2684_s24 = smov 1024   ;;  %s63_s23 = int_to_ptr.vmem [resolvable:$true] %s62_s23 }
  0x10   :  { %s2685_s25 = smov 64  }
  0x11   :  { %68 = dma.hbm_to_vmem [thread:$0]  %s61_s22, 3072, %s63_s23, [#allocation9], %s2684_s24, %s2684_s24, %s2685_s25  }
  0x12   :  { %2672 = dma.done.wait [#allocation6], 3584  }
  0x13   :  { %2673 = vsyncadd [#allocation6], 4294963712 }
  0x14   :  { %2674 = dma.done.wait [#allocation9], 6656  }
  0x15   :  { %2675 = vsyncadd [#allocation9], 4294960640  ;;  %s2366_s1 = sld [smem:[#allocation4 + $0xa]]  ;;  %v117_v1 = vld [vmem:[#allocation8 + $0x18] sm:$0xff]  ;;  %v116_v9 = vld [vmem:[#allocation8 + $0x10] sm:$0xff]  ;;  %vm300_vm0 = vcmask 261120  }
  0x16   :  { %s2367_s26 = sld [smem:[#allocation4 + $0xb]]  ;;  %v142_v2 = vld [vmem:[#allocation8 + $0x38] sm:$0xff]  ;;  %v141_v10 = vld [vmem:[#allocation8 + $0x30] sm:$0xff]  ;;  %v115_v27 = vld [vmem:[#allocation8 + $0x8] sm:$0xff] }
  0x17   :  { %s2368_s27 = sld [smem:[#allocation4 + $0xc]]  ;;  %v171_v3 = vld [vmem:[#allocation8 + $0x58] sm:$0xff]  ;;  %v170_v16 = vld [vmem:[#allocation8 + $0x50] sm:$0xff]  ;;  %v140_v28 = vld [vmem:[#allocation8 + $0x28] sm:$0xff] }
  0x18   :  { %s2369_s28 = sld [smem:[#allocation4 + $0xd]]  ;;  %v200_v6 = vld [vmem:[#allocation8 + $0x78] sm:$0xff]  ;;  %v199_v17 = vld [vmem:[#allocation8 + $0x70] sm:$0xff]  ;;  %v169_v29 = vld [vmem:[#allocation8 + $0x48] sm:$0xff] }
  0x19   :  { %s2370_s29 = sld [smem:[#allocation4 + $0xe]]  ;;  %v229_v13 = vld [vmem:[#allocation8 + $0x98] sm:$0xff]  ;;  %v228_v23 = vld [vmem:[#allocation8 + $0x90] sm:$0xff]  ;;  %v198_v38 = vld [vmem:[#allocation8 + $0x68] sm:$0xff] }
  0x1a   :  { %s2371_s30 = sld [smem:[#allocation4 + $0xf]]  ;;  %v258_v21 = vld [vmem:[#allocation8 + $0xb8] sm:$0xff]  ;;  %v257_v34 = vld [vmem:[#allocation8 + $0xb0] sm:$0xff]  ;;  %v114_v39 = vld [vmem:[#allocation8] sm:$0xff] }
  0x1b   :  { %v2746_v0 = vstv %s2366_s1  ;;  %s2372_s6 = sld [smem:[#allocation4 + $0x10]]  ;;  %v287_v33 = vld [vmem:[#allocation8 + $0xd8] sm:$0xff]  ;;  %v286_v41 = vld [vmem:[#allocation8 + $0xd0] sm:$0xff]  ;;  %v139_v45 = vld [vmem:[#allocation8 + $0x20] sm:$0xff] }
  0x1c   :  { %v121_v4 = vmul.f32 %v117_v1, %v2746_v0  ;;  %v2749_v5 = vstv %s2367_s26  ;;  %v120_v14 = vmul.f32 %v116_v9, %v2746_v0  ;;  %v119_v42 = vmul.f32 %v115_v27, %v2746_v0  ;;  %v168_v46 = vld [vmem:[#allocation8 + $0x40] sm:$0xff]  ;;  %v227_v50 = vld [vmem:[#allocation8 + $0x88] sm:$0xff]  ;;  %s2816_s16 = sld [smem:[#allocation4]] }
  0x1d   :  { %v146_v7 = vmul.f32 %v142_v2, %v2749_v5  ;;  %v2752_v8 = vstv %s2368_s27  ;;  %v145_v15 = vmul.f32 %v141_v10, %v2749_v5  ;;  %v144_v43 = vmul.f32 %v140_v28, %v2749_v5  ;;  %v197_v55 = vld [vmem:[#allocation8 + $0x60] sm:$0xff]  ;;  %v256_v58 = vld [vmem:[#allocation8 + $0xa8] sm:$0xff]  ;;  %s2822_s17 = sld [smem:[#allocation4 + $0x3]] }
  0x1e   :  { %v175_v11 = vmul.f32 %v171_v3, %v2752_v8  ;;  %v2755_v12 = vstv %s2369_s28  ;;  %v174_v22 = vmul.f32 %v170_v16, %v2752_v8  ;;  %v173_v44 = vmul.f32 %v169_v29, %v2752_v8  ;;  %v226_v1 = vld [vmem:[#allocation8 + $0x80] sm:$0xff]  ;;  %v285_v3 = vld [vmem:[#allocation8 + $0xc8] sm:$0xff]  ;;  %v298_v29 = vld [vmem:[%s4487_s5 + $0x10] sm:$0xff]  ;;  %s2828_s18 = sld [smem:[#allocation4 + $0x2]] }
  0x1f   :  { %v150_v18 = vadd.f32 %v146_v7, %v121_v4  ;;  %v204_v19 = vmul.f32 %v200_v6, %v2755_v12  ;;  %v2760_v20 = vstv %s2370_s29  ;;  %v149_v25 = vadd.f32 %v145_v15, %v120_v14  ;;  %s2831_s19 = sld [smem:[#allocation4 + $0x4]] }
  0x20   :  { %v2763_v24 = vstv %s2371_s30  ;;  %v203_v26 = vmul.f32 %v199_v17, %v2755_v12  ;;  %v233_v31 = vmul.f32 %v229_v13, %v2760_v20  ;;  %v232_v37 = vmul.f32 %v228_v23, %v2760_v20  ;;  %s2834_s20 = sld [smem:[#allocation4 + $0x5]] }
  0x21   :  { %v179_v30 = vadd.f32 %v175_v11, %v150_v18  ;;  %v2767_v32 = vstv %s2372_s6  ;;  %v262_v35 = vmul.f32 %v258_v21, %v2763_v24  ;;  %v178_v36 = vadd.f32 %v174_v22, %v149_v25  ;;  %v255_v11 = vld [vmem:[#allocation8 + $0xa0] sm:$0xff]  ;;  %s2866_s21 = sld [smem:[#allocation4 + $0x6]] }
  0x22   :  { %v291_v47 = vmul.f32 %v287_v33, %v2767_v32  ;;  %v261_v49 = vmul.f32 %v257_v34, %v2763_v24  ;;  %v148_v52 = vadd.f32 %v144_v43, %v119_v42  ;;  %v202_v53 = vmul.f32 %v198_v38, %v2755_v12  ;;  %v284_v18 = vld [vmem:[#allocation8 + $0xc0] sm:$0xff]  ;;  %v297_v33 = vld [vmem:[%s4487_s5 + $0x8] sm:$0xff] }
  0x23   :  { %v208_v40 = vadd.f32 %v204_v19, %v179_v30  ;;  %v207_v48 = vadd.f32 %v203_v26, %v178_v36  ;;  %v118_v54 = vmul.f32 %v114_v39, %v2746_v0  ;;  %v290_v57 = vmul.f32 %v286_v41, %v2767_v32  ;;  %v296_v30 = vld [vmem:[%s4487_s5] sm:$0xff]  ;;  %v107_v39 = vld [vmem:[#allocation5 + $0x10] sm:$0xff] }
  0x24   :  { %v143_v59 = vmul.f32 %v139_v45, %v2749_v5  ;;  %v172_v60 = vmul.f32 %v168_v46, %v2752_v8  ;;  %v177_v62 = vadd.f32 %v173_v44, %v148_v52  ;;  %v231_v63 = vmul.f32 %v227_v50, %v2760_v20  ;;  %v105_v34 = vld [vmem:[#allocation5] sm:$0xff]  ;;  %v156_v46 = vld [vmem:[#allocation5 + $0x50] sm:$0xff]  ;;  %v126_v50 = vld [vmem:[#allocation5 + $0x28] sm:$0xff] }
  0x25   :  { %v237_v51 = vadd.f32 %v233_v31, %v208_v40  ;;  %v236_v56 = vadd.f32 %v232_v37, %v207_v48  ;;  %v201_v6 = vmul.f32 %v197_v55, %v2755_v12  ;;  %v260_v10 = vmul.f32 %v256_v58, %v2763_v24  ;;  %v299_v31 = vld [vmem:[%s4487_s5 + $0x18] sm:$0xff]  ;;  %v154_v38 = vld [vmem:[#allocation5 + $0x40] sm:$0xff]  ;;  %v127_v40 = vld [vmem:[#allocation5 + $0x30] sm:$0xff]  ;;  %s2811_s5 = sld [smem:[#allocation4 + $0x1]] }
  0x26   :  { %v147_v4 = vadd.f32 %v143_v59, %v118_v54  ;;  %v206_v9 = vadd.f32 %v202_v53, %v177_v62  ;;  %v230_v15 = vmul.f32 %v226_v1, %v2760_v20  ;;  %v289_v17 = vmul.f32 %v285_v3, %v2767_v32  ;;  %v183_v43 = vld [vmem:[#allocation5 + $0x60] sm:$0xff]  ;;  %v185_v54 = vld [vmem:[#allocation5 + $0x70] sm:$0xff]  ;;  %v108_v58 = vld [vmem:[#allocation5 + $0x18] sm:$0xff] }
  0x27   :  { %v266_v61 = vadd.f32 %v262_v35, %v237_v51  ;;  %v265_v2 = vadd.f32 %v261_v49, %v236_v56  ;;  %v259_v21 = vmul.f32 %v255_v11, %v2763_v24  ;;  %v288_v25 = vmul.f32 %v284_v18, %v2767_v32  ;;  %v125_v35 = vld [vmem:[#allocation5 + $0x20] sm:$0xff]  ;;  %v106_v49 = vld [vmem:[#allocation5 + $0x8] sm:$0xff]  ;;  %v128_v59 = vld [vmem:[#allocation5 + $0x38] sm:$0xff] }
  0x28   :  { %v176_v14 = vadd.f32 %v172_v60, %v147_v4  ;;  %v235_v16 = vadd.f32 %v231_v63, %v206_v9  ;;  %v110_v36 = vmul.f32 %v2746_v0, %v105_v34  ;;  %v130_v37 = vmul.f32 %v2749_v5, %v125_v35  ;;  %v212_v51 = vld [vmem:[#allocation5 + $0x80] sm:$0xff]  ;;  %v155_v62 = vld [vmem:[#allocation5 + $0x48] sm:$0xff]  ;;  %v214_v4 = vld [vmem:[#allocation5 + $0x90] sm:$0xff] }
  0x29   :  { %v295_v7 = vadd.f32 %v291_v47, %v266_v61  ;;  %v294_v13 = vadd.f32 %v290_v57, %v265_v2  ;;  %v159_v42 = vmul.f32 %v2752_v8, %v154_v38  ;;  %v112_v44 = vmul.f32 %v2746_v0, %v107_v39  ;;  %v241_v1 = vld [vmem:[#allocation5 + $0xa0] sm:$0xff]  ;;  %v272_v39 = vld [vmem:[#allocation5 + $0xd0] sm:$0xff] }
  0x2a   :  { %v205_v19 = vadd.f32 %v201_v6, %v176_v14  ;;  %v264_v22 = vadd.f32 %v260_v10, %v235_v16  ;;  %v134_v41 = vadd.f32 %v130_v37, %v110_v36  ;;  %v132_v45 = vmul.f32 %v2749_v5, %v127_v40  ;;  %v184_v16 = vld [vmem:[#allocation5 + $0x68] sm:$0xff] }
  0x2b   :  { %2534 = vmatpush.msra.mxu2 %v295_v7  ;;  %325 = vmatpush.msra.mxu0 %v295_v7  ;;  %v188_v48 = vmul.f32 %v2755_v12, %v183_v43  ;;  %v161_v53 = vmul.f32 %v2752_v8, %v156_v46  ;;  %v411_v55 = vlaneseq  ;;  %v111_v56 = vmul.f32 %v2746_v0, %v106_v49  ;;  %v213_v37 = vld [vmem:[#allocation5 + $0x88] sm:$0xff] }
  0x2c   :  { %v234_v23 = vadd.f32 %v230_v15, %v205_v19  ;;  %v293_v26 = vadd.f32 %v289_v17, %v264_v22  ;;  %v163_v47 = vadd.f32 %v159_v42, %v134_v41  ;;  %v136_v52 = vadd.f32 %v132_v45, %v112_v44  ;;  %v243_v19 = vld [vmem:[#allocation5 + $0xb0] sm:$0xff] }
  0x2d   :  { %2535 = vmatpush.msra.mxu2 %v294_v13  ;;  %326 = vmatpush.msra.mxu0 %v294_v13  ;;  %v131_v57 = vmul.f32 %v2749_v5, %v126_v50  ;;  %v217_v61 = vmul.f32 %v2760_v20, %v212_v51  ;;  %v2819_v63 = vand.u32 127, %v411_v55  ;;  %v190_v3 = vmul.f32 %v2755_v12, %v185_v54  ;;  %v157_v13 = vld [vmem:[#allocation5 + $0x58] sm:$0xff]  ;;  %v242_v51 = vld [vmem:[#allocation5 + $0xa8] sm:$0xff] }
  0x2e   :  { %v263_v27 = vadd.f32 %v259_v21, %v234_v23  ;;  %v192_v60 = vadd.f32 %v188_v48, %v163_v47  ;;  %v165_v2 = vadd.f32 %v161_v53, %v136_v52  ;;  %v113_v6 = vmul.f32 %v2746_v0, %v108_v58  ;;  %v215_v47 = vld [vmem:[#allocation5 + $0x98] sm:$0xff] }
  0x2f   :  { %2536 = vmatpush.msra.mxu2 %v293_v26  ;;  %327 = vmatpush.msra.mxu0 %v293_v26  ;;  %v133_v7 = vmul.f32 %v2749_v5, %v128_v59  ;;  %v413_v9 = vcvt.s32.f32 %v2819_v63  ;;  %v135_v10 = vadd.f32 %v131_v57, %v111_v56  ;;  %v160_v11 = vmul.f32 %v2752_v8, %v155_v62 }
  0x30   :  { %v292_v28 = vadd.f32 %v288_v25, %v263_v27  ;;  %v221_v14 = vadd.f32 %v217_v61, %v192_v60  ;;  %v246_v15 = vmul.f32 %v2763_v24, %v241_v1  ;;  %v194_v18 = vadd.f32 %v190_v3, %v165_v2  ;;  %v270_v27 = vld [vmem:[#allocation5 + $0xc0] sm:$0xff]  ;;  %v244_v3 = vld [vmem:[#allocation5 + $0xb8] sm:$0xff] }
  0x31   :  { %v414_v17 = vmul.f32 0.03125, %v413_v9  ;;  %v219_v0 = vmul.f32 %v2760_v20, %v214_v4  ;;  %v2837_v5 = vstv %s2811_s5  ;;  %v137_v23 = vadd.f32 %v133_v7, %v113_v6 }
  0x32   :  { %2537 = vmatpush.msra.mxu2 %v292_v28  ;;  %328 = vmatpush.msra.mxu0 %v292_v28  ;;  %v162_v25 = vmul.f32 %v2752_v8, %v157_v13  ;;  %v164_v28 = vadd.f32 %v160_v11, %v135_v10  ;;  %v248_v34 = vmul.f32 %v2763_v24, %v243_v19  ;;  %v2849_v8 = vstv %s2816_s16 }
  0x33   :  { %2375 = vmatmul.msk.f32.vlgmr.msra.gmra.mxu2 %vm300_vm0, %v298_v29  ;;  %2373 = vmatmul.msk.f32.vlgmr.msra.gmra.mxu0 %vm300_vm0, %v296_v30  ;;  %v415_v26 = vfloor.f32 %v414_v17  ;;  %v189_v29 = vmul.f32 %v2755_v12, %v184_v16  ;;  %v186_v30 = vld [vmem:[#allocation5 + $0x78] sm:$0xff]  ;;  %v223_v38 = vadd.f32 %v219_v0, %v194_v18  ;;  %v2852_v40 = vstv %s2822_s17 }
  0x34   :  { %4557 = vst [vmem:[#allocation16_spill] sm:$0xff] %v2852_v40  ;;  %v275_v42 = vmul.f32 %v2767_v32, %v270_v27  ;;  %v166_v43 = vadd.f32 %v162_v25, %v137_v23  ;;  %v191_v44 = vmul.f32 %v2755_v12, %v186_v30  ;;  %v2857_v48 = vstv %s2828_s18  ;;  %v273_v23 = vld [vmem:[#allocation5 + $0xd8] sm:$0xff]  ;;  %s2346_s18 = sshll.u32 %s4490_s8, 4  ;;  %s2347_s18 = int_to_ptr.hbm [resolvable:$true] %s2346_s18 }
  0x35   :  { %v416_v35 = vmul.f32 32.0, %v415_v26  ;;  %v2846_v36 = vsub.f32 %v415_v26, %v2837_v5  ;;  %v193_v46 = vadd.f32 %v189_v29, %v164_v28  ;;  %v218_v50 = vmul.f32 %v2760_v20, %v213_v37 }
  0x36   :  { %v277_v52 = vmul.f32 %v2767_v32, %v272_v39  ;;  %v252_v56 = vadd.f32 %v248_v34, %v223_v38  ;;  %v2869_v12 = vstv %s2831_s19  ;;  %v2872_v57 = vstv %s2834_s20  ;;  %s2364_s19 = sld [smem:[#allocation4 + $0x8]] }
  0x37   :  { %v417_v45 = vsub.f32 %v413_v9, %v416_v35  ;;  %v425_v54 = vsub.f32 %v2846_v36, %v2852_v40  ;;  %4558 = vst [vmem:[#allocation17_spill] sm:$0xff] %v2869_v12  ;;  %v195_v61 = vadd.f32 %v191_v44, %v166_v43  ;;  %v220_v62 = vmul.f32 %v2760_v20, %v215_v47  ;;  %s2365_s20 = sld [smem:[#allocation4 + $0x9]] }
  0x38   :  { %4559 = vst [vmem:[#allocation18_spill] sm:$0xff] %v2872_v57  ;;  %v247_v2 = vmul.f32 %v2763_v24, %v242_v51  ;;  %v2879_v4 = vshrl.u32 %v411_v55, 7  ;;  %v271_v55 = vld [vmem:[#allocation5 + $0xc8] sm:$0xff]  ;;  %v249_v18 = vmul.f32 %v2763_v24, %v244_v3  ;;  %v2904_v30 = vstv %s2866_s21 }
  0x39   :  { %v2862_v53 = vsub.f32 %v417_v45, %v2849_v8  ;;  %v430_v20 = vmul.f32 %v2872_v57, %v425_v54  ;;  %v434_v13 = vmul.f32 %v2869_v12, %v425_v54  ;;  %v224_v17 = vadd.f32 %v220_v62, %v195_v61 }
  0x3a   :  { %4560 = vst [vmem:[#allocation19_spill] sm:$0xff] %v2879_v4  ;;  %v466_v28 = vadd.s32 16, %v2879_v4  ;;  %v467_v24 = vadd.s32 24, %v2879_v4  ;;  %v276_v29 = vmul.f32 %v2767_v32, %v271_v55  ;;  %v278_v35 = vmul.f32 %v2767_v32, %v273_v23 }
  0x3b   :  { %2376 = vmatmul.msk.f32.gmra.mxu2 %vm300_vm0, %v299_v31  ;;  %2374 = vmatmul.msk.f32.gmra.mxu0 %vm300_vm0, %v297_v33  ;;  %v718_v31 = vadd.s32 128, %v2819_v63  ;;  %v250_v33 = vadd.f32 %v246_v15, %v221_v14  ;;  %v423_v1 = vsub.f32 %v2862_v53, %v2857_v48  ;;  %v222_v14 = vadd.f32 %v218_v50, %v193_v46 }
  0x3c   :  { %v281_v15 = vadd.f32 %v277_v52, %v252_v56  ;;  %v253_v34 = vadd.f32 %v249_v18, %v224_v17  ;;  %v2916_v43 = vcvt.s32.f32 %v466_v28  ;;  %v2918_v44 = vcvt.s32.f32 %v467_v24 }
  0x3d   :  { %v719_v41 = vcvt.s32.f32 %v718_v31  ;;  %v279_v60 = vadd.f32 %v275_v42, %v250_v33  ;;  %v427_v10 = vmul.f32 %v2869_v12, %v423_v1  ;;  %v432_v11 = vmul.f32 %v2872_v57, %v423_v1 }
  0x3e   :  { %v251_v33 = vadd.f32 %v247_v2, %v222_v14  ;;  %4561 = vst [vmem:[#allocation20_spill] sm:$0xff] %v2916_v43  ;;  %v282_v47 = vadd.f32 %v278_v35, %v253_v34  ;;  %vm444_vm1 = vcmp.ge.f32.partialorder %v2862_v53, 0.0  ;;  %vm448_vm4 = vcmp.ge.f32.partialorder %v2846_v36, 0.0 }
  0x3f   :  { %v720_v49 = vmul.f32 0.03125, %v719_v41  ;;  %v428_v0 = vadd.f32 %v427_v10, %v2857_v48  ;;  %v433_v19 = vadd.f32 %v432_v11, %v2852_v40  ;;  %v939_v11 = vadd.s32 256, %v2819_v63 }
  0x40   :  { %v280_v32 = vadd.f32 %v276_v29, %v251_v33 }
  0x41   :  { %v721_v58 = vfloor.f32 %v720_v49  ;;  %v431_v26 = vsub.f32 %v428_v0, %v430_v20  ;;  %v2896_v27 = vadd.f32 %v434_v13, %v433_v19  ;;  %v1160_v13 = vadd.s32 384, %v2819_v63 }
  0x42   :  { %v940_v14 = vcvt.s32.f32 %v939_v11 }
  0x43   :  { %v722_v6 = vmul.f32 32.0, %v721_v58  ;;  %v2882_v7 = vsub.f32 %v721_v58, %v2837_v5  ;;  %v436_v37 = vadd.f32 0.5, %v431_v26 }
  0x45   :  { %v723_v16 = vsub.f32 %v719_v41, %v722_v6  ;;  %v438_v42 = vmul.f32 %v2904_v30, %v436_v37 }
  0x47   :  { %v2892_v25 = vsub.f32 %v723_v16, %v2849_v8  ;;  %v2922_v49 = vadd.f32 -0.5, %v438_v42  ;;  %v941_v16 = vmul.f32 0.03125, %v940_v14 }
  0x49   :  { %v726_v31 = vsub.f32 %v2892_v25, %v2857_v48  ;;  %v475_v52 = vsub.f32 %v2918_v44, %v2922_v49  ;;  %v474_v54 = vsub.f32 %v2916_v43, %v2922_v49  ;;  %v942_v17 = vfloor.f32 %v941_v16 }
  0x4a   :  { %vm453_vm7 = vcmp.ge.f32.partialorder %v2922_v49, 0.0  ;;  %vm454_vm8 = vcmp.le.f32.partialorder %v2922_v49, 31.0  ;;  %vm742_vm9 = vcmp.ge.f32.partialorder %v2892_v25, 0.0 }
  0x4b   :  { %v728_v38 = vmul.f32 %v726_v31, %v2869_v12  ;;  %v732_v39 = vmul.f32 %v726_v31, %v2872_v57  ;;  %v479_v58 = vand.u32 2147483647, %v475_v52  ;;  %v943_v0 = vmul.f32 32.0, %v942_v17  ;;  %vm455_vm14 = vmand %vm453_vm7, %vm454_vm8 }
  0x4c   :  { %v2946_v24 = vsub.f32 %v942_v17, %v2837_v5 }
  0x4d   :  { %v729_v45 = vadd.f32 %v728_v38, %v2857_v48  ;;  %v733_v46 = vadd.f32 %v732_v39, %v2852_v40  ;;  %v483_v61 = vsub.f32 1.0, %v479_v58  ;;  %v944_v23 = vsub.f32 %v940_v14, %v943_v0 }
  0x4e   :  { %v948_v34 = vsub.f32 %v2946_v24, %v2852_v40 }
  0x4f   :  { %v487_v2 = vmax.f32 %v483_v61, 0.0  ;;  %v2940_v26 = vsub.f32 %v944_v23, %v2849_v8 }
  0x50   :  { %v951_v39 = vmul.f32 %v948_v34, %v2872_v57 }
  0x51   :  { %580 = vmatpush.msrb.mxu2 %v487_v2  ;;  %v947_v29 = vsub.f32 %v2940_v26, %v2857_v48 }
  0x53   :  { %v949_v35 = vmul.f32 %v947_v29, %v2869_v12 }
  0xb0   :  { %v2839_v22 = vpop.f32.mrf.mxu0 }
  0xb6   :  { %v336_v21 = vpop.f32.mrf.mxu2 }
  0xb8   :  { %v333_v9 = vpop.f32.mrf.mxu0 }
  0xbe   :  { %v339_v59 = vpop.f32.mrf.mxu2 }
  0xbf   :  { %366 = vmatpush.msra.mxu1 %v339_v59  ;;  %2538 = vmatpush.msra.mxu3 %v339_v59  ;;  %v478_v59 = vand.u32 2147483647, %v474_v54 }
  0xc1   :  { %367 = vmatpush.msra.mxu1 %v336_v21  ;;  %2539 = vmatpush.msra.mxu3 %v336_v21  ;;  %v727_v21 = vsub.f32 %v2882_v7, %v2852_v40  ;;  %v482_v62 = vsub.f32 1.0, %v478_v59 }
  0xc3   :  { %368 = vmatpush.msra.mxu1 %v333_v9  ;;  %2540 = vmatpush.msra.mxu3 %v333_v9  ;;  %v734_v41 = vmul.f32 %v727_v21, %v2869_v12  ;;  %v486_v3 = vmax.f32 %v482_v62, 0.0 }
  0xc5   :  { %369 = vmatpush.msra.mxu1 %v2839_v22  ;;  %2541 = vmatpush.msra.mxu3 %v2839_v22  ;;  %v730_v22 = vmul.f32 %v727_v21, %v2872_v57  ;;  %v2924_v51 = vadd.f32 %v734_v41, %v733_v46 }
  0xc6   :  { %2377 = vmatmul.msk.f32.vlgmr.msra.gmra.mxu1 %vm300_vm0, %v279_v60  ;;  %2379 = vmatmul.msk.f32.vlgmr.msra.gmra.mxu3 %vm300_vm0, %v281_v15  ;;  %v1161_v15 = vcvt.s32.f32 %v1160_v13 }
  0xc7   :  { %v731_v50 = vsub.f32 %v729_v45, %v730_v22  ;;  %581 = vmatpush.msrb.mxu2 %v486_v3  ;;  %v950_v22 = vadd.f32 %v949_v35, %v2857_v48  ;;  %v955_v35 = vmul.f32 %v948_v34, %v2869_v12 }
  0xc8   :  { %v1162_v55 = vmul.f32 0.03125, %v1161_v15 }
  0xc9   :  { %v736_v56 = vadd.f32 0.5, %v731_v50  ;;  %v952_v45 = vsub.f32 %v950_v22, %v951_v39  ;;  %v465_v50 = vadd.s32 8, %v2879_v4 }
  0xca   :  { %v1163_v18 = vfloor.f32 %v1162_v55 }
  0xcb   :  { %v737_v60 = vmul.f32 %v736_v56, %v2904_v30  ;;  %v2972_v59 = vcvt.s32.f32 %v465_v50 }
  0xcc   :  { %v1164_v19 = vmul.f32 32.0, %v1163_v18  ;;  %v2951_v31 = vsub.f32 %v1163_v18, %v2837_v5 }
  0xcd   :  { %v2933_v1 = vadd.f32 -0.5, %v737_v60  ;;  %4562 = vst [vmem:[#allocation21_spill] sm:$0xff] %v2972_v59 }
  0xce   :  { %2378 = vmatmul.msk.f32.gmra.mxu1 %vm300_vm0, %v280_v32  ;;  %2380 = vmatmul.msk.f32.gmra.mxu3 %vm300_vm0, %v282_v47  ;;  %v1165_v21 = vsub.f32 %v1161_v15, %v1164_v19  ;;  %v1169_v37 = vsub.f32 %v2951_v31, %v2852_v40  ;;  %v957_v32 = vadd.f32 0.5, %v952_v45 }
  0xcf   :  { %v762_v6 = vsub.f32 %v2918_v44, %v2933_v1  ;;  %v761_v3 = vsub.f32 %v2916_v43, %v2933_v1  ;;  %v760_v55 = vsub.f32 %v2972_v59, %v2933_v1  ;;  %vm749_vm12 = vcmp.ge.f32.partialorder %v2933_v1, 0.0 }
  0xd0   :  { %v2943_v28 = vsub.f32 %v1165_v21, %v2849_v8  ;;  %v1172_v42 = vmul.f32 %v1169_v37, %v2872_v57  ;;  %v958_v52 = vmul.f32 %v957_v32, %v2904_v30  ;;  %v953_v21 = vmul.f32 %v947_v29, %v2872_v57 }
  0xd1   :  { %v766_v9 = vand.u32 2147483647, %v762_v6  ;;  %v765_v14 = vand.u32 2147483647, %v761_v3  ;;  %v1176_v22 = vmul.f32 %v1169_v37, %v2869_v12  ;;  %v764_v29 = vand.u32 2147483647, %v760_v55 }
  0xd2   :  { %v1168_v33 = vsub.f32 %v2943_v28, %v2857_v48  ;;  %v2968_v56 = vadd.f32 -0.5, %v958_v52  ;;  %vm750_vm13 = vcmp.le.f32.partialorder %v2933_v1, 31.0 }
  0xd3   :  { %v770_v10 = vsub.f32 1.0, %v766_v9  ;;  %v2983_v9 = vcvt.s32.f32 %v2879_v4  ;;  %v769_v23 = vsub.f32 1.0, %v765_v14 }
  0xd4   :  { %v1170_v38 = vmul.f32 %v1168_v33, %v2869_v12  ;;  %v983_v60 = vsub.f32 %v2918_v44, %v2968_v56  ;;  %v982_v6 = vsub.f32 %v2916_v43, %v2968_v56  ;;  %v981_v17 = vsub.f32 %v2972_v59, %v2968_v56 }
  0xd5   :  { %v774_v20 = vmax.f32 %v770_v10, 0.0  ;;  %4563 = vst [vmem:[#allocation22_spill] sm:$0xff] %v2983_v9  ;;  %v759_v3 = vsub.f32 %v2983_v9, %v2933_v1 }
  0xd6   :  { %v1171_v41 = vadd.f32 %v1170_v38, %v2857_v48  ;;  %v987_v62 = vand.u32 2147483647, %v983_v60  ;;  %v986_v15 = vand.u32 2147483647, %v982_v6  ;;  %v1174_v38 = vmul.f32 %v1168_v33, %v2872_v57 }
  0xd7   :  { %803 = vmatpush.msrb.mxu3 %v774_v20  ;;  %v473_v20 = vsub.f32 %v2972_v59, %v2922_v49  ;;  %v985_v52 = vand.u32 2147483647, %v981_v17  ;;  %v980_v6 = vsub.f32 %v2983_v9, %v2968_v56 }
  0xd8   :  { %v1173_v46 = vsub.f32 %v1171_v41, %v1172_v42  ;;  %v991_v11 = vsub.f32 1.0, %v987_v62  ;;  %v773_v41 = vmax.f32 %v769_v23, 0.0  ;;  %v990_v42 = vsub.f32 1.0, %v986_v15 }
  0xd9   :  { %v477_v18 = vand.u32 2147483647, %v473_v20  ;;  %v1175_v32 = vadd.f32 %v1174_v38, %v2852_v40  ;;  %v989_v62 = vsub.f32 1.0, %v985_v52  ;;  %v763_v15 = vand.u32 2147483647, %v759_v3 }
  0xda   :  { %v1178_v47 = vadd.f32 0.5, %v1173_v46  ;;  %v995_v0 = vmax.f32 %v991_v11, 0.0  ;;  %v954_v46 = vadd.f32 %v953_v21, %v2852_v40  ;;  %804 = vmatpush.msrb.mxu3 %v773_v41  ;;  %v994_v34 = vmax.f32 %v990_v42, 0.0 }
  0xdb   :  { %v481_v39 = vsub.f32 1.0, %v477_v18  ;;  %v984_v55 = vand.u32 2147483647, %v980_v6 }
  0xdc   :  { %v1179_v54 = vmul.f32 %v1178_v47, %v2904_v30  ;;  %1024 = vmatpush.msrb.mxu0 %v995_v0  ;;  %v472_v47 = vsub.f32 %v2983_v9, %v2922_v49  ;;  %v3001_v37 = vadd.f32 %v955_v35, %v954_v46  ;;  %v767_v0 = vsub.f32 1.0, %v763_v15 }
  0xdd   :  { %v485_v50 = vmax.f32 %v481_v39, 0.0  ;;  %v988_v23 = vsub.f32 1.0, %v984_v55 }
  0xde   :  { %v2970_v58 = vadd.f32 -0.5, %v1179_v54  ;;  %v3003_v54 = vadd.f32 %v1176_v22, %v1175_v32  ;;  %v476_v60 = vand.u32 2147483647, %v472_v47  ;;  %1025 = vmatpush.msrb.mxu0 %v994_v34  ;;  %v771_v38 = vmax.f32 %v767_v0, 0.0 }
  0xdf   :  { %582 = vmatpush.msrb.mxu2 %v485_v50  ;;  %v992_v39 = vmax.f32 %v988_v23, 0.0  ;;  %v960_v49 = vadd.f32 0.5, %v3001_v37 }
  0xe0   :  { %v1204_v61 = vsub.f32 %v2918_v44, %v2970_v58  ;;  %v1203_v10 = vsub.f32 %v2916_v43, %v2970_v58  ;;  %v1201_v11 = vsub.f32 %v2983_v9, %v2970_v58 }
  0xe2   :  { %v1208_v2 = vand.u32 2147483647, %v1204_v61  ;;  %v1207_v16 = vand.u32 2147483647, %v1203_v10  ;;  %v768_v61 = vsub.f32 1.0, %v764_v29  ;;  %v480_v10 = vsub.f32 1.0, %v476_v60 }
  0xe3   :  { %v1205_v17 = vand.u32 2147483647, %v1201_v11 }
  0xe4   :  { %v1212_v13 = vsub.f32 1.0, %v1208_v2  ;;  %v1211_v45 = vsub.f32 1.0, %v1207_v16  ;;  %v1202_v2 = vsub.f32 %v2972_v59, %v2970_v58  ;;  %v772_v20 = vmax.f32 %v768_v61, 0.0 }
  0xe5   :  { %v484_v16 = vmax.f32 %v480_v10, 0.0  ;;  %v1209_v21 = vsub.f32 1.0, %v1205_v17 }
  0xe6   :  { %v1216_v19 = vmax.f32 %v1212_v13, 0.0  ;;  %v1215_v33 = vmax.f32 %v1211_v45, 0.0  ;;  %v993_v13 = vmax.f32 %v989_v62, 0.0  ;;  %v1206_v14 = vand.u32 2147483647, %v1202_v2  ;;  %805 = vmatpush.msrb.mxu3 %v772_v20 }
  0xe7   :  { %583 = vmatpush.msrb.mxu2 %v484_v16  ;;  %v1213_v41 = vmax.f32 %v1209_v21, 0.0  ;;  %v1602_v45 = vadd.s32 640, %v2819_v63 }
  0xe8   :  { %1245 = vmatpush.msrb.mxu1 %v1216_v19  ;;  %1026 = vmatpush.msrb.mxu0 %v993_v13  ;;  %v1210_v18 = vsub.f32 1.0, %v1206_v14  ;;  %v1381_v19 = vadd.s32 512, %v2819_v63  ;;  %v1823_v13 = vadd.s32 768, %v2819_v63 }
  0xe9   :  { %806 = vmatpush.msrb.mxu3 %v771_v38  ;;  %v1603_v32 = vcvt.s32.f32 %v1602_v45  ;;  %v2044_v45 = vadd.s32 896, %v2819_v63 }
  0xea   :  { %1246 = vmatpush.msrb.mxu1 %v1215_v33  ;;  %v1214_v35 = vmax.f32 %v1210_v18, 0.0  ;;  %v1382_v22 = vcvt.s32.f32 %v1381_v19  ;;  %1027 = vmatpush.msrb.mxu0 %v992_v39  ;;  %v1824_v16 = vcvt.s32.f32 %v1823_v13  ;;  %v387_v39 = vld [vmem:[%s4486_s4] sm:$0xff] }
  0xeb   :  { %v1604_v50 = vmul.f32 0.03125, %v1603_v32  ;;  %399 = vst.msk [vmem:[#allocation2 + $0x20] sm:$0xff] %vm300_vm0, %v387_v39 }
  0xec   :  { %1247 = vmatpush.msrb.mxu1 %v1214_v35  ;;  %v1383_v42 = vmul.f32 0.03125, %v1382_v22  ;;  %v1825_v0 = vmul.f32 0.03125, %v1824_v16 }
  0xed   :  { %v1605_v33 = vfloor.f32 %v1604_v50  ;;  %v2045_v50 = vcvt.s32.f32 %v2044_v45 }
  0xee   :  { %1248 = vmatpush.msrb.mxu1 %v1213_v41  ;;  %v1384_v46 = vfloor.f32 %v1383_v42  ;;  %v1826_v35 = vfloor.f32 %v1825_v0 }
  0xef   :  { %v1606_v61 = vmul.f32 32.0, %v1605_v33  ;;  %v3026_v62 = vsub.f32 %v1605_v33, %v2837_v5 }
  0xf0   :  { %v1385_v47 = vmul.f32 32.0, %v1384_v46  ;;  %v3016_v29 = vsub.f32 %v1384_v46, %v2837_v5  ;;  %v1827_v41 = vmul.f32 32.0, %v1826_v35  ;;  %v3060_v42 = vsub.f32 %v1826_v35, %v2837_v5 }
  0xf1   :  { %4567 = vst [vmem:[#allocation26_spill] sm:$0xff] %v3026_v62  ;;  %v1607_v3 = vsub.f32 %v1603_v32, %v1606_v61  ;;  %v3041_v11 = vsub.f32 %v3026_v62, %v2852_v40 }
  0xf2   :  { %4564 = vst [vmem:[#allocation23_spill] sm:$0xff] %v3016_v29  ;;  %v1386_v34 = vsub.f32 %v1382_v22, %v1385_v47  ;;  %v3023_v60 = vsub.f32 %v3016_v29, %v2852_v40  ;;  %v1828_v47 = vsub.f32 %v1824_v16, %v1827_v41 }
  0xf3   :  { %v3037_v20 = vsub.f32 %v1607_v3, %v2849_v8  ;;  %4570 = vst [vmem:[#allocation29_spill] sm:$0xff] %v3041_v11  ;;  %v1614_v18 = vmul.f32 %v3041_v11, %v2872_v57  ;;  %v3071_v3 = vsub.f32 %v3060_v42, %v2852_v40 }
  0xf4   :  { %v3019_v52 = vsub.f32 %v1386_v34, %v2849_v8  ;;  %4566 = vst [vmem:[#allocation25_spill] sm:$0xff] %v3023_v60  ;;  %v1393_v10 = vmul.f32 %v3023_v60, %v2872_v57  ;;  %v3075_v63 = vsub.f32 %v1828_v47, %v2849_v8 }
  0xf5   :  { %4569 = vst [vmem:[#allocation28_spill] sm:$0xff] %v3037_v20  ;;  %v3047_v15 = vsub.f32 %v3037_v20, %v2857_v48 }
  0xf6   :  { %4565 = vst [vmem:[#allocation24_spill] sm:$0xff] %v3019_v52  ;;  %v3030_v2 = vsub.f32 %v3019_v52, %v2857_v48 }
  0xf7   :  { %4571 = vst [vmem:[#allocation30_spill] sm:$0xff] %v3047_v15  ;;  %v1612_v17 = vmul.f32 %v3047_v15, %v2869_v12 }
  0xf8   :  { %4568 = vst [vmem:[#allocation27_spill] sm:$0xff] %v3030_v2  ;;  %v1391_v6 = vmul.f32 %v3030_v2, %v2869_v12  ;;  %v3429_v2 = vstv %s2365_s20 }
  0xf9   :  { %v1613_v21 = vadd.f32 %v1612_v17, %v2857_v48  ;;  %4572 = vst [vmem:[#allocation31_spill] sm:$0xff] %v3060_v42  ;;  %vm451_vm6 = vcmp.le.f32.partialorder %v2846_v36, %v3429_v2  ;;  %vm747_vm8 = vcmp.le.f32.partialorder %v2882_v7, %v3429_v2 }
  0xfa   :  { %v1392_v14 = vadd.f32 %v1391_v6, %v2857_v48  ;;  %4574 = vst [vmem:[#allocation33_spill] sm:$0xff] %v3071_v3  ;;  %v2046_v6 = vmul.f32 0.03125, %v2045_v50 }
  0xfb   :  { %v1615_v22 = vsub.f32 %v1613_v21, %v1614_v18  ;;  %4575 = vst [vmem:[#allocation34_spill] sm:$0xff] %v3075_v63 }
  0xfc   :  { %v1394_v55 = vsub.f32 %v1392_v14, %v1393_v10  ;;  %v2047_v17 = vfloor.f32 %v2046_v6  ;;  %4589 = vst [vmem:[#allocation48_spill] sm:$0xff] %v3429_v2 }
  0xfd   :  { %v1620_v32 = vadd.f32 0.5, %v1615_v22 }
  0xfe   :  { %v1399_v23 = vadd.f32 0.5, %v1394_v55  ;;  %v3088_v55 = vsub.f32 %v3075_v63, %v2857_v48  ;;  %v2048_v35 = vmul.f32 32.0, %v2047_v17 }
  0xff   :  { %v1621_v33 = vmul.f32 %v1620_v32, %v2904_v30 }
 0x100   :  { %v1400_v38 = vmul.f32 %v1399_v23, %v2904_v30  ;;  %4577 = vst [vmem:[#allocation36_spill] sm:$0xff] %v3088_v55  ;;  %v388_v23 = vld [vmem:[%s4486_s4 + $0x8] sm:$0xff]  ;;  %v1833_v21 = vmul.f32 %v3088_v55, %v2869_v12  ;;  %v2049_v47 = vsub.f32 %v2045_v50, %v2048_v35  ;;  %v389_v35 = vld [vmem:[%s4486_s4 + $0x10] sm:$0xff] }
 0x101   :  { %v3079_v16 = vadd.f32 -0.5, %v1621_v33  ;;  %400 = vst.msk [vmem:[#allocation2 + $0x28] sm:$0xff] %vm300_vm0, %v388_v23 }
 0x102   :  { %v3064_v46 = vadd.f32 -0.5, %v1400_v38  ;;  %v3104_v38 = vsub.f32 %v2047_v17, %v2837_v5  ;;  %v1834_v32 = vadd.f32 %v1833_v21, %v2857_v48  ;;  %401 = vst.msk [vmem:[#allocation2 + $0x30] sm:$0xff] %vm300_vm0, %v389_v35 }
 0x103   :  { %4576 = vst [vmem:[#allocation35_spill] sm:$0xff] %v3079_v16  ;;  %v1646_v0 = vsub.f32 %v2918_v44, %v3079_v16  ;;  %v1645_v45 = vsub.f32 %v2916_v43, %v3079_v16 }
 0x104   :  { %4573 = vst [vmem:[#allocation32_spill] sm:$0xff] %v3064_v46  ;;  %v1425_v34 = vsub.f32 %v2918_v44, %v3064_v46  ;;  %v1424_v22 = vsub.f32 %v2916_v43, %v3064_v46 }
 0x105   :  { %4578 = vst [vmem:[#allocation37_spill] sm:$0xff] %v3104_v38  ;;  %v1650_v41 = vand.u32 2147483647, %v1646_v0  ;;  %v1649_v6 = vand.u32 2147483647, %v1645_v45 }
 0x106   :  { %v1429_v14 = vand.u32 2147483647, %v1425_v34  ;;  %v1428_v34 = vand.u32 2147483647, %v1424_v22 }
 0x107   :  { %v1654_v33 = vsub.f32 1.0, %v1650_v41  ;;  %v1653_v50 = vsub.f32 1.0, %v1649_v6 }
 0x108   :  { %v1433_v18 = vsub.f32 1.0, %v1429_v14  ;;  %v3118_v14 = vsub.f32 %v3104_v38, %v2852_v40  ;;  %v1432_v17 = vsub.f32 1.0, %v1428_v34 }
 0x109   :  { %v1657_v21 = vmax.f32 %v1653_v50, 0.0 }
 0x10a   :  { %v1437_v39 = vmax.f32 %v1433_v18, 0.0  ;;  %4580 = vst [vmem:[#allocation39_spill] sm:$0xff] %v3118_v14  ;;  %v1658_v18 = vmax.f32 %v1654_v33, 0.0  ;;  %v2056_v41 = vmul.f32 %v3118_v14, %v2872_v57 }
 0x10c   :  { %1466 = vmatpush.msra.mxu2 %v1437_v39  ;;  %1687 = vmatpush.msra.mxu3 %v1658_v18 }
 0x10e   :  { %1688 = vmatpush.msra.mxu3 %v1657_v21 }
 0x143   :  { %v371_v19 = vpop.f32.mrf.mxu1 }
 0x144   :  { %383 = vst.msk [vmem:[#allocation2] sm:$0xff] %vm300_vm0, %v371_v19  ;;  %v1835_v19 = vmul.f32 %v3071_v3, %v2872_v57 }
 0x146   :  { %v1836_v5 = vsub.f32 %v1834_v32, %v1835_v19  ;;  %v1436_v19 = vmax.f32 %v1432_v17, 0.0 }
 0x148   :  { %v1841_v23 = vadd.f32 0.5, %v1836_v5  ;;  %1467 = vmatpush.msra.mxu2 %v1436_v19 }
 0x149   :  { %v377_v61 = vpop.f32.mrf.mxu3 }
 0x14a   :  { %385 = vst.msk [vmem:[#allocation2 + $0x10] sm:$0xff] %vm300_vm0, %v377_v61  ;;  %v1842_v22 = vmul.f32 %v1841_v23, %v2904_v30 }
 0x14b   :  { %v374_v10 = vpop.f32.mrf.mxu1  ;;  %v3077_v13 = vld [vmem:[#allocation2] sm:$0xff] }
 0x14c   :  { %384 = vst.msk [vmem:[#allocation2 + $0x8] sm:$0xff] %vm300_vm0, %v374_v10  ;;  %2384 = vmatmul.msk.f32.vlgmr.msrb.gmra.mxu2 %vm300_vm0, %v3077_v13  ;;  %2403 = vmatmul.msk.f32.vlgmr.msrb.gmra.mxu3 %vm300_vm0, %v3077_v13  ;;  %v3114_v10 = vsub.f32 %v2049_v47, %v2849_v8  ;;  %v3143_v45 = vadd.f32 -0.5, %v1842_v22 }
 0x14d   :  { %2422 = vmatmul.msk.f32.vlgmr.msrb.gmra.mxu0 %vm300_vm0, %v3077_v13  ;;  %2441 = vmatmul.msk.f32.vlgmr.msrb.gmra.mxu1 %vm300_vm0, %v3077_v13 }
 0x14e   :  { %4579 = vst [vmem:[#allocation38_spill] sm:$0xff] %v3114_v10  ;;  %v3128_v8 = vsub.f32 %v3114_v10, %v2857_v48  ;;  %v1867_v34 = vsub.f32 %v2918_v44, %v3143_v45  ;;  %v1866_v18 = vsub.f32 %v2916_v43, %v3143_v45 }
 0x14f   :  { %4582 = vst [vmem:[#allocation41_spill] sm:$0xff] %v3143_v45 }
 0x150   :  { %4581 = vst [vmem:[#allocation40_spill] sm:$0xff] %v3128_v8  ;;  %v2054_v39 = vmul.f32 %v3128_v8, %v2869_v12  ;;  %v1870_v19 = vand.u32 2147483647, %v1866_v18  ;;  %v1423_v18 = vsub.f32 %v2972_v59, %v3064_v46 }
 0x151   :  { %v380_v61 = vpop.f32.mrf.mxu3  ;;  %v3146_v47 = vld [vmem:[#allocation2 + $0x10] sm:$0xff] }
 0x152   :  { %386 = vst.msk [vmem:[#allocation2 + $0x18] sm:$0xff] %vm300_vm0, %v380_v61  ;;  %v2055_v32 = vadd.f32 %v2054_v39, %v2857_v48  ;;  %v1871_v61 = vand.u32 2147483647, %v1867_v34  ;;  %v390_v48 = vld [vmem:[%s4486_s4 + $0x18] sm:$0xff]  ;;  %v1874_v22 = vsub.f32 1.0, %v1870_v19 }
 0x153   :  { %v3120_v0 = vld [vmem:[#allocation2 + $0x8] sm:$0xff]  ;;  %402 = vst.msk [vmem:[#allocation2 + $0x38] sm:$0xff] %vm300_vm0, %v390_v48  ;;  %v1427_v19 = vand.u32 2147483647, %v1423_v18 }
 0x154   :  { %2385 = vmatmul.msk.f32.gmra.mxu2 %vm300_vm0, %v3120_v0  ;;  %2404 = vmatmul.msk.f32.gmra.mxu3 %vm300_vm0, %v3120_v0  ;;  %v2057_v33 = vsub.f32 %v2055_v32, %v2056_v41  ;;  %v1875_v5 = vsub.f32 1.0, %v1871_v61  ;;  %v1878_v39 = vmax.f32 %v1874_v22, 0.0  ;;  %v391_v41 = vld [vmem:[%s4486_s4 + $0x20] sm:$0xff]  ;;  %v3203_v22 = vld [vmem:[#allocation2 + $0x28] sm:$0xff] }
 0x155   :  { %2423 = vmatmul.msk.f32.gmra.mxu0 %vm300_vm0, %v3120_v0  ;;  %2442 = vmatmul.msk.f32.gmra.mxu1 %vm300_vm0, %v3120_v0  ;;  %403 = vst.msk [vmem:[#allocation2 + $0x40] sm:$0xff] %vm300_vm0, %v391_v41 }
 0x156   :  { %v2062_v6 = vadd.f32 0.5, %v2057_v33  ;;  %v1879_v50 = vmax.f32 %v1875_v5, 0.0 }
 0x158   :  { %v2063_v17 = vmul.f32 %v2062_v6, %v2904_v30  ;;  %1908 = vmatpush.msra.mxu0 %v1879_v50  ;;  %v3185_v6 = vld [vmem:[#allocation2 + $0x20] sm:$0xff]  ;;  %v1644_v50 = vsub.f32 %v2972_v59, %v3079_v16 }
 0x159   :  { %v3167_v21 = vld [vmem:[#allocation2 + $0x18] sm:$0xff] }
 0x15a   :  { %v3165_v23 = vadd.f32 -0.5, %v2063_v17  ;;  %1909 = vmatpush.msra.mxu0 %v1878_v39  ;;  %v392_v17 = vld [vmem:[%s4486_s4 + $0x28] sm:$0xff] }
 0x15b   :  { %404 = vst.msk [vmem:[#allocation2 + $0x48] sm:$0xff] %vm300_vm0, %v392_v17  ;;  %v3233_v17 = vld [vmem:[#allocation2 + $0x38] sm:$0xff] }
 0x15c   :  { %2386 = vmatmul.msk.f32.gmra.mxu2 %vm300_vm0, %v3146_v47  ;;  %2405 = vmatmul.msk.f32.gmra.mxu3 %vm300_vm0, %v3146_v47  ;;  %4583 = vst [vmem:[#allocation42_spill] sm:$0xff] %v3165_v23  ;;  %v2088_v35 = vsub.f32 %v2918_v44, %v3165_v23  ;;  %v2087_v34 = vsub.f32 %v2916_v43, %v3165_v23 }
 0x15d   :  { %2424 = vmatmul.msk.f32.gmra.mxu0 %vm300_vm0, %v3146_v47  ;;  %2443 = vmatmul.msk.f32.gmra.mxu1 %vm300_vm0, %v3146_v47 }
 0x15e   :  { %v2092_v30 = vand.u32 2147483647, %v2088_v35  ;;  %v2091_v61 = vand.u32 2147483647, %v2087_v34  ;;  %v1648_v35 = vand.u32 2147483647, %v1644_v50 }
 0x15f   :  { %v393_v34 = vld [vmem:[%s4486_s4 + $0x30] sm:$0xff] }
 0x160   :  { %v2096_v32 = vsub.f32 1.0, %v2092_v30  ;;  %v2095_v48 = vsub.f32 1.0, %v2091_v61  ;;  %v1431_v30 = vsub.f32 1.0, %v1427_v19  ;;  %v1652_v39 = vsub.f32 1.0, %v1648_v35  ;;  %405 = vst.msk [vmem:[#allocation2 + $0x50] sm:$0xff] %vm300_vm0, %v393_v34  ;;  %v394_v61 = vld [vmem:[%s4486_s4 + $0x38] sm:$0xff] }
 0x161   :  { %406 = vst.msk [vmem:[#allocation2 + $0x58] sm:$0xff] %vm300_vm0, %v394_v61  ;;  %v395_v19 = vld [vmem:[%s4486_s4 + $0x40] sm:$0xff]  ;;  %v2086_v35 = vsub.f32 %v2972_v59, %v3165_v23  ;;  %v396_v34 = vld [vmem:[%s4486_s4 + $0x48] sm:$0xff]  ;;  %v1422_v61 = vsub.f32 %v2983_v9, %v3064_v46 }
 0x162   :  { %v2100_v33 = vmax.f32 %v2096_v32, 0.0  ;;  %v2099_v5 = vmax.f32 %v2095_v48, 0.0  ;;  %v1435_v41 = vmax.f32 %v1431_v30, 0.0  ;;  %v1656_v32 = vmax.f32 %v1652_v39, 0.0  ;;  %407 = vst.msk [vmem:[#allocation2 + $0x60] sm:$0xff] %vm300_vm0, %v395_v19  ;;  %v3249_v39 = vld [vmem:[#allocation2 + $0x40] sm:$0xff] }
 0x163   :  { %v1865_v48 = vsub.f32 %v2972_v59, %v3143_v45  ;;  %v2090_v30 = vand.u32 2147483647, %v2086_v35  ;;  %408 = vst.msk [vmem:[#allocation2 + $0x68] sm:$0xff] %vm300_vm0, %v396_v34 }
 0x164   :  { %2387 = vmatmul.msk.f32.gmra.mxu2 %vm300_vm0, %v3167_v21  ;;  %2406 = vmatmul.msk.f32.gmra.mxu3 %vm300_vm0, %v3167_v21 }
 0x165   :  { %2425 = vmatmul.msk.f32.gmra.mxu0 %vm300_vm0, %v3167_v21  ;;  %2444 = vmatmul.msk.f32.gmra.mxu1 %vm300_vm0, %v3167_v21 }
 0x166   :  { %2129 = vmatpush.msra.mxu1 %v2100_v33  ;;  %1468 = vmatpush.msra.mxu2 %v1435_v41  ;;  %v3217_v33 = vld [vmem:[#allocation2 + $0x30] sm:$0xff]  ;;  %v2094_v41 = vsub.f32 1.0, %v2090_v30 }
 0x167   :  { %1689 = vmatpush.msra.mxu3 %v1656_v32  ;;  %v3281_v34 = vld [vmem:[#allocation2 + $0x50] sm:$0xff] }
 0x168   :  { %2130 = vmatpush.msra.mxu1 %v2099_v5  ;;  %v1869_v5 = vand.u32 2147483647, %v1865_v48  ;;  %v2098_v32 = vmax.f32 %v2094_v41, 0.0  ;;  %v1643_v48 = vsub.f32 %v2983_v9, %v3079_v16 }
 0x16a   :  { %v1873_v18 = vsub.f32 1.0, %v1869_v5  ;;  %2131 = vmatpush.msra.mxu1 %v2098_v32  ;;  %v1426_v5 = vand.u32 2147483647, %v1422_v61  ;;  %v397_v32 = vld [vmem:[%s4486_s4 + $0x50] sm:$0xff]  ;;  %v398_v61 = vld [vmem:[%s4486_s4 + $0x58] sm:$0xff]  ;;  %s2363_s4 = sld [smem:[#allocation4 + $0x7]] }
 0x16b   :  { %409 = vst.msk [vmem:[#allocation2 + $0x70] sm:$0xff] %vm300_vm0, %v397_v32  ;;  %v3309_v32 = vld [vmem:[#allocation2 + $0x60] sm:$0xff] }
 0x16c   :  { %2388 = vmatmul.msk.f32.gmra.mxu2 %vm300_vm0, %v3185_v6  ;;  %2407 = vmatmul.msk.f32.gmra.mxu3 %vm300_vm0, %v3185_v6  ;;  %v1877_v50 = vmax.f32 %v1873_v18, 0.0  ;;  %v1647_v18 = vand.u32 2147483647, %v1643_v48  ;;  %v1430_v19 = vsub.f32 1.0, %v1426_v5  ;;  %v1864_v48 = vsub.f32 %v2983_v9, %v3143_v45  ;;  %410 = vst.msk [vmem:[#allocation2 + $0x78] sm:$0xff] %vm300_vm0, %v398_v61 }
 0x16d   :  { %2426 = vmatmul.msk.f32.gmra.mxu0 %vm300_vm0, %v3185_v6  ;;  %2445 = vmatmul.msk.f32.gmra.mxu1 %vm300_vm0, %v3185_v6  ;;  %4585 = vst [vmem:[#allocation44_spill] sm:$0xff] %v3309_v32 }
 0x16e   :  { %1910 = vmatpush.msra.mxu0 %v1877_v50  ;;  %v3267_v50 = vld [vmem:[#allocation2 + $0x48] sm:$0xff]  ;;  %v1651_v35 = vsub.f32 1.0, %v1647_v18  ;;  %v1434_v30 = vmax.f32 %v1430_v19, 0.0  ;;  %v1868_v5 = vand.u32 2147483647, %v1864_v48  ;;  %v3297_v18 = vld [vmem:[#allocation2 + $0x58] sm:$0xff] }
 0x16f   :  { %4584 = vst [vmem:[#allocation43_spill] sm:$0xff] %v3297_v18 }
 0x170   :  { %v1655_v41 = vmax.f32 %v1651_v35, 0.0  ;;  %1469 = vmatpush.msra.mxu2 %v1434_v30  ;;  %v1872_v19 = vsub.f32 1.0, %v1868_v5  ;;  %v2085_v30 = vsub.f32 %v2983_v9, %v3165_v23  ;;  %v3319_v5 = vld [vmem:[#allocation2 + $0x68] sm:$0xff] }
 0x171   :  { %4586 = vst [vmem:[#allocation45_spill] sm:$0xff] %v3319_v5 }
 0x172   :  { %1690 = vmatpush.msra.mxu3 %v1655_v41  ;;  %v1876_v35 = vmax.f32 %v1872_v19, 0.0  ;;  %v2089_v41 = vand.u32 2147483647, %v2085_v30  ;;  %v440_v19 = vadd.f32 0.5, %v2896_v27  ;;  %v3331_v30 = vstv %s2363_s4 }
 0x173   :  { %4587 = vst [vmem:[#allocation46_spill] sm:$0xff] %v3331_v30  ;;  %v519_v4 = vld [vmem:[#allocation2 + $0x78] sm:$0xff] }
 0x174   :  { %2389 = vmatmul.msk.f32.gmra.mxu2 %vm300_vm0, %v3203_v22  ;;  %2408 = vmatmul.msk.f32.gmra.mxu3 %vm300_vm0, %v3203_v22  ;;  %v2093_v61 = vsub.f32 1.0, %v2089_v41  ;;  %v442_v41 = vmul.f32 %v3331_v30, %v440_v19 }
 0x175   :  { %2427 = vmatmul.msk.f32.gmra.mxu0 %vm300_vm0, %v3203_v22  ;;  %2446 = vmatmul.msk.f32.gmra.mxu1 %vm300_vm0, %v3203_v22 }
 0x176   :  { %1911 = vmatpush.msra.mxu0 %v1876_v35  ;;  %v2097_v48 = vmax.f32 %v2093_v61, 0.0  ;;  %v739_v35 = vadd.f32 0.5, %v2924_v51  ;;  %v3341_v27 = vadd.f32 -0.5, %v442_v41 }
 0x178   :  { %2132 = vmatpush.msra.mxu1 %v2097_v48  ;;  %v740_v61 = vmul.f32 %v739_v35, %v3331_v30  ;;  %v3335_v48 = vld [vmem:[#allocation2 + $0x70] sm:$0xff]  ;;  %v488_v19 = vsub.f32 %v2983_v9, %v3341_v27  ;;  %v489_v16 = vsub.f32 %v2972_v59, %v3341_v27  ;;  %v490_v23 = vsub.f32 %v2916_v43, %v3341_v27 }
 0x179   :  { %4588 = vst [vmem:[#allocation47_spill] sm:$0xff] %v3335_v48  ;;  %vm456_vm15 = vcmp.ge.f32.partialorder %v3341_v27, 0.0 }
 0x17a   :  { %v3343_v51 = vadd.f32 -0.5, %v740_v61  ;;  %v492_v41 = vand.u32 2147483647, %v488_v19  ;;  %v493_v38 = vand.u32 2147483647, %v489_v16 }
 0x17b   :  { %v494_v63 = vand.u32 2147483647, %v490_v23 }
 0x17c   :  { %2390 = vmatmul.msk.f32.gmra.mxu2 %vm300_vm0, %v3217_v33  ;;  %2409 = vmatmul.msk.f32.gmra.mxu3 %vm300_vm0, %v3217_v33  ;;  %v775_v35 = vsub.f32 %v2983_v9, %v3343_v51  ;;  %v496_v62 = vsub.f32 1.0, %v492_v41  ;;  %v776_v46 = vsub.f32 %v2972_v59, %v3343_v51  ;;  %v497_v16 = vsub.f32 1.0, %v493_v38 }
 0x17d   :  { %2428 = vmatmul.msk.f32.gmra.mxu0 %vm300_vm0, %v3217_v33  ;;  %2447 = vmatmul.msk.f32.gmra.mxu1 %vm300_vm0, %v3217_v33 }
 0x17e   :  { %v779_v61 = vand.u32 2147483647, %v775_v35  ;;  %v780_v35 = vand.u32 2147483647, %v776_v46 }
 0x180   :  { %v783_v20 = vsub.f32 1.0, %v779_v61  ;;  %v784_v45 = vsub.f32 1.0, %v780_v35 }
 0x182   :  { %v3371_v19 = vmax.f32 %v783_v20, 0.0  ;;  %v777_v20 = vsub.f32 %v2916_v43, %v3343_v51  ;;  %v3393_v38 = vmax.f32 %v784_v45, 0.0 }
 0x184   :  { %2391 = vmatmul.msk.f32.gmra.mxu2 %vm300_vm0, %v3233_v17  ;;  %2410 = vmatmul.msk.f32.gmra.mxu3 %vm300_vm0, %v3233_v17 }
 0x185   :  { %2429 = vmatmul.msk.f32.gmra.mxu0 %vm300_vm0, %v3233_v17  ;;  %2448 = vmatmul.msk.f32.gmra.mxu1 %vm300_vm0, %v3233_v17 }
 0x18c   :  { %2392 = vmatmul.msk.f32.gmra.mxu2 %vm300_vm0, %v3249_v39  ;;  %2411 = vmatmul.msk.f32.gmra.mxu3 %vm300_vm0, %v3249_v39 }
 0x18d   :  { %2430 = vmatmul.msk.f32.gmra.mxu0 %vm300_vm0, %v3249_v39  ;;  %2449 = vmatmul.msk.f32.gmra.mxu1 %vm300_vm0, %v3249_v39 }
 0x194   :  { %2393 = vmatmul.msk.f32.gmra.mxu2 %vm300_vm0, %v3267_v50  ;;  %2412 = vmatmul.msk.f32.gmra.mxu3 %vm300_vm0, %v3267_v50 }
 0x195   :  { %2431 = vmatmul.msk.f32.gmra.mxu0 %vm300_vm0, %v3267_v50  ;;  %2450 = vmatmul.msk.f32.gmra.mxu1 %vm300_vm0, %v3267_v50 }
 0x19c   :  { %2394 = vmatmul.msk.f32.gmra.mxu2 %vm300_vm0, %v3281_v34  ;;  %2413 = vmatmul.msk.f32.gmra.mxu3 %vm300_vm0, %v3281_v34 }
 0x19d   :  { %2432 = vmatmul.msk.f32.gmra.mxu0 %vm300_vm0, %v3281_v34  ;;  %2451 = vmatmul.msk.f32.gmra.mxu1 %vm300_vm0, %v3281_v34 }
 0x1a4   :  { %2395 = vmatmul.msk.f32.gmra.mxu2 %vm300_vm0, %v3297_v18  ;;  %2414 = vmatmul.msk.f32.gmra.mxu3 %vm300_vm0, %v3297_v18 }
 0x1a5   :  { %2433 = vmatmul.msk.f32.gmra.mxu0 %vm300_vm0, %v3297_v18  ;;  %2452 = vmatmul.msk.f32.gmra.mxu1 %vm300_vm0, %v3297_v18 }
 0x1ac   :  { %2396 = vmatmul.msk.f32.gmra.mxu2 %vm300_vm0, %v3309_v32  ;;  %2415 = vmatmul.msk.f32.gmra.mxu3 %vm300_vm0, %v3309_v32 }
 0x1ad   :  { %2434 = vmatmul.msk.f32.gmra.mxu0 %vm300_vm0, %v3309_v32  ;;  %2453 = vmatmul.msk.f32.gmra.mxu1 %vm300_vm0, %v3309_v32 }
 0x1b4   :  { %2397 = vmatmul.msk.f32.gmra.mxu2 %vm300_vm0, %v3319_v5  ;;  %2416 = vmatmul.msk.f32.gmra.mxu3 %vm300_vm0, %v3319_v5 }
 0x1b5   :  { %2435 = vmatmul.msk.f32.gmra.mxu0 %vm300_vm0, %v3319_v5  ;;  %2454 = vmatmul.msk.f32.gmra.mxu1 %vm300_vm0, %v3319_v5 }
 0x1bc   :  { %2398 = vmatmul.msk.f32.gmra.mxu2 %vm300_vm0, %v3335_v48  ;;  %2417 = vmatmul.msk.f32.gmra.mxu3 %vm300_vm0, %v3335_v48 }
 0x1bd   :  { %2436 = vmatmul.msk.f32.gmra.mxu0 %vm300_vm0, %v3335_v48  ;;  %2455 = vmatmul.msk.f32.gmra.mxu1 %vm300_vm0, %v3335_v48  ;;  %v491_v48 = vsub.f32 %v2918_v44, %v3341_v27 }
 0x1bf   :  { %v495_v15 = vand.u32 2147483647, %v491_v48 }
 0x1c4   :  { %2399 = vmatmul.msk.f32.gmra.mxu2 %vm300_vm0, %v519_v4  ;;  %2418 = vmatmul.msk.f32.gmra.mxu3 %vm300_vm0, %v519_v4 }
 0x1c5   :  { %2437 = vmatmul.msk.f32.gmra.mxu0 %vm300_vm0, %v519_v4  ;;  %2456 = vmatmul.msk.f32.gmra.mxu1 %vm300_vm0, %v519_v4  ;;  %v3369_v4 = vmax.f32 %v496_v62, 0.0 }
 0x1ca   :  { %v3361_v29 = vpop.f32.mrf.mxu0  ;;  %v3363_v52 = vpop.f32.mrf.mxu1 }
 0x1cc   :  { %2460 = vmatmul.msk.f32.vlgmr.msra.gmra.mxu2 %vm300_vm0, %v3077_v13  ;;  %2479 = vmatmul.msk.f32.vlgmr.msra.gmra.mxu3 %vm300_vm0, %v3077_v13 }
 0x1cd   :  { %2498 = vmatmul.msk.f32.vlgmr.msra.gmra.mxu0 %vm300_vm0, %v3077_v13  ;;  %2517 = vmatmul.msk.f32.vlgmr.msra.gmra.mxu1 %vm300_vm0, %v3077_v13  ;;  %v3391_v13 = vmax.f32 %v497_v16, 0.0 }
 0x1cf   :  { %v585_v41 = vpop.f32.mrf.mxu2  ;;  %v808_v61 = vpop.f32.mrf.mxu3 }
 0x1d0   :  { %v633_v10 = vmul.f32 %v585_v41, %v3369_v4  ;;  %v856_v62 = vmul.f32 %v808_v61, %v3371_v19  ;;  %v781_v41 = vand.u32 2147483647, %v777_v20  ;;  %v498_v61 = vsub.f32 1.0, %v494_v63 }
 0x1d1   :  { %v778_v20 = vsub.f32 %v2918_v44, %v3343_v51 }
 0x1d2   :  { %v3383_v46 = vpop.f32.mrf.mxu0  ;;  %v3385_v42 = vpop.f32.mrf.mxu1  ;;  %v785_v45 = vsub.f32 1.0, %v781_v41  ;;  %v3413_v63 = vmax.f32 %v498_v61, 0.0 }
 0x1d4   :  { %2461 = vmatmul.msk.f32.gmra.mxu2 %vm300_vm0, %v3120_v0  ;;  %2480 = vmatmul.msk.f32.gmra.mxu3 %vm300_vm0, %v3120_v0  ;;  %v3415_v41 = vmax.f32 %v785_v45, 0.0 }
 0x1d5   :  { %2499 = vmatmul.msk.f32.gmra.mxu0 %vm300_vm0, %v3120_v0  ;;  %2518 = vmatmul.msk.f32.gmra.mxu1 %vm300_vm0, %v3120_v0 }
 0x1d7   :  { %v588_v35 = vpop.f32.mrf.mxu2  ;;  %v811_v23 = vpop.f32.mrf.mxu3 }
 0x1d8   :  { %v634_v5 = vmul.f32 %v588_v35, %v3391_v13  ;;  %v857_v16 = vmul.f32 %v811_v23, %v3393_v38  ;;  %v3417_v35 = vstv %s2364_s19 }
 0x1d9   :  { %vm446_vm2 = vcmp.le.f32.partialorder %v2862_v53, %v3417_v35  ;;  %vm743_vm10 = vcmp.le.f32.partialorder %v2892_v25, %v3417_v35 }
 0x1da   :  { %v637_v32 = vadd.f32 %v634_v5, %v633_v10  ;;  %v860_v11 = vadd.f32 %v857_v16, %v856_v62  ;;  %v3405_v60 = vpop.f32.mrf.mxu0  ;;  %v3407_v0 = vpop.f32.mrf.mxu1  ;;  %v782_v10 = vand.u32 2147483647, %v778_v20  ;;  %v499_v62 = vsub.f32 1.0, %v495_v15  ;;  %vm447_vm3 = vmand %vm444_vm1, %vm446_vm2 }
 0x1db   :  { %vm449_vm5 = vmand %vm447_vm3, %vm448_vm4  ;;  %vm745_vm2 = vcmp.ge.f32.partialorder %v2882_v7, 0.0  ;;  %vm752_vm4 = vcmp.ge.f32.partialorder %v3343_v51, 0.0 }
 0x1dc   :  { %2462 = vmatmul.msk.f32.gmra.mxu2 %vm300_vm0, %v3146_v47  ;;  %2481 = vmatmul.msk.f32.gmra.mxu3 %vm300_vm0, %v3146_v47  ;;  %v786_v16 = vsub.f32 1.0, %v782_v10  ;;  %vm3454_vm11 = vmand %vm449_vm5, %vm451_vm6  ;;  %v1181_v10 = vadd.f32 0.5, %v3003_v54  ;;  %vm458_vm6 = vcmp.le.f32.partialorder %v3341_v27, 31.0 }
 0x1dd   :  { %2500 = vmatmul.msk.f32.gmra.mxu0 %vm300_vm0, %v3146_v47  ;;  %2519 = vmatmul.msk.f32.gmra.mxu1 %vm300_vm0, %v3146_v47  ;;  %vm744_vm1 = vmand %vm742_vm9, %vm743_vm10  ;;  %vm754_vm10 = vcmp.le.f32.partialorder %v3343_v51, 31.0 }
 0x1de   :  { %v3445_v15 = vmax.f32 %v786_v16, 0.0  ;;  %vm751_vm3 = vmand %vm749_vm12, %vm750_vm13  ;;  %v1182_v7 = vmul.f32 %v1181_v10, %v3331_v30 }
 0x1df   :  { %v591_v5 = vpop.f32.mrf.mxu2  ;;  %v814_v48 = vpop.f32.mrf.mxu3  ;;  %vm3467_vm5 = vmand %vm455_vm14, %vm456_vm15 }
 0x1e0   :  { %v635_v23 = vmul.f32 %v591_v5, %v3413_v63  ;;  %v858_v61 = vmul.f32 %v814_v48, %v3415_v41  ;;  %vm746_vm7 = vmand %vm744_vm1, %vm745_vm2  ;;  %vm964_vm2 = vcmp.le.f32.partialorder %v2940_v26, %v3417_v35 }
 0x1e1   :  { %vm753_vm9 = vmand %vm751_vm3, %vm752_vm4  ;;  %vm966_vm3 = vcmp.ge.f32.partialorder %v2946_v24, 0.0 }
 0x1e2   :  { %v638_v45 = vadd.f32 %v637_v32, %v635_v23  ;;  %v861_v20 = vadd.f32 %v860_v11, %v858_v61  ;;  %v3431_v14 = vpop.f32.mrf.mxu0  ;;  %v3433_v53 = vpop.f32.mrf.mxu1  ;;  %v3443_v11 = vmax.f32 %v499_v62, 0.0  ;;  %v961_v62 = vmul.f32 %v960_v49, %v3331_v30  ;;  %vm3486_vm12 = vmand %vm3467_vm5, %vm458_vm6 }
 0x1e3   :  { %vm3493_vm13 = vmand %vm746_vm7, %vm747_vm8  ;;  %v4539_v49 = vmov 0.0   ;;  %vm968_vm5 = vcmp.le.f32.partialorder %v2946_v24, %v3429_v2  ;;  %vm970_vm6 = vcmp.ge.f32.partialorder %v2968_v56, 0.0  ;;  %vm971_vm7 = vcmp.le.f32.partialorder %v2968_v56, 31.0 }
 0x1e4   :  { %2463 = vmatmul.msk.f32.gmra.mxu2 %vm300_vm0, %v3167_v21  ;;  %2482 = vmatmul.msk.f32.gmra.mxu3 %vm300_vm0, %v3167_v21  ;;  %vm3501_vm14 = vmand %vm753_vm9, %vm754_vm10  ;;  %vm1184_vm9 = vcmp.ge.f32.partialorder %v2943_v28, 0.0  ;;  %vm1185_vm10 = vcmp.le.f32.partialorder %v2943_v28, %v3417_v35 }
 0x1e5   :  { %2501 = vmatmul.msk.f32.gmra.mxu0 %vm300_vm0, %v3167_v21  ;;  %2520 = vmatmul.msk.f32.gmra.mxu1 %vm300_vm0, %v3167_v21  ;;  %vm460_vm15 = vmand %vm3454_vm11, %vm3486_vm12  ;;  %vm963_vm11 = vcmp.ge.f32.partialorder %v2940_v26, 0.0 }
 0x1e6   :  { %vm756_vm1 = vmand %vm3493_vm13, %vm3501_vm14  ;;  %vm1191_vm14 = vcmp.ge.f32.partialorder %v2970_v58, 0.0 }
 0x1e7   :  { %v594_v47 = vpop.f32.mrf.mxu2  ;;  %v817_v32 = vpop.f32.mrf.mxu3  ;;  %vm3649_vm4 = vmand %vm963_vm11, %vm964_vm2 }
 0x1e8   :  { %v636_v25 = vmul.f32 %v594_v47, %v3443_v11  ;;  %v859_v21 = vmul.f32 %v817_v32, %v3445_v15  ;;  %vm3665_vm8 = vmand %vm3649_vm4, %vm966_vm3  ;;  %vm1187_vm3 = vcmp.ge.f32.partialorder %v2951_v31, 0.0 }
 0x1e9   :  { %vm3696_vm12 = vmand %vm3665_vm8, %vm968_vm5  ;;  %vm1189_vm8 = vcmp.le.f32.partialorder %v2951_v31, %v3429_v2 }
 0x1ea   :  { %v639_v37 = vadd.f32 %v638_v45, %v636_v25  ;;  %v862_v5 = vadd.f32 %v861_v20, %v859_v21  ;;  %v3472_v48 = vpop.f32.mrf.mxu0  ;;  %v3477_v23 = vpop.f32.mrf.mxu1  ;;  %v3499_v20 = vadd.f32 -0.5, %v961_v62  ;;  %vm3719_vm2 = vmand %vm1184_vm9, %vm1185_vm10 }
 0x1ec   :  { %v640_v61 = vrot.slane %v639_v37, 4  ;;  %v863_v54 = vrot.slane %v862_v5, 4  ;;  %2464 = vmatmul.msk.f32.gmra.mxu2 %vm300_vm0, %v3185_v6  ;;  %2483 = vmatmul.msk.f32.gmra.mxu3 %vm300_vm0, %v3185_v6  ;;  %v997_v1 = vsub.f32 %v2972_v59, %v3499_v20  ;;  %vm973_vm13 = vcmp.ge.f32.partialorder %v3499_v20, 0.0 }
 0x1ed   :  { %2502 = vmatmul.msk.f32.gmra.mxu0 %vm300_vm0, %v3185_v6  ;;  %2521 = vmatmul.msk.f32.gmra.mxu1 %vm300_vm0, %v3185_v6  ;;  %vm975_vm11 = vcmp.le.f32.partialorder %v3499_v20, 31.0 }
 0x1ee   :  { %v641_v16 = vadd.f32 %v640_v61, %v639_v37  ;;  %v864_v45 = vadd.f32 %v863_v54, %v862_v5  ;;  %v3513_v37 = vadd.f32 -0.5, %v1182_v7  ;;  %v996_v54 = vsub.f32 %v2983_v9, %v3499_v20 }
 0x1ef   :  { %v597_v47 = vpop.f32.mrf.mxu2  ;;  %v820_v32 = vpop.f32.mrf.mxu3  ;;  %v1001_v51 = vand.u32 2147483647, %v997_v1 }
 0x1f0   :  { %v642_v25 = vrot.slane %v641_v16, 2  ;;  %v865_v21 = vrot.slane %v864_v45, 2  ;;  %v647_v10 = vmul.f32 %v597_v47, %v3369_v4  ;;  %v870_v6 = vmul.f32 %v820_v32, %v3371_v19 }
 0x1f1   :  { %v998_v47 = vsub.f32 %v2916_v43, %v3499_v20  ;;  %v1218_v7 = vsub.f32 %v2972_v59, %v3513_v37  ;;  %v1000_v1 = vand.u32 2147483647, %v996_v54  ;;  %v1217_v3 = vsub.f32 %v2983_v9, %v3513_v37 }
 0x1f2   :  { %v643_v5 = vadd.f32 %v642_v25, %v641_v16  ;;  %v866_v62 = vadd.f32 %v865_v21, %v864_v45  ;;  %v3519_v61 = vpop.f32.mrf.mxu0  ;;  %v3525_v30 = vpop.f32.mrf.mxu1  ;;  %v999_v45 = vsub.f32 %v2918_v44, %v3499_v20  ;;  %v2383_v25 = vsel %vm460_vm15, 1.0, %v4539_v49  ;;  %v4620_v20 = vld [vmem:[#allocation18_spill] sm:$0xff] }
 0x1f3   :  { %v2402_v21 = vsel %vm756_vm1, 1.0, %v4539_v49  ;;  %v1002_v12 = vand.u32 2147483647, %v998_v47  ;;  %v1219_v36 = vsub.f32 %v2916_v43, %v3513_v37  ;;  %v1004_v43 = vsub.f32 1.0, %v1000_v1  ;;  %vm3707_vm1 = vmand %vm970_vm6, %vm971_vm7 }
 0x1f4   :  { %v644_v16 = vrot.slane %v643_v5, 1  ;;  %v867_v32 = vrot.slane %v866_v62, 1  ;;  %2465 = vmatmul.msk.f32.gmra.mxu2 %vm300_vm0, %v3203_v22  ;;  %2484 = vmatmul.msk.f32.gmra.mxu3 %vm300_vm0, %v3203_v22  ;;  %v1003_v54 = vand.u32 2147483647, %v999_v45  ;;  %v1221_v57 = vand.u32 2147483647, %v1217_v3  ;;  %vm3745_vm6 = vmand %vm3707_vm1, %vm973_vm13 }
 0x1f5   :  { %2503 = vmatmul.msk.f32.gmra.mxu0 %vm300_vm0, %v3203_v22  ;;  %2522 = vmatmul.msk.f32.gmra.mxu1 %vm300_vm0, %v3203_v22  ;;  %v1222_v22 = vand.u32 2147483647, %v1218_v7  ;;  %vm1192_vm15 = vcmp.le.f32.partialorder %v2970_v58, 31.0  ;;  %vm1194_vm4 = vcmp.ge.f32.partialorder %v3513_v37, 0.0  ;;  %vm1188_vm7 = vmand %vm3719_vm2, %vm1187_vm3  ;;  %vm1196_vm10 = vcmp.le.f32.partialorder %v3513_v37, 31.0 }
 0x1f6   :  { %v645_v59 = vadd.f32 %v644_v16, %v643_v5  ;;  %v868_v18 = vadd.f32 %v867_v32, %v866_v62  ;;  %v1005_v16 = vsub.f32 1.0, %v1001_v51  ;;  %v1220_v32 = vsub.f32 %v2918_v44, %v3513_v37  ;;  %vm3731_vm5 = vmand %vm1191_vm14, %vm1192_vm15 }
 0x1f7   :  { %v600_v27 = vpop.f32.mrf.mxu2  ;;  %v823_v40 = vpop.f32.mrf.mxu3  ;;  %v1226_v7 = vsub.f32 1.0, %v1222_v22  ;;  %v1007_v51 = vsub.f32 1.0, %v1003_v54  ;;  %v1225_v3 = vsub.f32 1.0, %v1221_v57  ;;  %vm3762_vm9 = vmand %vm3731_vm5, %vm1194_vm4 }
 0x1f8   :  { %v3550_v8 = vmul.f32 %v2383_v25, %v645_v59  ;;  %v3552_v49 = vmul.f32 %v2402_v21, %v868_v18  ;;  %v648_v5 = vmul.f32 %v600_v27, %v3391_v13  ;;  %v871_v62 = vmul.f32 %v823_v40, %v3393_v38  ;;  %vm3776_vm13 = vmand %vm3745_vm6, %vm975_vm11 }
 0x1f9   :  { %v1006_v59 = vsub.f32 1.0, %v1002_v12  ;;  %v1223_v25 = vand.u32 2147483647, %v1219_v36  ;;  %v3566_v40 = vmax.f32 %v1005_v16, 0.0  ;;  %v3572_v12 = vmax.f32 %v1004_v43, 0.0  ;;  %vm3782_vm14 = vmand %vm1188_vm7, %vm1189_vm8 }
 0x1fa   :  { %v651_v47 = vadd.f32 %v648_v5, %v647_v10  ;;  %v874_v9 = vadd.f32 %v871_v62, %v870_v6  ;;  %v3558_v55 = vpop.f32.mrf.mxu0  ;;  %v3560_v18 = vpop.f32.mrf.mxu1  ;;  %v1224_v10 = vand.u32 2147483647, %v1220_v32  ;;  %v3580_v62 = vmax.f32 %v1226_v7, 0.0  ;;  %vm3792_vm15 = vmand %vm3762_vm9, %vm1196_vm10 }
 0x1fb   :  { %v3574_v6 = vmax.f32 %v1006_v59, 0.0  ;;  %v1227_v45 = vsub.f32 1.0, %v1223_v25  ;;  %v1078_v5 = vmul.f32 %v3383_v46, %v3566_v40  ;;  %v3582_v16 = vmax.f32 %v1007_v51, 0.0  ;;  %vm977_vm1 = vmand %vm3696_vm12, %vm3776_vm13 }
 0x1fc   :  { %2466 = vmatmul.msk.f32.gmra.mxu2 %vm300_vm0, %v3217_v33  ;;  %2485 = vmatmul.msk.f32.gmra.mxu3 %vm300_vm0, %v3217_v33  ;;  %v1077_v54 = vmul.f32 %v3361_v29, %v3572_v12  ;;  %v3586_v32 = vmax.f32 %v1225_v3, 0.0  ;;  %v1299_v46 = vmul.f32 %v3385_v42, %v3580_v62  ;;  %vm1198_vm11 = vmand %vm3782_vm14, %vm3792_vm15 }
 0x1fd   :  { %2504 = vmatmul.msk.f32.gmra.mxu0 %vm300_vm0, %v3217_v33  ;;  %2523 = vmatmul.msk.f32.gmra.mxu1 %vm300_vm0, %v3217_v33  ;;  %v1228_v33 = vsub.f32 1.0, %v1224_v10  ;;  %v1079_v59 = vmul.f32 %v3405_v60, %v3574_v6  ;;  %v3590_v25 = vmax.f32 %v1227_v45, 0.0  ;;  %v1080_v29 = vmul.f32 %v3431_v14, %v3582_v16 }
 0x1fe   :  { %v1298_v60 = vmul.f32 %v3363_v52, %v3586_v32  ;;  %v1092_v52 = vmul.f32 %v3519_v61, %v3566_v40 }
 0x1ff   :  { %v603_v21 = vpop.f32.mrf.mxu2  ;;  %v826_v1 = vpop.f32.mrf.mxu3  ;;  %v1300_v51 = vmul.f32 %v3407_v0, %v3590_v25 }
 0x200   :  { %v649_v36 = vmul.f32 %v603_v21, %v3413_v63  ;;  %v872_v27 = vmul.f32 %v826_v1, %v3415_v41  ;;  %v1302_v45 = vadd.f32 %v1299_v46, %v1298_v60 }
 0x202   :  { %v652_v43 = vadd.f32 %v651_v47, %v649_v36  ;;  %v875_v22 = vadd.f32 %v874_v9, %v872_v27  ;;  %v1050_v57 = vpop.f32.mrf.mxu0  ;;  %v3592_v21 = vpop.f32.mrf.mxu1  ;;  %v1081_v9 = vadd.f32 %v1078_v5, %v1077_v54  ;;  %v3602_v47 = vmax.f32 %v1228_v33, 0.0 }
 0x203   :  { %v1303_v33 = vadd.f32 %v1302_v45, %v1300_v51  ;;  %v1312_v54 = vmul.f32 %v3477_v23, %v3586_v32  ;;  %v1314_v51 = vmul.f32 %v3560_v18, %v3590_v25 }
 0x204   :  { %2467 = vmatmul.msk.f32.gmra.mxu2 %vm300_vm0, %v3233_v17  ;;  %2486 = vmatmul.msk.f32.gmra.mxu3 %vm300_vm0, %v3233_v17  ;;  %v1082_v7 = vadd.f32 %v1081_v9, %v1079_v59  ;;  %v1301_v36 = vmul.f32 %v3433_v53, %v3602_v47  ;;  %v1313_v59 = vmul.f32 %v3525_v30, %v3580_v62 }
 0x205   :  { %2505 = vmatmul.msk.f32.gmra.mxu0 %vm300_vm0, %v3233_v17  ;;  %2524 = vmatmul.msk.f32.gmra.mxu1 %vm300_vm0, %v3233_v17  ;;  %v1091_v17 = vmul.f32 %v3472_v48, %v3572_v12 }
 0x206   :  { %v1083_v1 = vadd.f32 %v1082_v7, %v1080_v29  ;;  %v1304_v30 = vadd.f32 %v1303_v33, %v1301_v36  ;;  %v1316_v7 = vadd.f32 %v1313_v59, %v1312_v54 }
 0x207   :  { %v606_v10 = vpop.f32.mrf.mxu2  ;;  %v829_v42 = vpop.f32.mrf.mxu3  ;;  %v1095_v61 = vadd.f32 %v1092_v52, %v1091_v17 }
 0x208   :  { %v650_v3 = vmul.f32 %v606_v10, %v3443_v11  ;;  %v873_v14 = vmul.f32 %v829_v42, %v3445_v15  ;;  %v1084_v23 = vrot.slane %v1083_v1, 4  ;;  %v1317_v26 = vadd.f32 %v1316_v7, %v1314_v51 }
 0x20a   :  { %v653_v27 = vadd.f32 %v652_v43, %v650_v3  ;;  %v876_v5 = vadd.f32 %v875_v22, %v873_v14  ;;  %v1053_v0 = vpop.f32.mrf.mxu0  ;;  %v1274_v46 = vpop.f32.mrf.mxu1  ;;  %v1093_v43 = vmul.f32 %v3558_v55, %v3574_v6  ;;  %v1094_v3 = vmul.f32 %v1050_v57, %v3582_v16 }
 0x20b   :  { %v1114_v9 = vmul.f32 %v1053_v0, %v3572_v12  ;;  %v1335_v48 = vmul.f32 %v1274_v46, %v3586_v32  ;;  %v1085_v57 = vadd.f32 %v1084_v23, %v1083_v1  ;;  %v1315_v0 = vmul.f32 %v3592_v21, %v3602_v47  ;;  %v3680_v23 = vld [vmem:[%s4485_s3] sm:$0x1] }
 0x20c   :  { %v654_v53 = vrot.slane %v653_v27, 4  ;;  %v877_v29 = vrot.slane %v876_v5, 4  ;;  %2468 = vmatmul.msk.f32.gmra.mxu2 %vm300_vm0, %v3249_v39  ;;  %2487 = vmatmul.msk.f32.gmra.mxu3 %vm300_vm0, %v3249_v39  ;;  %v1096_v17 = vadd.f32 %v1095_v61, %v1093_v43  ;;  %v3685_v61 = vld [vmem:[%s4485_s3 + $0x4] sm:$0x1] }
 0x20d   :  { %2506 = vmatmul.msk.f32.gmra.mxu0 %vm300_vm0, %v3249_v39  ;;  %2525 = vmatmul.msk.f32.gmra.mxu1 %vm300_vm0, %v3249_v39  ;;  %v1305_v39 = vrot.slane %v1304_v30, 4 }
 0x20e   :  { %v655_v22 = vadd.f32 %v654_v53, %v653_v27  ;;  %v878_v60 = vadd.f32 %v877_v29, %v876_v5  ;;  %v1097_v1 = vadd.f32 %v1096_v17, %v1094_v3 }
 0x20f   :  { %v609_v10 = vpop.f32.mrf.mxu2  ;;  %v832_v42 = vpop.f32.mrf.mxu3  ;;  %v1306_v21 = vadd.f32 %v1305_v39, %v1304_v30 }
 0x210   :  { %v656_v14 = vrot.slane %v655_v22, 2  ;;  %v879_v45 = vrot.slane %v878_v60, 2  ;;  %v670_v36 = vmul.f32 %v609_v10, %v3369_v4  ;;  %v893_v18 = vmul.f32 %v832_v42, %v3371_v19 }
 0x211   :  { %v1307_v28 = vrot.slane %v1306_v21, 2 }
 0x212   :  { %v657_v52 = vadd.f32 %v656_v14, %v655_v22  ;;  %v880_v27 = vadd.f32 %v879_v45, %v878_v60  ;;  %v1056_v5 = vpop.f32.mrf.mxu0  ;;  %v1277_v54 = vpop.f32.mrf.mxu1  ;;  %v1086_v22 = vrot.slane %v1085_v57, 2 }
 0x213   :  { %v1115_v33 = vmul.f32 %v1056_v5, %v3566_v40  ;;  %v1336_v29 = vmul.f32 %v1277_v54, %v3580_v62 }
 0x214   :  { %v658_v46 = vrot.slane %v657_v52, 1  ;;  %v881_v53 = vrot.slane %v880_v27, 1  ;;  %2469 = vmatmul.msk.f32.gmra.mxu2 %vm300_vm0, %v3267_v50  ;;  %2488 = vmatmul.msk.f32.gmra.mxu3 %vm300_vm0, %v3267_v50  ;;  %v1087_v55 = vadd.f32 %v1086_v22, %v1085_v57  ;;  %v4627_v57 = vld [vmem:[#allocation33_spill] sm:$0xff] }
 0x215   :  { %v1118_v43 = vadd.f32 %v1115_v33, %v1114_v9  ;;  %2507 = vmatmul.msk.f32.gmra.mxu0 %vm300_vm0, %v3267_v50  ;;  %v1339_v51 = vadd.f32 %v1336_v29, %v1335_v48  ;;  %2526 = vmatmul.msk.f32.gmra.mxu1 %vm300_vm0, %v3267_v50  ;;  %v1318_v9 = vadd.f32 %v1317_v26, %v1315_v0  ;;  %v1098_v50 = vrot.slane %v1097_v1, 4 }
 0x216   :  { %v659_v60 = vadd.f32 %v658_v46, %v657_v52  ;;  %v882_v7 = vadd.f32 %v881_v53, %v880_v27  ;;  %v1308_v46 = vadd.f32 %v1307_v28, %v1306_v21  ;;  %v4625_v28 = vld [vmem:[#allocation16_spill] sm:$0xff] }
 0x217   :  { %v612_v48 = vpop.f32.mrf.mxu2  ;;  %v835_v10 = vpop.f32.mrf.mxu3  ;;  %v1319_v58 = vrot.slane %v1318_v9, 4  ;;  %v1099_v54 = vadd.f32 %v1098_v50, %v1097_v1  ;;  %v1088_v1 = vrot.slane %v1087_v55, 1 }
 0x218   :  { %v661_v42 = vsub.f32 %v659_v60, %v3680_v23  ;;  %v884_v3 = vsub.f32 %v882_v7, %v3685_v61  ;;  %v671_v56 = vmul.f32 %v612_v48, %v3391_v13  ;;  %v894_v45 = vmul.f32 %v835_v10, %v3393_v38  ;;  %v4621_v7 = vld [vmem:[#allocation36_spill] sm:$0xff] }
 0x219   :  { %v1320_v29 = vadd.f32 %v1319_v58, %v1318_v9  ;;  %v1837_v48 = vmul.f32 %v4621_v7, %v4620_v20  ;;  %v1089_v37 = vadd.f32 %v1088_v1, %v1087_v55  ;;  %v1309_v50 = vrot.slane %v1308_v46, 1 }
 0x21a   :  { %v3736_v17 = vmul.f32 %v661_v42, %v3550_v8  ;;  %v3739_v52 = vmul.f32 %v884_v3, %v3552_v49  ;;  %v1059_v27 = vpop.f32.mrf.mxu0  ;;  %v674_v5 = vadd.f32 %v671_v56, %v670_v36  ;;  %v897_v26 = vadd.f32 %v894_v45, %v893_v18  ;;  %v1280_v33 = vpop.f32.mrf.mxu1  ;;  %v4630_v36 = vld [vmem:[#allocation39_spill] sm:$0xff] }
 0x21b   :  { %v1116_v0 = vmul.f32 %v1059_v27, %v3574_v6  ;;  %v1337_v59 = vmul.f32 %v1280_v33, %v3590_v25  ;;  %v1321_v56 = vrot.slane %v1320_v29, 2  ;;  %v1838_v30 = vadd.f32 %v1837_v48, %v4625_v28  ;;  %v4626_v27 = vld [vmem:[#allocation17_spill] sm:$0xff]  ;;  %v4632_v48 = vld [vmem:[#allocation30_spill] sm:$0xff] }
 0x21c   :  { %2470 = vmatmul.msk.f32.gmra.mxu2 %vm300_vm0, %v3281_v34  ;;  %2489 = vmatmul.msk.f32.gmra.mxu3 %vm300_vm0, %v3281_v34  ;;  %v1839_v58 = vmul.f32 %v4627_v57, %v4626_v27  ;;  %v1310_v7 = vadd.f32 %v1309_v50, %v1308_v46 }
 0x21d   :  { %v1119_v18 = vadd.f32 %v1118_v43, %v1116_v0  ;;  %2508 = vmatmul.msk.f32.gmra.mxu0 %vm300_vm0, %v3281_v34  ;;  %2527 = vmatmul.msk.f32.gmra.mxu1 %vm300_vm0, %v3281_v34  ;;  %v1340_v43 = vadd.f32 %v1339_v51, %v1337_v59  ;;  %v1100_v34 = vrot.slane %v1099_v54, 2  ;;  %v4624_v51 = vld [vmem:[#allocation40_spill] sm:$0xff]  ;;  %v4628_v0 = vmov 0.0  }
 0x21e   :  { %v2058_v9 = vmul.f32 %v4624_v51, %v4620_v20  ;;  %v2421_v55 = vsel %vm977_vm1, 1.0, %v4628_v0  ;;  %v2060_v59 = vmul.f32 %v4630_v36, %v4626_v27 }
 0x21f   :  { %v615_v22 = vpop.f32.mrf.mxu2  ;;  %v838_v60 = vpop.f32.mrf.mxu3  ;;  %v1101_v33 = vadd.f32 %v1100_v34, %v1099_v54  ;;  %v1616_v34 = vmul.f32 %v4632_v48, %v4620_v20  ;;  %v4634_v48 = vld [vmem:[#allocation29_spill] sm:$0xff] }
 0x220   :  { %v672_v10 = vmul.f32 %v615_v22, %v3413_v63  ;;  %v895_v24 = vmul.f32 %v838_v60, %v3415_v41  ;;  %v2059_v1 = vadd.f32 %v2058_v9, %v4625_v28  ;;  %v4631_v22 = vld [vmem:[#allocation27_spill] sm:$0xff]  ;;  %v2440_v60 = vsel %vm1198_vm11, 1.0, %v4628_v0 }
 0x221   :  { %v1395_v54 = vmul.f32 %v4631_v22, %v4620_v20  ;;  %v1102_v53 = vrot.slane %v1101_v33, 1 }
 0x222   :  { %v675_v42 = vadd.f32 %v674_v5, %v672_v10  ;;  %v898_v3 = vadd.f32 %v897_v26, %v895_v24  ;;  %v1062_v14 = vpop.f32.mrf.mxu0  ;;  %v1283_v39 = vpop.f32.mrf.mxu1  ;;  %v4629_v26 = vld [vmem:[#allocation43_spill] sm:$0xff]  ;;  %v3835_v10 = vmul.f32 %v2421_v55, %v1089_v37  ;;  %v1322_v24 = vadd.f32 %v1321_v56, %v1320_v29 }
 0x223   :  { %v1117_v45 = vmul.f32 %v1062_v14, %v3582_v16  ;;  %v1338_v5 = vmul.f32 %v1283_v39, %v3602_v47  ;;  %v2061_v50 = vadd.f32 %v2060_v59, %v2059_v1  ;;  %v1396_v57 = vadd.f32 %v1395_v54, %v4625_v28 }
 0x224   :  { %2471 = vmatmul.msk.f32.gmra.mxu2 %vm300_vm0, %v4629_v26  ;;  %2490 = vmatmul.msk.f32.gmra.mxu3 %vm300_vm0, %v4629_v26 }
 0x225   :  { %v1120_v31 = vadd.f32 %v1119_v18, %v1117_v45  ;;  %2509 = vmatmul.msk.f32.gmra.mxu0 %vm300_vm0, %v4629_v26  ;;  %v1341_v18 = vadd.f32 %v1340_v43, %v1338_v5  ;;  %2528 = vmatmul.msk.f32.gmra.mxu1 %vm300_vm0, %v4629_v26  ;;  %v1840_v45 = vadd.f32 %v1839_v58, %v1838_v30  ;;  %v4633_v5 = vld [vmem:[#allocation25_spill] sm:$0xff] }
 0x226   :  { %v1397_v20 = vmul.f32 %v4633_v5, %v4626_v27  ;;  %v1617_v26 = vadd.f32 %v1616_v34, %v4625_v28 }
 0x227   :  { %v1121_v51 = vrot.slane %v1120_v31, 4  ;;  %v618_v9 = vpop.f32.mrf.mxu2  ;;  %v841_v14 = vpop.f32.mrf.mxu3  ;;  %v1342_v39 = vrot.slane %v1341_v18, 4  ;;  %v1844_v22 = vadd.f32 0.5, %v1840_v45 }
 0x228   :  { %v673_v21 = vmul.f32 %v618_v9, %v3443_v11  ;;  %v896_v46 = vmul.f32 %v841_v14, %v3445_v15  ;;  %v4635_v9 = vld [vmem:[#allocation44_spill] sm:$0xff]  ;;  %v1398_v28 = vadd.f32 %v1397_v20, %v1396_v57 }
 0x229   :  { %v1122_v43 = vadd.f32 %v1121_v51, %v1120_v31  ;;  %v1343_v37 = vadd.f32 %v1342_v39, %v1341_v18  ;;  %v1618_v31 = vmul.f32 %v4634_v48, %v4626_v27  ;;  %v1323_v27 = vrot.slane %v1322_v24, 1  ;;  %v4636_v39 = vld [vmem:[#allocation46_spill] sm:$0xff] }
 0x22a   :  { %v676_v55 = vadd.f32 %v675_v42, %v673_v21  ;;  %v899_v29 = vadd.f32 %v898_v3, %v896_v46  ;;  %v1065_v56 = vpop.f32.mrf.mxu0  ;;  %v1286_v36 = vpop.f32.mrf.mxu1  ;;  %v3849_v42 = vmul.f32 %v2440_v60, %v1310_v7  ;;  %v1845_v21 = vmul.f32 %v1844_v22, %v4636_v39 }
 0x22b   :  { %v1123_v30 = vrot.slane %v1122_v43, 2  ;;  %v1137_v58 = vmul.f32 %v1065_v56, %v3572_v12  ;;  %v1344_v59 = vrot.slane %v1343_v37, 2  ;;  %v1358_v51 = vmul.f32 %v1286_v36, %v3586_v32 }
 0x22c   :  { %v677_v1 = vrot.slane %v676_v55, 4  ;;  %v900_v54 = vrot.slane %v899_v29, 4  ;;  %2472 = vmatmul.msk.f32.gmra.mxu2 %vm300_vm0, %v4635_v9  ;;  %2491 = vmatmul.msk.f32.gmra.mxu3 %vm300_vm0, %v4635_v9  ;;  %v2065_v12 = vadd.f32 0.5, %v2061_v50  ;;  %v3857_v32 = vadd.f32 %v1102_v53, %v1101_v33  ;;  %v3869_v33 = vld [vmem:[%s4485_s3 + $0xd] sm:$0x1] }
 0x22d   :  { %v1124_v3 = vadd.f32 %v1123_v30, %v1122_v43  ;;  %2510 = vmatmul.msk.f32.gmra.mxu0 %vm300_vm0, %v4635_v9  ;;  %v1345_v18 = vadd.f32 %v1344_v59, %v1343_v37  ;;  %2529 = vmatmul.msk.f32.gmra.mxu1 %vm300_vm0, %v4635_v9  ;;  %v1619_v46 = vadd.f32 %v1618_v31, %v1617_v26  ;;  %v3863_v43 = vld [vmem:[%s4485_s3 + $0x9] sm:$0x1]  ;;  %v3877_v59 = vadd.f32 -0.5, %v1845_v21 }
 0x22e   :  { %v678_v34 = vadd.f32 %v677_v1, %v676_v55  ;;  %v901_v14 = vadd.f32 %v900_v54, %v899_v29  ;;  %v2066_v55 = vmul.f32 %v2065_v12, %v4636_v39  ;;  %v1402_v29 = vadd.f32 0.5, %v1398_v28  ;;  %v4638_v12 = vld [vmem:[#allocation45_spill] sm:$0xff]  ;;  %v683_v28 = vld [vmem:[%s4485_s3 + $0x1] sm:$0x1] }
 0x22f   :  { %v1125_v60 = vrot.slane %v1124_v3, 1  ;;  %v621_v7 = vpop.f32.mrf.mxu2  ;;  %v844_v45 = vpop.f32.mrf.mxu3  ;;  %v1346_v50 = vrot.slane %v1345_v18, 1  ;;  %v3873_v56 = vadd.f32 %v1323_v27, %v1322_v24  ;;  %4637 = vst [vmem:[#allocation18_spill] sm:$0xff] %v3877_v59  ;;  %v1623_v1 = vadd.f32 0.5, %v1619_v46  ;;  %v3897_v27 = vld [vmem:[%s4485_s3 + $0x5] sm:$0x1] }
 0x230   :  { %v679_v57 = vrot.slane %v678_v34, 2  ;;  %v902_v5 = vrot.slane %v901_v14, 2  ;;  %v694_v20 = vmul.f32 %v621_v7, %v3369_v4  ;;  %v916_v53 = vmul.f32 %v844_v45, %v3371_v19  ;;  %v3882_v19 = vld [vmem:[%s4485_s3 + $0x8] sm:$0x1] }
 0x231   :  { %v1126_v37 = vadd.f32 %v1125_v60, %v1124_v3  ;;  %v1347_v26 = vadd.f32 %v1346_v50, %v1345_v18  ;;  %v1624_v50 = vmul.f32 %v1623_v1, %v4636_v39 }
 0x232   :  { %v680_v30 = vadd.f32 %v679_v57, %v678_v34  ;;  %v903_v36 = vadd.f32 %v902_v5, %v901_v14  ;;  %v1068_v22 = vpop.f32.mrf.mxu0  ;;  %v1289_v31 = vpop.f32.mrf.mxu1  ;;  %v1403_v34 = vmul.f32 %v1402_v29, %v4636_v39  ;;  %v1105_v57 = vsub.f32 %v3857_v32, %v3882_v19 }
 0x233   :  { %v1128_v48 = vsub.f32 %v1126_v37, %v3863_v43  ;;  %v1138_v4 = vmul.f32 %v1068_v22, %v3566_v40  ;;  %v1349_v24 = vsub.f32 %v1347_v26, %v3869_v33  ;;  %v1359_v3 = vmul.f32 %v1289_v31, %v3580_v62  ;;  %v4640_v26 = vld [vmem:[#allocation22_spill] sm:$0xff] }
 0x234   :  { %v681_v54 = vrot.slane %v680_v30, 1  ;;  %v904_v9 = vrot.slane %v903_v36, 1  ;;  %2473 = vmatmul.msk.f32.gmra.mxu2 %vm300_vm0, %v4638_v12  ;;  %2492 = vmatmul.msk.f32.gmra.mxu3 %vm300_vm0, %v4638_v12  ;;  %v3903_v62 = vadd.f32 -0.5, %v2066_v55  ;;  %v663_v5 = vadd.f32 %v3736_v17, %v3680_v23 }
 0x235   :  { %v3889_v40 = vmul.f32 %v1128_v48, %v3835_v10  ;;  %v1141_v18 = vadd.f32 %v1138_v4, %v1137_v58  ;;  %2511 = vmatmul.msk.f32.gmra.mxu0 %vm300_vm0, %v4638_v12  ;;  %v3907_v14 = vmul.f32 %v1349_v24, %v3849_v42  ;;  %v1362_v45 = vadd.f32 %v1359_v3, %v1358_v51  ;;  %v3914_v58 = vld [vmem:[%s4485_s3 + $0xc] sm:$0x1]  ;;  %v4641_v3 = vld [vmem:[#allocation47_spill] sm:$0xff] }
 0x236   :  { %4639 = vst [vmem:[#allocation36_spill] sm:$0xff] %v3903_v62  ;;  %v682_v60 = vadd.f32 %v681_v54, %v680_v30  ;;  %v905_v7 = vadd.f32 %v904_v9, %v903_v36  ;;  %2530 = vmatmul.msk.f32.gmra.mxu1 %vm300_vm0, %v4638_v12  ;;  %v1880_v30 = vsub.f32 %v4640_v26, %v3877_v59  ;;  %v3926_v36 = vadd.f32 -0.5, %v1403_v34  ;;  %v664_v12 = vld [vmem:[#allocation10] sm:$0xff] }
 0x237   :  { %v624_v21 = vpop.f32.mrf.mxu2  ;;  %v847_v46 = vpop.f32.mrf.mxu3  ;;  %v1326_v39 = vsub.f32 %v3873_v56, %v3914_v58  ;;  %v2101_v48 = vsub.f32 %v4640_v26, %v3903_v62  ;;  %v3937_v1 = vadd.f32 -0.5, %v1624_v50  ;;  %v665_v24 = vperm.slane %v663_v5, 0  ;;  %v688_v34 = vld [vmem:[#allocation10 + $0x40] sm:$0xff] }
 0x238   :  { %v684_v37 = vsub.f32 %v682_v60, %v683_v28  ;;  %v907_v51 = vsub.f32 %v905_v7, %v3897_v27  ;;  %v695_v55 = vmul.f32 %v624_v21, %v3391_v13  ;;  %v917_v29 = vmul.f32 %v847_v46, %v3393_v38 }
 0x239   :  { %v668_v56 = vmul.f32 %v3736_v17, %v3736_v17  ;;  %v1438_v17 = vsub.f32 %v4640_v26, %v3926_v36  ;;  %v2105_v7 = vand.u32 2147483647, %v2101_v48  ;;  %v1659_v5 = vsub.f32 %v4640_v26, %v3937_v1 }
 0x23a   :  { %v685_v32 = vmul.f32 %v684_v37, %v3550_v8  ;;  %v3932_v22 = vmul.f32 %v907_v51, %v3552_v49  ;;  %v1071_v23 = vpop.f32.mrf.mxu0  ;;  %v698_v13 = vadd.f32 %v695_v55, %v694_v20  ;;  %v920_v4 = vadd.f32 %v917_v29, %v916_v53  ;;  %v1292_v31 = vpop.f32.mrf.mxu1 }
 0x23b   :  { %v1139_v38 = vmul.f32 %v1071_v23, %v3574_v6  ;;  %v1360_v20 = vmul.f32 %v1292_v31, %v3590_v25  ;;  %v1884_v6 = vand.u32 2147483647, %v1880_v30  ;;  %v3956_v25 = vmul.f32 %v1326_v39, %v3849_v42  ;;  %v4642_v23 = vld [vmem:[#allocation21_spill] sm:$0xff] }
 0x23c   :  { %v686_v54 = vadd.f32 %v685_v32, %v683_v28  ;;  %v692_v9 = vmul.f32 %v685_v32, %v685_v32  ;;  %2474 = vmatmul.msk.f32.gmra.mxu2 %vm300_vm0, %v4641_v3  ;;  %2493 = vmatmul.msk.f32.gmra.mxu3 %vm300_vm0, %v4641_v3  ;;  %v666_v37 = vmul.f32 %v665_v24, %v664_v12  ;;  %v1442_v32 = vand.u32 2147483647, %v1438_v17 }
 0x23d   :  { %v1142_v60 = vadd.f32 %v1141_v18, %v1139_v38  ;;  %2512 = vmatmul.msk.f32.gmra.mxu0 %vm300_vm0, %v4641_v3  ;;  %v1106_v18 = vmul.f32 %v1105_v57, %v3835_v10  ;;  %v1363_v21 = vadd.f32 %v1362_v45, %v1360_v20  ;;  %v1888_v30 = vsub.f32 1.0, %v1884_v6 }
 0x23e   :  { %v689_v53 = vperm.slane %v686_v54, 0  ;;  %v3950_v28 = vadd.f32 %v692_v9, %v668_v56  ;;  %2531 = vmatmul.msk.f32.gmra.mxu1 %vm300_vm0, %v4641_v3  ;;  %v1881_v57 = vsub.f32 %v4642_v23, %v3877_v59  ;;  %v2102_v39 = vsub.f32 %v4642_v23, %v3903_v62 }
 0x23f   :  { %v627_v46 = vpop.f32.mrf.mxu2  ;;  %v850_v50 = vpop.f32.mrf.mxu3  ;;  %v2109_v26 = vsub.f32 1.0, %v2105_v7  ;;  %v3969_v24 = vadd.f32 %v1106_v18, %v3882_v19  ;;  %v1663_v56 = vand.u32 2147483647, %v1659_v5  ;;  %v3972_v54 = vmul.f32 %v1106_v18, %v1106_v18  ;;  %v4643_v18 = vld [vmem:[#allocation20_spill] sm:$0xff] }
 0x240   :  { %v690_v51 = vmul.f32 %v689_v53, %v688_v34  ;;  %v696_v55 = vmul.f32 %v627_v46, %v3413_v63  ;;  %v918_v29 = vmul.f32 %v850_v50, %v3415_v41  ;;  %v3976_v9 = vadd.f32 %v3956_v25, %v3914_v58 }
 0x241   :  { %v3980_v3 = vadd.f32 %v3739_v52, %v3685_v61  ;;  %v1885_v12 = vand.u32 2147483647, %v1881_v57  ;;  %v2106_v34 = vand.u32 2147483647, %v2102_v39  ;;  %v3987_v58 = vmax.f32 %v1888_v30, 0.0 }
 0x242   :  { %v3966_v45 = vadd.f32 %v690_v51, %v666_v37  ;;  %v699_v48 = vadd.f32 %v698_v13, %v696_v55  ;;  %v921_v38 = vadd.f32 %v920_v4, %v918_v29  ;;  %v1074_v31 = vpop.f32.mrf.mxu0  ;;  %v1295_v41 = vpop.f32.mrf.mxu1  ;;  %v2561_v4 = vld [vmem:[#allocation2 + $0x78] sm:$0xff]  ;;  %v3989_v61 = vmax.f32 %v2109_v26, 0.0 }
 0x243   :  { %v1140_v63 = vmul.f32 %v1074_v31, %v3582_v16  ;;  %v1361_v13 = vmul.f32 %v1295_v41, %v3602_v47  ;;  %v1446_v16 = vsub.f32 1.0, %v1442_v32  ;;  %v1439_v47 = vsub.f32 %v4642_v23, %v3926_v36 }
 0x244   :  { %2475 = vmatmul.msk.f32.gmra.mxu2 %vm300_vm0, %v2561_v4  ;;  %2494 = vmatmul.msk.f32.gmra.mxu3 %vm300_vm0, %v2561_v4  ;;  %v1667_v53 = vsub.f32 1.0, %v1663_v56  ;;  %v1660_v7 = vsub.f32 %v4642_v23, %v3937_v1  ;;  %v1882_v46 = vsub.f32 %v4643_v18, %v3877_v59  ;;  %v2103_v37 = vsub.f32 %v4643_v18, %v3903_v62 }
 0x245   :  { %v1143_v19 = vadd.f32 %v1142_v60, %v1140_v63  ;;  %2513 = vmatmul.msk.f32.gmra.mxu0 %vm300_vm0, %v2561_v4  ;;  %v1364_v20 = vadd.f32 %v1363_v21, %v1361_v13  ;;  %v4001_v55 = vmax.f32 %v1446_v16, 0.0  ;;  %v1889_v29 = vsub.f32 1.0, %v1885_v12 }
 0x246   :  { %2532 = vmatmul.msk.f32.gmra.mxu1 %vm300_vm0, %v2561_v4  ;;  %v2110_v30 = vsub.f32 1.0, %v2106_v34  ;;  %v1443_v31 = vand.u32 2147483647, %v1439_v47  ;;  %v4003_v41 = vmax.f32 %v1667_v53, 0.0  ;;  %v1886_v56 = vand.u32 2147483647, %v1882_v46 }
 0x247   :  { %v1144_v6 = vrot.slane %v1143_v19, 4  ;;  %v630_v17 = vpop.f32.mrf.mxu2  ;;  %v853_v60 = vpop.f32.mrf.mxu3  ;;  %v1365_v21 = vrot.slane %v1364_v20, 4  ;;  %v4005_v16 = vmax.f32 %v1889_v29, 0.0  ;;  %v1440_v12 = vsub.f32 %v4643_v18, %v3926_v36 }
 0x248   :  { %v697_v50 = vmul.f32 %v630_v17, %v3443_v11  ;;  %v919_v5 = vmul.f32 %v853_v60, %v3445_v15  ;;  %v1664_v11 = vand.u32 2147483647, %v1660_v7  ;;  %v2107_v17 = vand.u32 2147483647, %v2103_v37 }
 0x249   :  { %v1145_v51 = vadd.f32 %v1144_v6, %v1143_v19  ;;  %v1366_v32 = vadd.f32 %v1365_v21, %v1364_v20  ;;  %v4011_v47 = vmax.f32 %v2110_v30, 0.0  ;;  %v1447_v7 = vsub.f32 1.0, %v1443_v31  ;;  %v4021_v30 = vld [vmem:[%s4485_s3 + $0xe] sm:$0x1] }
 0x24a   :  { %v700_v57 = vadd.f32 %v699_v48, %v697_v50  ;;  %v922_v39 = vadd.f32 %v921_v38, %v919_v5  ;;  %v1913_v23 = vpop.f32.mrf.mxu0  ;;  %v2134_v63 = vpop.f32.mrf.mxu1  ;;  %v1661_v48 = vsub.f32 %v4643_v18, %v3937_v1  ;;  %v1668_v46 = vsub.f32 1.0, %v1664_v11  ;;  %v4016_v50 = vld [vmem:[%s4485_s3 + $0xa] sm:$0x1] }
 0x24b   :  { %v1146_v26 = vrot.slane %v1145_v51, 2  ;;  %v1367_v15 = vrot.slane %v1366_v32, 2  ;;  %4644 = vst [vmem:[#allocation40_spill] sm:$0xff] %v4011_v47  ;;  %v1890_v21 = vsub.f32 1.0, %v1886_v56  ;;  %v2111_v18 = vsub.f32 1.0, %v2107_v17 }
 0x24c   :  { %v701_v13 = vrot.slane %v700_v57, 4  ;;  %v923_v4 = vrot.slane %v922_v39, 4  ;;  %v2182_v17 = vmul.f32 %v2134_v63, %v3989_v61 }
 0x24d   :  { %v1147_v19 = vadd.f32 %v1146_v26, %v1145_v51  ;;  %v1368_v38 = vadd.f32 %v1367_v15, %v1366_v32  ;;  %v1444_v32 = vand.u32 2147483647, %v1440_v12  ;;  %v2104_v15 = vsub.f32 %v2918_v44, %v3903_v62 }
 0x24e   :  { %v702_v34 = vadd.f32 %v701_v13, %v700_v57  ;;  %v924_v20 = vadd.f32 %v923_v4, %v922_v39  ;;  %v1665_v57 = vand.u32 2147483647, %v1661_v48  ;;  %v1883_v39 = vsub.f32 %v2918_v44, %v3877_v59 }
 0x24f   :  { %v1148_v6 = vrot.slane %v1147_v19, 1  ;;  %v1471_v60 = vpop.f32.mrf.mxu2  ;;  %v1692_v53 = vpop.f32.mrf.mxu3  ;;  %v1369_v5 = vrot.slane %v1368_v38, 1  ;;  %v1961_v4 = vmul.f32 %v1913_v23, %v3987_v58  ;;  %v929_v23 = vld [vmem:[%s4485_s3 + $0x6] sm:$0x1]  ;;  %v4051_v62 = vmax.f32 %v2111_v18, 0.0 }
 0x250   :  { %v703_v37 = vrot.slane %v702_v34, 2  ;;  %v925_v51 = vrot.slane %v924_v20, 2  ;;  %v1448_v59 = vsub.f32 1.0, %v1444_v32  ;;  %v1887_v2 = vand.u32 2147483647, %v1883_v39 }
 0x251   :  { %v1149_v29 = vadd.f32 %v1148_v6, %v1147_v19  ;;  %v1370_v31 = vadd.f32 %v1369_v5, %v1368_v38  ;;  %v4042_v5 = vmax.f32 %v1447_v7, 0.0  ;;  %v1669_v7 = vsub.f32 1.0, %v1665_v57  ;;  %v887_v57 = vld [vmem:[#allocation10 + $0x8] sm:$0xff] }
 0x252   :  { %v704_v26 = vadd.f32 %v703_v37, %v702_v34  ;;  %v926_v11 = vadd.f32 %v925_v51, %v924_v20  ;;  %v1916_v56 = vpop.f32.mrf.mxu0  ;;  %v2137_v12 = vpop.f32.mrf.mxu1  ;;  %v707_v20 = vld [vmem:[%s4485_s3 + $0x2] sm:$0x1]  ;;  %v4044_v37 = vmax.f32 %v1668_v46, 0.0  ;;  %v1519_v46 = vmul.f32 %v1471_v60, %v4001_v55 }
 0x253   :  { %v1151_v13 = vsub.f32 %v1149_v29, %v4016_v50  ;;  %v1962_v19 = vmul.f32 %v1916_v56, %v4005_v16  ;;  %v1372_v48 = vsub.f32 %v1370_v31, %v4021_v30  ;;  %v2183_v38 = vmul.f32 %v2137_v12, %v4011_v47 }
 0x254   :  { %v705_v6 = vrot.slane %v704_v26, 1  ;;  %v927_v0 = vrot.slane %v926_v11, 1  ;;  %v4049_v12 = vmax.f32 %v1890_v21, 0.0  ;;  %v909_v21 = vadd.f32 %v3932_v22, %v3897_v27 }
 0x255   :  { %v4034_v34 = vmul.f32 %v1151_v13, %v3835_v10  ;;  %v1965_v63 = vadd.f32 %v1962_v19, %v1961_v4  ;;  %v4047_v51 = vmul.f32 %v1372_v48, %v3849_v42  ;;  %v2186_v10 = vadd.f32 %v2183_v38, %v2182_v17 }
 0x256   :  { %v706_v29 = vadd.f32 %v705_v6, %v704_v26  ;;  %v928_v31 = vadd.f32 %v927_v0, %v926_v11  ;;  %v2108_v19 = vand.u32 2147483647, %v2104_v15  ;;  %v1740_v42 = vmul.f32 %v1692_v53, %v4003_v41 }
 0x257   :  { %v1474_v56 = vpop.f32.mrf.mxu2  ;;  %v1695_v13 = vpop.f32.mrf.mxu3  ;;  %v888_v11 = vperm.slane %v3980_v3, 0  ;;  %v1891_v48 = vsub.f32 1.0, %v1887_v2  ;;  %v891_v27 = vmul.f32 %v3739_v52, %v3739_v52  ;;  %v911_v2 = vperm.slane %v909_v21, 0  ;;  %v910_v52 = vld [vmem:[#allocation10 + $0x48] sm:$0xff] }
 0x258   :  { %v708_v47 = vsub.f32 %v706_v29, %v707_v20  ;;  %v930_v4 = vsub.f32 %v928_v31, %v929_v23  ;;  %v1520_v26 = vmul.f32 %v1474_v56, %v4042_v5  ;;  %v1741_v0 = vmul.f32 %v1695_v13, %v4044_v37  ;;  %v712_v31 = vld [vmem:[#allocation10 + $0x80] sm:$0xff] }
 0x259   :  { %v4063_v29 = vmax.f32 %v1448_v59, 0.0  ;;  %v2112_v3 = vsub.f32 1.0, %v2108_v19  ;;  %v889_v56 = vmul.f32 %v888_v11, %v887_v57  ;;  %v914_v59 = vmul.f32 %v3932_v22, %v3932_v22 }
 0x25a   :  { %v709_v18 = vmul.f32 %v708_v47, %v3550_v8  ;;  %v931_v32 = vmul.f32 %v930_v4, %v3552_v49  ;;  %v1919_v39 = vpop.f32.mrf.mxu0  ;;  %v1523_v15 = vadd.f32 %v1520_v26, %v1519_v46  ;;  %v1744_v17 = vadd.f32 %v1741_v0, %v1740_v42  ;;  %v2140_v53 = vpop.f32.mrf.mxu1 }
 0x25b   :  { %v1963_v60 = vmul.f32 %v1919_v39, %v4049_v12  ;;  %v2184_v49 = vmul.f32 %v2140_v53, %v4051_v62  ;;  %v4068_v47 = vmax.f32 %v1669_v7, 0.0  ;;  %v4073_v26 = vmax.f32 %v1891_v48, 0.0 }
 0x25c   :  { %v710_v6 = vadd.f32 %v709_v18, %v707_v20  ;;  %v716_v38 = vmul.f32 %v709_v18, %v709_v18  ;;  %v932_v46 = vadd.f32 %v931_v32, %v929_v23  ;;  %v4076_v18 = vmax.f32 %v2112_v3, 0.0  ;;  %v1108_v3 = vld [vmem:[#allocation10 + $0x10] sm:$0xff] }
 0x25d   :  { %v1966_v8 = vadd.f32 %v1965_v63, %v1963_v60  ;;  %v2187_v20 = vadd.f32 %v2186_v10, %v2184_v49  ;;  %v937_v23 = vmul.f32 %v931_v32, %v931_v32  ;;  %v1441_v22 = vsub.f32 %v2918_v44, %v3926_v36 }
 0x25e   :  { %v713_v13 = vperm.slane %v710_v6, 0  ;;  %v717_v4 = vadd.f32 %v716_v38, %v3950_v28  ;;  %v1130_v28 = vadd.f32 %v3889_v40, %v3863_v43  ;;  %v934_v39 = vperm.slane %v932_v46, 0  ;;  %v933_v6 = vld [vmem:[#allocation10 + $0x88] sm:$0xff] }
 0x25f   :  { %v1477_v19 = vpop.f32.mrf.mxu2  ;;  %v1698_v42 = vpop.f32.mrf.mxu3  ;;  %v1109_v53 = vperm.slane %v3969_v24, 0  ;;  %v912_v48 = vmul.f32 %v911_v2, %v910_v52 }
 0x260   :  { %v714_v63 = vmul.f32 %v713_v13, %v712_v31  ;;  %v892_v0 = vadd.f32 %v891_v27, %v717_v4  ;;  %v1521_v7 = vmul.f32 %v1477_v19, %v4063_v29  ;;  %v1742_v11 = vmul.f32 %v1698_v42, %v4068_v47  ;;  %v1131_v42 = vld [vmem:[#allocation10 + $0x50] sm:$0xff] }
 0x261   :  { %v1153_v27 = vadd.f32 %v4034_v34, %v4016_v50  ;;  %v1132_v13 = vperm.slane %v1130_v28, 0  ;;  %v1445_v4 = vand.u32 2147483647, %v1441_v22  ;;  %v935_v46 = vmul.f32 %v934_v39, %v933_v6  ;;  %v1329_v39 = vld [vmem:[#allocation10 + $0x18] sm:$0xff] }
 0x262   :  { %v715_v10 = vadd.f32 %v714_v63, %v3966_v45  ;;  %v915_v21 = vadd.f32 %v914_v59, %v892_v0  ;;  %v1524_v57 = vadd.f32 %v1523_v15, %v1521_v7  ;;  %v1922_v60 = vpop.f32.mrf.mxu0  ;;  %v4085_v38 = vadd.f32 %v1744_v17, %v1742_v11  ;;  %v2143_v32 = vpop.f32.mrf.mxu1 }
 0x263   :  { %v1964_v43 = vmul.f32 %v1922_v60, %v4073_v26  ;;  %v2185_v45 = vmul.f32 %v2143_v32, %v4076_v18  ;;  %v1135_v15 = vmul.f32 %v3889_v40, %v3889_v40  ;;  %v1110_v19 = vmul.f32 %v1109_v53, %v1108_v3  ;;  %v1352_v32 = vld [vmem:[#allocation10 + $0x58] sm:$0xff] }
 0x264   :  { %v890_v31 = vadd.f32 %v889_v56, %v715_v10  ;;  %v938_v49 = vadd.f32 %v937_v23, %v915_v21  ;;  %v1351_v50 = vadd.f32 %v3907_v14, %v3869_v33  ;;  %v1449_v56 = vsub.f32 1.0, %v1445_v4 }
 0x265   :  { %v4093_v24 = vadd.f32 %v1966_v8, %v1964_v43  ;;  %v4096_v59 = vadd.f32 %v2187_v20, %v2185_v45  ;;  %v1155_v0 = vperm.slane %v1153_v27, 0  ;;  %v1158_v40 = vmul.f32 %v4034_v34, %v4034_v34  ;;  %v1154_v20 = vld [vmem:[#allocation10 + $0x90] sm:$0xff] }
 0x266   :  { %v913_v17 = vadd.f32 %v912_v48, %v890_v31  ;;  %v1113_v2 = vadd.f32 %v3972_v54, %v938_v49  ;;  %v1330_v28 = vperm.slane %v3976_v9, 0  ;;  %v1333_v54 = vmul.f32 %v3956_v25, %v3956_v25 }
 0x267   :  { %v1480_v52 = vpop.f32.mrf.mxu2  ;;  %v1701_v63 = vpop.f32.mrf.mxu3  ;;  %v4105_v23 = vmax.f32 %v1449_v56, 0.0  ;;  %v1133_v11 = vmul.f32 %v1132_v13, %v1131_v42  ;;  %v1374_v33 = vadd.f32 %v4047_v51, %v4021_v30  ;;  %v1356_v34 = vmul.f32 %v3907_v14, %v3907_v14  ;;  %v1375_v13 = vld [vmem:[#allocation10 + $0x98] sm:$0xff] }
 0x268   :  { %v936_v8 = vadd.f32 %v935_v46, %v913_v17  ;;  %v1136_v7 = vadd.f32 %v1135_v15, %v1113_v2  ;;  %v1662_v9 = vsub.f32 %v2918_v44, %v3937_v1  ;;  %v1353_v53 = vperm.slane %v1351_v50, 0  ;;  %v4645_v46 = vld [vmem:[#allocation34_spill] sm:$0xff] }
 0x269   :  { %v1522_v60 = vmul.f32 %v1480_v52, %v4105_v23  ;;  %v1156_v48 = vmul.f32 %v1155_v0, %v1154_v20  ;;  %v1331_v27 = vmul.f32 %v1330_v28, %v1329_v39  ;;  %v1376_v31 = vperm.slane %v1374_v33, 0  ;;  %v4646_v0 = vld [vmem:[#allocation31_spill] sm:$0xff]  ;;  %v4647_v28 = vld [vmem:[#allocation41_spill] sm:$0xff]  ;;  %v4651_v39 = vld [vmem:[#allocation38_spill] sm:$0xff] }
 0x26a   :  { %v1111_v22 = vadd.f32 %v1110_v19, %v936_v8  ;;  %v1159_v10 = vadd.f32 %v1158_v40, %v1136_v7  ;;  %v1925_v21 = vpop.f32.mrf.mxu0  ;;  %v2146_v25 = vpop.f32.mrf.mxu1  ;;  %v1666_v30 = vand.u32 2147483647, %v1662_v9  ;;  %v1379_v14 = vmul.f32 %v4047_v51, %v4047_v51 }
 0x26b   :  { %v4114_v3 = vadd.f32 %v1524_v57, %v1522_v60  ;;  %v1354_v17 = vmul.f32 %v1353_v53, %v1352_v32  ;;  %vm1847_vm0 = vcmp.ge.f32.partialorder %v4645_v46, 0.0  ;;  %vm1848_vm12 = vcmp.le.f32.partialorder %v4645_v46, %v3417_v35 }
 0x26c   :  { %v1134_v6 = vadd.f32 %v1133_v11, %v1111_v22  ;;  %v1334_v43 = vadd.f32 %v1333_v54, %v1159_v10  ;;  %v1670_v15 = vsub.f32 1.0, %v1666_v30  ;;  %v1975_v19 = vmul.f32 %v1925_v21, %v3987_v58  ;;  %vm1849_vm2 = vmand %vm1847_vm0, %vm1848_vm12  ;;  %v4648_v54 = vld [vmem:[#allocation40_spill] sm:$0xff]  ;;  %v4650_v21 = vld [vmem:[#allocation18_spill] sm:$0xff] }
 0x26d   :  { %v1377_v50 = vmul.f32 %v1376_v31, %v1375_v13  ;;  %v2196_v56 = vmul.f32 %v2146_v25, %v3989_v61  ;;  %vm1850_vm3 = vcmp.ge.f32.partialorder %v4646_v0, 0.0  ;;  %vm1854_vm4 = vcmp.ge.f32.partialorder %v4647_v28, 0.0  ;;  %v4649_v10 = vld [vmem:[#allocation48_spill] sm:$0xff]  ;;  %v4655_v31 = vld [vmem:[#allocation37_spill] sm:$0xff] }
 0x26e   :  { %v1157_v49 = vadd.f32 %v1156_v48, %v1134_v6  ;;  %v1357_v45 = vadd.f32 %v1356_v34, %v1334_v43  ;;  %v4121_v2 = vmax.f32 %v1670_v15, 0.0  ;;  %vm1855_vm5 = vcmp.le.f32.partialorder %v4647_v28, 31.0  ;;  %vm1851_vm6 = vmand %vm1849_vm2, %vm1850_vm3  ;;  %v4654_v6 = vld [vmem:[#allocation42_spill] sm:$0xff] }
 0x26f   :  { %v1483_v4 = vpop.f32.mrf.mxu2  ;;  %v1704_v44 = vpop.f32.mrf.mxu3  ;;  %vm1852_vm7 = vcmp.le.f32.partialorder %v4646_v0, %v4649_v10  ;;  %vm1856_vm8 = vmand %vm1854_vm4, %vm1855_vm5  ;;  %vm1857_vm9 = vcmp.ge.f32.partialorder %v4650_v21, 0.0  ;;  %vm2068_vm10 = vcmp.ge.f32.partialorder %v4651_v39, 0.0  ;;  %vm2069_vm13 = vcmp.le.f32.partialorder %v4651_v39, %v3417_v35  ;;  %v4662_v0 = vld [vmem:[#allocation23_spill] sm:$0xff] }
 0x270   :  { %v1332_v57 = vadd.f32 %v1331_v27, %v1157_v49  ;;  %v4124_v42 = vadd.f32 %v1379_v14, %v1357_v45  ;;  %v1743_v40 = vmul.f32 %v1701_v63, %v4121_v2  ;;  %v1533_v9 = vmul.f32 %v1483_v4, %v4001_v55  ;;  %vm4148_vm14 = vmand %vm1851_vm6, %vm1852_vm7  ;;  %v4656_v14 = vld [vmem:[#allocation36_spill] sm:$0xff] }
 0x271   :  { %vm2075_vm15 = vcmp.ge.f32.partialorder %v4654_v6, 0.0  ;;  %vm2076_vm1 = vcmp.le.f32.partialorder %v4654_v6, 31.0  ;;  %vm1858_vm11 = vmand %vm1856_vm8, %vm1857_vm9  ;;  %vm1859_vm0 = vcmp.le.f32.partialorder %v4650_v21, 31.0  ;;  %v1968_v27 = vrot.slane %v4093_v24, 4  ;;  %v4671_v6 = vld [vmem:[#allocation26_spill] sm:$0xff] }
 0x272   :  { %v1928_v51 = vpop.f32.mrf.mxu0  ;;  %v1355_v52 = vadd.f32 %v1354_v17, %v1332_v57  ;;  %v2149_v7 = vpop.f32.mrf.mxu1  ;;  %v4136_v33 = vadd.f32 %v4085_v38, %v1743_v40  ;;  %v1754_v38 = vmul.f32 %v1704_v44, %v4003_v41  ;;  %vm2070_vm12 = vmand %vm2068_vm10, %vm2069_vm13  ;;  %vm2071_vm2 = vcmp.ge.f32.partialorder %v4655_v31, 0.0  ;;  %v4659_v44 = vld [vmem:[#allocation24_spill] sm:$0xff] }
 0x273   :  { %v1976_v8 = vmul.f32 %v1928_v51, %v4005_v16  ;;  %v2197_v20 = vmul.f32 %v2149_v7, %v4648_v54  ;;  %v2189_v49 = vrot.slane %v4096_v59, 4  ;;  %vm2077_vm3 = vmand %vm2075_vm15, %vm2076_vm1  ;;  %vm2078_vm4 = vcmp.ge.f32.partialorder %v4656_v14, 0.0 }
 0x274   :  { %v4133_v11 = vadd.f32 %v1377_v50, %v1355_v52  ;;  %vm4166_vm5 = vmand %vm1858_vm11, %vm1859_vm0  ;;  %vm1405_vm6 = vcmp.ge.f32.partialorder %v4659_v44, 0.0  ;;  %vm1406_vm7 = vcmp.le.f32.partialorder %v4659_v44, %v3417_v35  ;;  %vm2073_vm9 = vcmp.le.f32.partialorder %v4655_v31, %v4649_v10 }
 0x275   :  { %v1979_v22 = vadd.f32 %v1976_v8, %v1975_v19  ;;  %v2200_v63 = vadd.f32 %v2197_v20, %v2196_v56  ;;  %vm4173_vm8 = vmand %vm2070_vm12, %vm2071_vm2  ;;  %v1969_v19 = vadd.f32 %v1968_v27, %v4093_v24  ;;  %vm2080_vm13 = vcmp.le.f32.partialorder %v4656_v14, 31.0 }
 0x276   :  { %vm2079_vm10 = vmand %vm2077_vm3, %vm2078_vm4  ;;  %v2190_v50 = vadd.f32 %v2189_v49, %v4096_v59  ;;  %v1526_v56 = vrot.slane %v4114_v3, 4  ;;  %vm1408_vm1 = vcmp.ge.f32.partialorder %v4662_v0, 0.0  ;;  %v1747_v40 = vrot.slane %v4136_v33, 4 }
 0x277   :  { %v1486_v34 = vpop.f32.mrf.mxu2  ;;  %v1707_v60 = vpop.f32.mrf.mxu3  ;;  %vm1407_vm15 = vmand %vm1405_vm6, %vm1406_vm7  ;;  %vm1410_vm12 = vcmp.le.f32.partialorder %v4662_v0, %v4649_v10 }
 0x278   :  { %v1534_v25 = vmul.f32 %v1486_v34, %v4042_v5  ;;  %v1755_v53 = vmul.f32 %v1707_v60, %v4044_v37  ;;  %vm4189_vm11 = vmand %vm4173_vm8, %vm2073_vm9  ;;  %v2191_v21 = vrot.slane %v2190_v50, 2  ;;  %v1527_v39 = vadd.f32 %v1526_v56, %v4114_v3  ;;  %v4668_v3 = vld [vmem:[#allocation28_spill] sm:$0xff] }
 0x279   :  { %vm4193_vm0 = vmand %vm2079_vm10, %vm2080_vm13  ;;  %vm1415_vm8 = vcmp.ge.f32.partialorder %v3926_v36, 0.0  ;;  %vm1626_vm9 = vcmp.ge.f32.partialorder %v4668_v3, 0.0  ;;  %vm1627_vm10 = vcmp.le.f32.partialorder %v4668_v3, %v3417_v35 }
 0x27a   :  { %v1537_v43 = vadd.f32 %v1534_v25, %v1533_v9  ;;  %v1758_v32 = vadd.f32 %v1755_v53, %v1754_v38  ;;  %v1931_v30 = vpop.f32.mrf.mxu0  ;;  %v2152_v13 = vpop.f32.mrf.mxu1  ;;  %vm1409_vm2 = vmand %vm1407_vm15, %vm1408_vm1  ;;  %v4667_v9 = vld [vmem:[#allocation32_spill] sm:$0xff]  ;;  %v1748_v38 = vadd.f32 %v1747_v40, %v4136_v33  ;;  %vm1629_vm15 = vcmp.ge.f32.partialorder %v4671_v6, 0.0 }
 0x27b   :  { %v1977_v45 = vmul.f32 %v1931_v30, %v4049_v12  ;;  %v2198_v15 = vmul.f32 %v2152_v13, %v4051_v62  ;;  %vm1412_vm4 = vcmp.ge.f32.partialorder %v4667_v9, 0.0  ;;  %vm1413_vm6 = vcmp.le.f32.partialorder %v4667_v9, 31.0  ;;  %vm4220_vm13 = vmand %vm1409_vm2, %vm1410_vm12 }
 0x27c   :  { %v2192_v27 = vadd.f32 %v2191_v21, %v2190_v50  ;;  %vm4231_vm3 = vmand %vm1412_vm4, %vm1413_vm6  ;;  %v1528_v31 = vrot.slane %v1527_v39, 2  ;;  %vm1417_vm2 = vcmp.le.f32.partialorder %v3926_v36, 31.0  ;;  %vm1638_vm4 = vcmp.le.f32.partialorder %v3937_v1, 31.0 }
 0x27d   :  { %v1980_v17 = vadd.f32 %v1979_v22, %v1977_v45  ;;  %v2201_v57 = vadd.f32 %v2200_v63, %v2198_v15  ;;  %v1970_v63 = vrot.slane %v1969_v19, 2  ;;  %vm4237_vm12 = vmand %vm1626_vm9, %vm1627_vm10  ;;  %v1749_v15 = vrot.slane %v1748_v38, 2 }
 0x27e   :  { %vm1636_vm9 = vcmp.ge.f32.partialorder %v3937_v1, 0.0  ;;  %vm4259_vm10 = vmand %vm4231_vm3, %vm1415_vm8  ;;  %v4683_v9 = vmov 0.0  }
 0x27f   :  { %v1489_v51 = vpop.f32.mrf.mxu2  ;;  %v1710_v52 = vpop.f32.mrf.mxu3  ;;  %v1971_v30 = vadd.f32 %v1970_v63, %v1969_v19  ;;  %vm4684_vm8 = vmand %vm4148_vm14, %vm4166_vm5  ;;  %vm4688_vm14 = vcmp.le.f32.partialorder %v4671_v6, %v4649_v10 }
 0x280   :  { %v1535_v8 = vmul.f32 %v1489_v51, %v4063_v29  ;;  %v1756_v7 = vmul.f32 %v1710_v52, %v4068_v47 }
 0x281   :  { %v1972_v40 = vrot.slane %v1971_v30, 1 }
 0x282   :  { %v1538_v28 = vadd.f32 %v1537_v43, %v1535_v8  ;;  %v1759_v20 = vadd.f32 %v1758_v32, %v1756_v7  ;;  %v1934_v22 = vpop.f32.mrf.mxu0  ;;  %v2155_v60 = vpop.f32.mrf.mxu1  ;;  %v4672_v43 = vld [vmem:[#allocation35_spill] sm:$0xff]  ;;  %v2193_v8 = vrot.slane %v2192_v27, 1  ;;  %v1529_v7 = vadd.f32 %v1528_v31, %v1527_v39 }
 0x283   :  { %v1978_v34 = vmul.f32 %v1934_v22, %v4073_v26  ;;  %v2199_v25 = vmul.f32 %v2155_v60, %v4076_v18  ;;  %vm1633_vm1 = vcmp.ge.f32.partialorder %v4672_v43, 0.0  ;;  %vm1634_vm7 = vcmp.le.f32.partialorder %v4672_v43, 31.0 }
 0x284   :  { %vm4250_vm6 = vmand %vm1633_vm1, %vm1634_vm7  ;;  %v2497_v39 = vsel %vm4684_vm8, 1.0, %v4683_v9  ;;  %v1973_v43 = vadd.f32 %v1972_v40, %v1971_v30  ;;  %v1530_v35 = vrot.slane %v1529_v7, 1 }
 0x285   :  { %v1981_v53 = vadd.f32 %v1980_v17, %v1978_v34  ;;  %v2202_v32 = vadd.f32 %v2201_v57, %v2199_v25  ;;  %vm1630_vm7 = vmand %vm4237_vm12, %vm1629_vm15 }
 0x286   :  { %vm4274_vm3 = vmand %vm4250_vm6, %vm1636_vm9 }
 0x287   :  { %v1982_v49 = vrot.slane %v1981_v53, 4  ;;  %v1492_v45 = vpop.f32.mrf.mxu2  ;;  %v1713_v13 = vpop.f32.mrf.mxu3  ;;  %v2203_v44 = vrot.slane %v2202_v32, 4  ;;  %vm4288_vm15 = vmand %vm4259_vm10, %vm1417_vm2  ;;  %vm2269_vm2 = vcmask 7168  }
 0x288   :  { %v1536_v17 = vmul.f32 %v1492_v45, %v4105_v23  ;;  %v1757_v46 = vmul.f32 %v1713_v13, %v4121_v2  ;;  %vm4687_vm1 = vmand %vm4189_vm11, %vm4193_vm0  ;;  %v4327_v13 = vld [vmem:[%s4485_s3 + $0x1c] sm:$0x1] }
 0x289   :  { %v1983_v19 = vadd.f32 %v1982_v49, %v1981_v53  ;;  %v2204_v56 = vadd.f32 %v2203_v44, %v2202_v32  ;;  %v2516_v48 = vsel %vm4687_vm1, 1.0, %v4683_v9  ;;  %vm4301_vm5 = vmand %vm1630_vm7, %vm4688_vm14  ;;  %v2194_v32 = vadd.f32 %v2193_v8, %v2192_v27  ;;  %v4318_v49 = vld [vmem:[%s4485_s3 + $0x18] sm:$0x1] }
 0x28a   :  { %v1539_v51 = vadd.f32 %v1538_v28, %v1536_v17  ;;  %v1760_v52 = vadd.f32 %v1759_v20, %v1757_v46  ;;  %v4264_v0 = vpop.f32.mrf.mxu0  ;;  %v4270_v63 = vpop.f32.mrf.mxu1  ;;  %v1750_v28 = vadd.f32 %v1749_v15, %v1748_v38  ;;  %vm4309_vm12 = vmand %vm4274_vm3, %vm1638_vm4  ;;  %v4333_v46 = vmul.f32 %v2497_v39, %v1973_v43 }
 0x28b   :  { %v1984_v22 = vrot.slane %v1983_v19, 2  ;;  %v2205_v20 = vrot.slane %v2204_v56, 2  ;;  %vm1419_vm11 = vmand %vm4220_vm13, %vm4288_vm15  ;;  %v4335_v57 = vmul.f32 %v2516_v48, %v2194_v32  ;;  %vm2313_vm13 = vcmask 1040384  }
 0x28c   :  { %v1540_v34 = vrot.slane %v1539_v51, 4  ;;  %v1761_v60 = vrot.slane %v1760_v52, 4  ;;  %v1751_v31 = vrot.slane %v1750_v28, 1  ;;  %vm1640_vm0 = vmand %vm4301_vm5, %vm4309_vm12 }
 0x28d   :  { %v1985_v3 = vadd.f32 %v1984_v22, %v1983_v19  ;;  %v2206_v36 = vadd.f32 %v2205_v20, %v2204_v56  ;;  %v1531_v19 = vadd.f32 %v1530_v35, %v1529_v7  ;;  %v2459_v22 = vsel %vm1419_vm11, 1.0, %v4683_v9  ;;  %v4357_v20 = vld [vmem:[%s4485_s3 + $0x14] sm:$0x1] }
 0x28e   :  { %v1541_v38 = vadd.f32 %v1540_v34, %v1539_v51  ;;  %v1762_v53 = vadd.f32 %v1761_v60, %v1760_v52  ;;  %v1752_v51 = vadd.f32 %v1751_v31, %v1750_v28  ;;  %v2478_v21 = vsel %vm1640_vm0, 1.0, %v4683_v9  ;;  %v1546_v28 = vld [vmem:[%s4485_s3 + $0x10] sm:$0x1] }
 0x28f   :  { %v1986_v59 = vrot.slane %v1985_v3, 1  ;;  %v1495_v10 = vpop.f32.mrf.mxu2  ;;  %v4313_v6 = vpop.f32.mrf.mxu3  ;;  %v2207_v30 = vrot.slane %v2206_v36, 1 }
 0x290   :  { %v1542_v27 = vrot.slane %v1541_v38, 2  ;;  %v1763_v45 = vrot.slane %v1762_v53, 2  ;;  %v4364_v48 = vmul.f32 %v2478_v21, %v1752_v51 }
 0x291   :  { %v1987_v1 = vadd.f32 %v1986_v59, %v1985_v3  ;;  %v2208_v14 = vadd.f32 %v2207_v30, %v2206_v36  ;;  %v4362_v3 = vmul.f32 %v2459_v22, %v1531_v19  ;;  %v1550_v59 = vld [vmem:[#allocation10 + $0x20] sm:$0xff] }
 0x292   :  { %v1543_v15 = vadd.f32 %v1542_v27, %v1541_v38  ;;  %v1764_v44 = vadd.f32 %v1763_v45, %v1762_v53  ;;  %v1940_v17 = vpop.f32.mrf.mxu0  ;;  %v4338_v56 = vpop.f32.mrf.mxu1 }
 0x293   :  { %v1989_v50 = vsub.f32 %v1987_v1, %v4318_v49  ;;  %v2210_v8 = vsub.f32 %v2208_v14, %v4327_v13 }
 0x294   :  { %v1544_v52 = vrot.slane %v1543_v15, 1  ;;  %v1765_v40 = vrot.slane %v1764_v44, 1 }
 0x295   :  { %v4349_v7 = vmul.f32 %v1989_v50, %v4333_v46  ;;  %v4360_v60 = vmul.f32 %v2210_v8, %v4335_v57  ;;  %v1556_v50 = vmul.f32 %v1495_v10, %v4001_v55  ;;  %v1998_v10 = vmul.f32 %v4264_v0, %v3987_v58 }
 0x296   :  { %v1545_v34 = vadd.f32 %v1544_v52, %v1543_v15  ;;  %v1766_v33 = vadd.f32 %v1765_v40, %v1764_v44  ;;  %v2220_v0 = vmul.f32 %v4338_v56, %v4648_v54 }
 0x297   :  { %v1498_v39 = vpop.f32.mrf.mxu2  ;;  %v1719_v25 = vpop.f32.mrf.mxu3 }
 0x298   :  { %v1547_v4 = vsub.f32 %v1545_v34, %v1546_v28  ;;  %v1768_v36 = vsub.f32 %v1766_v33, %v4357_v20  ;;  %v1557_v15 = vmul.f32 %v1498_v39, %v4042_v5  ;;  %v1778_v39 = vmul.f32 %v1719_v25, %v4044_v37 }
 0x29a   :  { %v1548_v38 = vmul.f32 %v1547_v4, %v4362_v3  ;;  %v4369_v53 = vmul.f32 %v1768_v36, %v4364_v48  ;;  %v1943_v43 = vpop.f32.mrf.mxu0  ;;  %v2164_v32 = vpop.f32.mrf.mxu1  ;;  %v1560_v52 = vadd.f32 %v1557_v15, %v1556_v50 }
 0x29c   :  { %v1549_v35 = vadd.f32 %v1548_v38, %v1546_v28  ;;  %v1554_v24 = vmul.f32 %v1548_v38, %v1548_v38 }
 0x29e   :  { %v1551_v31 = vperm.slane %v1549_v35, 0  ;;  %v4372_v30 = vadd.f32 %v1554_v24, %v4124_v42  ;;  %v1999_v35 = vmul.f32 %v1940_v17, %v4005_v16  ;;  %v1777_v24 = vmul.f32 %v4313_v6, %v4003_v41  ;;  %v1569_v6 = vld [vmem:[%s4485_s3 + $0x11] sm:$0x1] }
 0x29f   :  { %v1501_v27 = vpop.f32.mrf.mxu2  ;;  %v1722_v1 = vpop.f32.mrf.mxu3  ;;  %v2000_v17 = vmul.f32 %v1943_v43, %v4049_v12 }
 0x2a0   :  { %v1552_v45 = vmul.f32 %v1551_v31, %v1550_v59  ;;  %v1558_v51 = vmul.f32 %v1501_v27, %v4063_v29  ;;  %v1779_v59 = vmul.f32 %v1722_v1, %v4068_v47  ;;  %v1781_v15 = vadd.f32 %v1778_v39, %v1777_v24 }
 0x2a1   :  { %v2221_v39 = vmul.f32 %v2164_v32, %v4051_v62  ;;  %v1573_v32 = vld [vmem:[#allocation10 + $0x60] sm:$0xff] }
 0x2a2   :  { %v4375_v14 = vadd.f32 %v1552_v45, %v4133_v11  ;;  %v1946_v44 = vpop.f32.mrf.mxu0  ;;  %v2167_v19 = vpop.f32.mrf.mxu1  ;;  %v1561_v8 = vadd.f32 %v1560_v52, %v1558_v51  ;;  %v2219_v51 = vmul.f32 %v4270_v63, %v3989_v61  ;;  %v2002_v52 = vadd.f32 %v1999_v35, %v1998_v10 }
 0x2a3   :  { %v1782_v1 = vadd.f32 %v1781_v15, %v1779_v59 }
 0x2a4   :  { %v2003_v63 = vadd.f32 %v2002_v52, %v2000_v17 }
 0x2a7   :  { %v1504_v40 = vpop.f32.mrf.mxu2  ;;  %v1725_v22 = vpop.f32.mrf.mxu3 }
 0x2a8   :  { %v1559_v42 = vmul.f32 %v1504_v40, %v4105_v23  ;;  %v1780_v25 = vmul.f32 %v1725_v22, %v4121_v2 }
 0x2aa   :  { %v1562_v21 = vadd.f32 %v1561_v8, %v1559_v42  ;;  %v1949_v28 = vpop.f32.mrf.mxu0  ;;  %v2170_v34 = vpop.f32.mrf.mxu1  ;;  %v2001_v8 = vmul.f32 %v1946_v44, %v4073_v26  ;;  %v1783_v22 = vadd.f32 %v1782_v1, %v1780_v25 }
 0x2ab   :  { %v2242_v43 = vmul.f32 %v2170_v34, %v3989_v61  ;;  %v2021_v24 = vmul.f32 %v1949_v28, %v3987_v58 }
 0x2ac   :  { %v1563_v33 = vrot.slane %v1562_v21, 4  ;;  %v2004_v35 = vadd.f32 %v2003_v63, %v2001_v8 }
 0x2ae   :  { %v1564_v11 = vadd.f32 %v1563_v33, %v1562_v21  ;;  %v2005_v34 = vrot.slane %v2004_v35, 4 }
 0x2af   :  { %v4381_v4 = vpop.f32.mrf.mxu2  ;;  %v4384_v38 = vpop.f32.mrf.mxu3 }
 0x2b0   :  { %v1565_v36 = vrot.slane %v1564_v11, 2  ;;  %v2006_v8 = vadd.f32 %v2005_v34, %v2004_v35 }
 0x2b2   :  { %v1566_v31 = vadd.f32 %v1565_v36, %v1564_v11  ;;  %v1952_v27 = vpop.f32.mrf.mxu0  ;;  %v2223_v11 = vadd.f32 %v2220_v0, %v2219_v51  ;;  %v2222_v51 = vmul.f32 %v2167_v19, %v4076_v18  ;;  %v2007_v35 = vrot.slane %v2006_v8, 2 }
 0x2b3   :  { %v2173_v45 = vpop.f32.mrf.mxu1  ;;  %v2022_v44 = vmul.f32 %v1952_v27, %v4005_v16 }
 0x2b4   :  { %v1567_v50 = vrot.slane %v1566_v31, 1  ;;  %v2243_v36 = vmul.f32 %v2173_v45, %v4648_v54  ;;  %v2224_v25 = vadd.f32 %v2223_v11, %v2221_v39 }
 0x2b5   :  { %v2025_v45 = vadd.f32 %v2022_v44, %v2021_v24 }
 0x2b6   :  { %v1568_v40 = vadd.f32 %v1567_v50, %v1566_v31  ;;  %v1784_v50 = vrot.slane %v1783_v22, 4  ;;  %v2246_v61 = vadd.f32 %v2243_v36, %v2242_v43 }
 0x2b7   :  { %v1510_v42 = vpop.f32.mrf.mxu2  ;;  %v1731_v33 = vpop.f32.mrf.mxu3 }
 0x2b8   :  { %v1570_v21 = vsub.f32 %v1568_v40, %v1569_v6  ;;  %v1785_v27 = vadd.f32 %v1784_v50, %v1783_v22  ;;  %v1580_v19 = vmul.f32 %v1510_v42, %v4042_v5  ;;  %v1579_v22 = vmul.f32 %v4381_v4, %v4001_v55 }
 0x2b9   :  { %v1800_v5 = vmul.f32 %v4384_v38, %v4003_v41 }
 0x2ba   :  { %v1571_v56 = vmul.f32 %v1570_v21, %v4362_v3  ;;  %v1955_v10 = vpop.f32.mrf.mxu0  ;;  %v1801_v21 = vmul.f32 %v1731_v33, %v4044_v37  ;;  %v1583_v43 = vadd.f32 %v1580_v19, %v1579_v22 }
 0x2bb   :  { %v2176_v59 = vpop.f32.mrf.mxu1  ;;  %v2023_v58 = vmul.f32 %v1955_v10, %v4049_v12  ;;  %v1786_v12 = vrot.slane %v1785_v27, 2 }
 0x2bc   :  { %v1572_v31 = vadd.f32 %v1571_v56, %v1569_v6  ;;  %v1577_v15 = vmul.f32 %v1571_v56, %v1571_v56  ;;  %v2244_v54 = vmul.f32 %v2176_v59, %v4051_v62  ;;  %v2225_v6 = vadd.f32 %v2224_v25, %v2222_v51 }
 0x2bd   :  { %v2026_v62 = vadd.f32 %v2025_v45, %v2023_v58  ;;  %v1804_v36 = vadd.f32 %v1801_v21, %v1800_v5  ;;  %v1787_v24 = vadd.f32 %v1786_v12, %v1785_v27  ;;  %v2008_v51 = vadd.f32 %v2007_v35, %v2006_v8  ;;  %v2011_v12 = vld [vmem:[%s4485_s3 + $0x19] sm:$0x1] }
 0x2be   :  { %v1574_v52 = vperm.slane %v1572_v31, 0  ;;  %v4410_v0 = vadd.f32 %v1577_v15, %v4372_v30  ;;  %v2247_v40 = vadd.f32 %v2246_v61, %v2244_v54  ;;  %v2226_v33 = vrot.slane %v2225_v6, 4 }
 0x2bf   :  { %v1513_v16 = vpop.f32.mrf.mxu2  ;;  %v1734_v17 = vpop.f32.mrf.mxu3  ;;  %v1788_v15 = vrot.slane %v1787_v24, 1 }
 0x2c0   :  { %v1575_v28 = vmul.f32 %v1574_v52, %v1573_v32  ;;  %v1581_v39 = vmul.f32 %v1513_v16, %v4063_v29  ;;  %v1802_v42 = vmul.f32 %v1734_v17, %v4068_v47  ;;  %v2227_v47 = vadd.f32 %v2226_v33, %v2225_v6 }
 0x2c1   :  { %v1789_v45 = vadd.f32 %v1788_v15, %v1787_v24  ;;  %v2009_v16 = vrot.slane %v2008_v51, 1 }
 0x2c2   :  { %v4415_v1 = vadd.f32 %v1575_v28, %v4375_v14  ;;  %v1958_v30 = vpop.f32.mrf.mxu0  ;;  %v1584_v44 = vadd.f32 %v1583_v43, %v1581_v39  ;;  %v1805_v4 = vadd.f32 %v1804_v36, %v1802_v42  ;;  %v2228_v54 = vrot.slane %v2227_v47, 2  ;;  %v1813_v39 = vld [vmem:[%s4485_s3 + $0x16] sm:$0x1]  ;;  %v2034_v36 = vld [vmem:[%s4485_s3 + $0x1a] sm:$0x1] }
 0x2c3   :  { %v2024_v11 = vmul.f32 %v1958_v30, %v4073_v26  ;;  %v2179_v63 = vpop.f32.mrf.mxu1  ;;  %v2010_v21 = vadd.f32 %v2009_v16, %v2008_v51  ;;  %v1991_v51 = vadd.f32 %v4349_v7, %v4318_v49 }
 0x2c4   :  { %v2245_v14 = vmul.f32 %v2179_v63, %v4076_v18  ;;  %v2229_v6 = vadd.f32 %v2228_v54, %v2227_v47 }
 0x2c5   :  { %v2027_v56 = vadd.f32 %v2026_v62, %v2024_v11  ;;  %v1592_v11 = vld [vmem:[%s4485_s3 + $0x12] sm:$0x1]  ;;  %v2012_v33 = vsub.f32 %v2010_v21, %v2011_v12 }
 0x2c6   :  { %v2248_v37 = vadd.f32 %v2247_v40, %v2245_v14  ;;  %v2230_v14 = vrot.slane %v2229_v6, 1 }
 0x2c7   :  { %v2028_v26 = vrot.slane %v2027_v56, 4  ;;  %v1516_v10 = vpop.f32.mrf.mxu2  ;;  %v1737_v29 = vpop.f32.mrf.mxu3 }
 0x2c8   :  { %v1582_v55 = vmul.f32 %v1516_v10, %v4105_v23  ;;  %v2249_v59 = vrot.slane %v2248_v37, 4  ;;  %v1803_v41 = vmul.f32 %v1737_v29, %v4121_v2  ;;  %v1790_v2 = vld [vmem:[%s4485_s3 + $0x15] sm:$0x1]  ;;  %v2231_v24 = vadd.f32 %v2230_v14, %v2229_v6  ;;  %v1817_v6 = vld [vmem:[#allocation10 + $0xa8] sm:$0xff] }
 0x2c9   :  { %v2029_v18 = vadd.f32 %v2028_v26, %v2027_v56  ;;  %v1791_v40 = vsub.f32 %v1789_v45, %v1790_v2 }
 0x2ca   :  { %v1585_v38 = vadd.f32 %v1584_v44, %v1582_v55  ;;  %v1806_v31 = vadd.f32 %v1805_v4, %v1803_v41  ;;  %v2250_v32 = vadd.f32 %v2249_v59, %v2248_v37  ;;  %v1770_v37 = vadd.f32 %v4369_v53, %v4357_v20  ;;  %v2232_v20 = vld [vmem:[%s4485_s3 + $0x1d] sm:$0x1] }
 0x2cb   :  { %v2030_v50 = vrot.slane %v2029_v18, 2  ;;  %v1792_v42 = vmul.f32 %v1791_v40, %v4364_v48  ;;  %v2013_v41 = vmul.f32 %v2012_v33, %v4333_v46  ;;  %v2038_v33 = vld [vmem:[#allocation10 + $0xb0] sm:$0xff] }
 0x2cc   :  { %v1586_v25 = vrot.slane %v1585_v38, 4  ;;  %v1807_v52 = vrot.slane %v1806_v31, 4  ;;  %v2251_v28 = vrot.slane %v2250_v32, 2  ;;  %v1772_v59 = vperm.slane %v1770_v37, 0 }
 0x2cd   :  { %v2031_v23 = vadd.f32 %v2030_v50, %v2029_v18  ;;  %v1793_v55 = vadd.f32 %v1792_v42, %v1790_v2 }
 0x2ce   :  { %v1587_v61 = vadd.f32 %v1586_v25, %v1585_v38  ;;  %v1808_v34 = vadd.f32 %v1807_v52, %v1806_v31  ;;  %v2252_v62 = vadd.f32 %v2251_v28, %v2250_v32  ;;  %v1596_v38 = vld [vmem:[#allocation10 + $0xa0] sm:$0xff]  ;;  %v1771_v31 = vld [vmem:[#allocation10 + $0x28] sm:$0xff]  ;;  %v2255_v25 = vld [vmem:[%s4485_s3 + $0x1e] sm:$0x1]  ;;  %v1798_v32 = vmul.f32 %v1792_v42, %v1792_v42 }
 0x2cf   :  { %v2032_v30 = vrot.slane %v2031_v23, 1  ;;  %v2233_v52 = vsub.f32 %v2231_v24, %v2232_v20 }
 0x2d0   :  { %v1588_v58 = vrot.slane %v1587_v61, 2  ;;  %v1809_v27 = vrot.slane %v1808_v34, 2  ;;  %v2253_v26 = vrot.slane %v2252_v62, 1 }
 0x2d1   :  { %v2033_v56 = vadd.f32 %v2032_v30, %v2031_v23  ;;  %v1773_v23 = vmul.f32 %v1772_v59, %v1771_v31  ;;  %v2234_v49 = vmul.f32 %v2233_v52, %v4335_v57  ;;  %v2236_v59 = vld [vmem:[#allocation10 + $0x78] sm:$0xff]  ;;  %v2267_v52 = vld [vmem:[%s4489_s7] sm:$0xff]  ;;  %s2688_s7 = smov [#allocation11]  }
 0x2d2   :  { %v1589_v17 = vadd.f32 %v1588_v58, %v1587_v61  ;;  %v1810_v19 = vadd.f32 %v1809_v27, %v1808_v34  ;;  %v2254_v47 = vadd.f32 %v2253_v26, %v2252_v62  ;;  %v1795_v61 = vperm.slane %v1793_v55, 0  ;;  %s2344_s5 = sshll.u32 %s2688_s7, 4  ;;  %s2345_s5 = int_to_ptr.vmem [resolvable:$true] %s2344_s5 }
 0x2d3   :  { %v2035_v29 = vsub.f32 %v2033_v56, %v2034_v36  ;;  %v2014_v58 = vadd.f32 %v2013_v41, %v2011_v12  ;;  %v2235_v42 = vadd.f32 %v2234_v49, %v2232_v20  ;;  %v2217_v26 = vmul.f32 %v4360_v60, %v4360_v60 }
 0x2d4   :  { %v1590_v8 = vrot.slane %v1589_v17, 1  ;;  %v1811_v63 = vrot.slane %v1810_v19, 1  ;;  %v2256_v16 = vsub.f32 %v2254_v47, %v2255_v25  ;;  %v2240_v55 = vmul.f32 %v2234_v49, %v2234_v49 }
 0x2d5   :  { %v2036_v34 = vmul.f32 %v2035_v29, %v4333_v46  ;;  %v1992_v46 = vld [vmem:[#allocation10 + $0x30] sm:$0xff]  ;;  %v2016_v62 = vperm.slane %v2014_v58, 0  ;;  %v2687_v49 = vmov 0  }
 0x2d6   :  { %v1591_v22 = vadd.f32 %v1590_v8, %v1589_v17  ;;  %v1812_v5 = vadd.f32 %v1811_v63, %v1810_v19  ;;  %v1993_v17 = vperm.slane %v1991_v51, 0  ;;  %v1996_v19 = vmul.f32 %v4349_v7, %v4349_v7  ;;  %2553 = vset.pattern.permute.xlu1 %v2687_v49  ;;  %2554 = vset.pattern.permute.xlu0 %v2687_v49 }
 0x2d7   :  { %v2037_v8 = vadd.f32 %v2036_v34, %v2034_v36  ;;  %v2042_v37 = vmul.f32 %v2036_v34, %v2036_v34 }
 0x2d8   :  { %v1593_v43 = vsub.f32 %v1591_v22, %v1592_v11  ;;  %v1814_v10 = vsub.f32 %v1812_v5, %v1813_v39  ;;  %v2257_v22 = vmul.f32 %v2256_v16, %v4335_v57  ;;  %v1994_v14 = vmul.f32 %v1993_v17, %v1992_v46  ;;  %v2015_v5 = vld [vmem:[#allocation10 + $0x70] sm:$0xff] }
 0x2d9   :  { %v2039_v7 = vperm.slane %v2037_v8, 0 }
 0x2da   :  { %v1594_v35 = vmul.f32 %v1593_v43, %v4362_v3  ;;  %v1815_v44 = vmul.f32 %v1814_v10, %v4364_v48  ;;  %v1775_v3 = vmul.f32 %v4369_v53, %v4369_v53  ;;  %v1794_v53 = vld [vmem:[#allocation10 + $0x68] sm:$0xff]  ;;  %v2258_v24 = vadd.f32 %v2257_v22, %v2255_v25 }
 0x2db   :  { %v1796_v40 = vmul.f32 %v1795_v61, %v1794_v53  ;;  %v2040_v29 = vmul.f32 %v2039_v7, %v2038_v33  ;;  %v2263_v31 = vmul.f32 %v2257_v22, %v2257_v22 }
 0x2dc   :  { %v1595_v4 = vadd.f32 %v1594_v35, %v1592_v11  ;;  %v1600_v18 = vmul.f32 %v1594_v35, %v1594_v35  ;;  %v1816_v50 = vadd.f32 %v1815_v44, %v1813_v39  ;;  %v1821_v28 = vmul.f32 %v1815_v44, %v1815_v44  ;;  %v2213_v35 = vld [vmem:[#allocation10 + $0x38] sm:$0xff] }
 0x2dd   :  { %v2212_v11 = vadd.f32 %v4360_v60, %v4327_v13  ;;  %v2017_v13 = vmul.f32 %v2016_v62, %v2015_v5 }
 0x2de   :  { %v1597_v15 = vperm.slane %v1595_v4, 0  ;;  %v1601_v48 = vadd.f32 %v1600_v18, %v4410_v0  ;;  %v1818_v2 = vperm.slane %v1816_v50, 0  ;;  %v2237_v4 = vperm.slane %v2235_v42, 0 }
 0x2df   :  { %v2214_v36 = vperm.slane %v2212_v11, 0 }
 0x2e0   :  { %v1598_v54 = vmul.f32 %v1597_v15, %v1596_v38  ;;  %v1776_v45 = vadd.f32 %v1775_v3, %v1601_v48  ;;  %v1819_v12 = vmul.f32 %v1818_v2, %v1817_v6  ;;  %v2260_v38 = vperm.slane %v2258_v24, 0  ;;  %v2259_v3 = vld [vmem:[#allocation10 + $0xb8] sm:$0xff] }
 0x2e1   :  { %v2215_v20 = vmul.f32 %v2214_v36, %v2213_v35  ;;  %v2238_v48 = vmul.f32 %v2237_v4, %v2236_v59 }
 0x2e2   :  { %v1599_v0 = vadd.f32 %v1598_v54, %v4415_v1  ;;  %v1799_v27 = vadd.f32 %v1798_v32, %v1776_v45  ;;  %v2019_v1 = vmul.f32 %v2013_v41, %v2013_v41  ;;  %v2261_v51 = vmul.f32 %v2260_v38, %v2259_v3 }
 0x2e4   :  { %v1774_v30 = vadd.f32 %v1773_v23, %v1599_v0  ;;  %v1822_v21 = vadd.f32 %v1821_v28, %v1799_v27  ;;  %v4693_v27 = vld [vmem:[#allocation19_spill] sm:$0xff] }
 0x2e5   :  { %vm2280_vm4 = vcmp.eq.s32.totalorder %v4693_v27, 5 }
 0x2e6   :  { %v1797_v63 = vadd.f32 %v1796_v40, %v1774_v30  ;;  %v1997_v39 = vadd.f32 %v1996_v19, %v1822_v21  ;;  %v2533_v17 = vsel %vm2280_vm4, 1.0, %v4683_v9 }
 0x2e8   :  { %v1820_v56 = vadd.f32 %v1819_v12, %v1797_v63  ;;  %v2020_v43 = vadd.f32 %v2019_v1, %v1997_v39 }
 0x2ea   :  { %v1995_v10 = vadd.f32 %v1994_v14, %v1820_v56  ;;  %v2043_v44 = vadd.f32 %v2042_v37, %v2020_v43 }
 0x2ec   :  { %v2018_v57 = vadd.f32 %v2017_v13, %v1995_v10  ;;  %v2218_v18 = vadd.f32 %v2217_v26, %v2043_v44 }
 0x2ee   :  { %v2041_v41 = vadd.f32 %v2040_v29, %v2018_v57  ;;  %v2241_v47 = vadd.f32 %v2240_v55, %v2218_v18 }
 0x2f0   :  { %v2216_v15 = vadd.f32 %v2215_v20, %v2041_v41  ;;  %v2264_v60 = vadd.f32 %v2263_v31, %v2241_v47 }
 0x2f2   :  { %v2239_v50 = vadd.f32 %v2238_v48, %v2216_v15  ;;  %v2314_v25 = vsel %vm2313_vm13, %v2264_v60, 0.0 }
 0x2f4   :  { %v2262_v32 = vadd.f32 %v2261_v51, %v2239_v50 }
 0x2f6   :  { %2265 = vadd.xlane.f32.xlu0 %v2262_v32 }
 0x2fe   :  { %2315 = vadd.xlane.f32.xlu0 %v2314_v25 }
 0x369   :  { %v2266_v61 = vpop.xlane.xlu0 %2265 }
 0x36a   :  { %v2268_v54 = vadd.f32 %v2267_v52, %v2266_v61 }
 0x36c   :  { %v2270_v34 = vsel %vm2269_vm2, %v2268_v54, -inf }
 0x36d   :  { %v2271_v45 = vrot.slane %v2270_v34, 4 }
 0x36f   :  { %v2272_v23 = vmax.f32 %v2270_v34, %v2271_v45 }
 0x371   :  { %v2273_v53 = vrot.slane %v2272_v23, 2  ;;  %v2316_v12 = vpop.xlane.xlu0 %2315 }
 0x372   :  { %v2317_v9 = vsub.f32 0.0, %v2316_v12 }
 0x373   :  { %v2274_v58 = vmax.f32 %v2272_v23, %v2273_v53 }
 0x374   :  { %v2318_v14 = vmul.f32 0.00032552084, %v2317_v9 }
 0x375   :  { %v2275_v16 = vrot.slane %v2274_v58, 1 }
 0x376   :  { %v2319_v43 = vmul.f32 1.442695, %v2318_v14 }
 0x377   :  { %v2276_v0 = vmax.f32 %v2274_v58, %v2275_v16 }
 0x379   :  { %v2277_v2 = vsub.f32 %v2268_v54, %v2276_v0 }
 0x37b   :  { %v2278_v28 = vmul.f32 1.442695, %v2277_v2 }
 0x37d   :  { %2555 = vpow2.f32 %v2278_v28 }
 0x383   :  { %v2556_v6 = vpop.eup %2555 }
 0x384   :  { %v2291_v19 = vsel %vm2269_vm2, %v2556_v6, 0.0  ;;  %v2283_v40 = vmul.f32 %v2556_v6, %v2533_v17 }
 0x385   :  { %v2292_v30 = vrot.slane %v2291_v19, 4 }
 0x386   :  { %v2284_v8 = vsel %vm2269_vm2, %v2283_v40, 0.0 }
 0x387   :  { %v2293_v46 = vadd.f32 %v2292_v30, %v2291_v19  ;;  %v2285_v11 = vrot.slane %v2284_v8, 4 }
 0x389   :  { %v2294_v21 = vrot.slane %v2293_v46, 2  ;;  %v2286_v22 = vadd.f32 %v2285_v11, %v2284_v8 }
 0x38b   :  { %v2295_v62 = vadd.f32 %v2294_v21, %v2293_v46  ;;  %v2287_v39 = vrot.slane %v2286_v22, 2 }
 0x38d   :  { %v2296_v1 = vrot.slane %v2295_v62, 1  ;;  %v2288_v42 = vadd.f32 %v2287_v39, %v2286_v22 }
 0x38f   :  { %v2297_v63 = vadd.f32 %v2296_v1, %v2295_v62  ;;  %v2289_v33 = vrot.slane %v2288_v42, 1 }
 0x391   :  { %2557 = vrcp.f32 %v2297_v63  ;;  %v2309_v37 = vand.u32 2147483648, %v2297_v63  ;;  %v2307_v26 = vand.u32 2147483647, %v2297_v63  ;;  %vm2303_vm9 = vweird.f32 %v2297_v63 }
 0x392   :  { %2559 = vpow2.f32 %v2319_v43  ;;  %v2290_v35 = vadd.f32 %v2289_v33, %v2288_v42 }
 0x393   :  { %v2310_v13 = vor.u32 1.1754944e-38, %v2309_v37  ;;  %vm2308_vm7 = vcmp.eq.f32.partialorder %v2307_v26, 8.507059e+37 }
 0x397   :  { %v2558_v5 = vpop.eup %2557 }
 0x398   :  { %v2299_v56 = vmul.f32 %v2558_v5, %v2297_v63  ;;  %vm2304_vm6 = vweird.f32 %v2558_v5  ;;  %v2560_v57 = vpop.eup %2559 }
 0x399   :  { %vm2305_vm10 = vmor %vm2303_vm9, %vm2304_vm6  ;;  %vm2325_vm8 = vcmp.lt.f32.partialorder %v2560_v57, 0.5  ;;  %v2322_v59 = vadd.f32 -1.0, %v2560_v57 }
 0x39a   :  { %v2300_v7 = vsub.f32 1.0, %v2299_v56 }
 0x39c   :  { %v2301_v36 = vmul.f32 %v2558_v5, %v2300_v7 }
 0x39e   :  { %v2302_v10 = vadd.f32 %v2558_v5, %v2301_v36 }
 0x3a0   :  { %v2306_v24 = vsel %vm2305_vm10, %v2558_v5, %v2302_v10 }
 0x3a1   :  { %v2311_v44 = vsel %vm2308_vm7, %v2310_v13, %v2306_v24 }
 0x3a2   :  { %v2312_v55 = vmul.f32 %v2311_v44, %v2290_v35 }
 0x3a4   :  { %v2327_v29 = vadd.f32 2.0, %v2312_v55  ;;  %v2323_v4 = vadd.f32 %v2560_v57, %v2312_v55  ;;  %vm2326_vm3 = vcmp.lt.f32.partialorder %v2312_v55, 1.0  ;;  %vm2321_vm1 = vcmp.lt.f32.partialorder %v2312_v55, 0.01 }
 0x3a6   :  { %v2328_v18 = vadd.f32 %v2560_v57, %v2327_v29  ;;  %vm2324_vm15 = vcmp.lt.f32.partialorder %v2323_v4, 1.0 }
 0x3a8   :  { %v2329_v20 = vsel %vm2326_vm3, %v2327_v29, %v2328_v18 }
 0x3a9   :  { %v2330_v41 = vsel %vm2325_vm8, %v2323_v4, %v2329_v20 }
 0x3aa   :  { %v2331_v38 = vsel %vm2324_vm15, %v2312_v55, %v2330_v41 }
 0x3ab   :  { %v2332_v47 = vsel %vm2321_vm1, %v2322_v59, %v2331_v38 }
 0x3ac   :  { %2335 = vperm.xlu1 %2553, %v2332_v47  }
 0x41e   :  { %v2336_v31 = vpop.permute.xlu1 %2335 }
 0x41f   :  { %2338 = vst [vmem:[#allocation11] sm:$0x1] %v2336_v31 }
 0x420   :  { %2349 = dma.vmem_to_hbm [thread:$0]  %s2345_s5, 16, %s2347_s18, [#allocation7]  }
 0x421   :  { %2676 = dma.done.wait [#allocation7], 16  }
 0x422   :  { %2677 = vsyncadd [#allocation7], 4294967280 }
 0x423   :  { %2354 = vsyncpa [#allocation6], 1 }
 0x424   :  { %2355 = vsyncpa [#allocation9], 1 }
 0x425   :  { %2356 = vsyncpa [#allocation7], 1 }

</bundles_post_ra>
